<compile_context>
chip_gen: v7x
topology: tpu7x:2x2x1
jax: 0.10.0
libtpu: 0.0.40
codegen_flags: <defaults>
</compile_context>

<pallas_src>
import math

import jax
import jax.numpy as jnp
from jax import lax
from jax.experimental import pallas as pl
from jax.experimental.pallas import tpu as pltpu

CP = 128           # every channel dimension is zero-padded to this lane width
NCP = 128          # padded class dimension (lane-dense FC output)
CIN_P = 4          # raw input channels padded to this
STEM_TAPS = 8      # stem k=7 conv padded to 8 taps (tap 7 has zero weight)


# ---------------------------------------------------------------------------
# In-kernel helpers (all shapes / indices are static Python values)
# ---------------------------------------------------------------------------
def _sel_rows(y, lo, offset):
    """Exact stride-2 row selection: out[l] = y[2*l + offset] (0.0 if out of range).

    Implemented as a 0/1 selection matmul (built from a 2-D iota) so no strided
    ref reads or in-kernel reshapes are needed; every product is y*1.0 or y*0.0,
    so the result is exact in f32.
    """
    lin = y.shape[0]
    r = lax.broadcasted_iota(jnp.int32, (lo, lin), 0)
    c = lax.broadcasted_iota(jnp.int32, (lo, lin), 1)
    e = (c == 2 * r + offset).astype(jnp.float32)
    return jnp.dot(e, y, preferred_element_type=jnp.float32)


def _conv3(a, w_im, pad_ref, lin):
    """k=3, stride=1, pad=1 conv of an (lin, CP) f32 value.

    `a` is written once into the halo scratch (zero rows at both ends), the three
    shifted windows are read back and lane-concatenated into an im2col slab, and
    the conv is one K=3*CP bf16 matmul with f32 accumulation (deep-K for the
    256-deep MXUs on v6e/v7x).
    """
    c = a.shape[1]
    zrow = jnp.zeros((1, c), jnp.float32)
    pad_ref[0:1, :] = zrow
    pad_ref[1:1 + lin, :] = a
    pad_ref[1 + lin:2 + lin, :] = zrow
    im = jnp.concatenate([pad_ref[k:k + lin, :] for k in range(3)], axis=1)
    return jnp.dot(im.astype(jnp.bfloat16), w_im,
                   preferred_element_type=jnp.float32)


def _make_kernel(plan):
    """Build the fused whole-network kernel for one batch sample (grid=(B,))."""
    l1 = plan["l1"]
    stem_bn = plan["stem_bn"]
    blocks = plan["blocks"]

    def kernel(x_ref, bns_ref, bnb_ref, wconv_ref, wds_ref, wstem_ref,
               wfc_ref, fcb_ref, o_ref, pad_ref):
        # ---- stem: Conv1d(k=7, s=2, p=3) (im2col'd in wrapper) + BN + ReLU ----
        acc = jnp.dot(x_ref[0].astype(jnp.bfloat16), wstem_ref[...],
                      preferred_element_type=jnp.float32)
        y = jnp.maximum(acc * bns_ref[stem_bn] + bnb_ref[stem_bn], 0.0)

        # ---- MaxPool1d(k=3, s=2, p=1): y >= 0 post-ReLU, so the 0.0 returned by
        # out-of-range selection rows can never win the max (matches -inf pad).
        x_cur = jnp.maximum(
            jnp.maximum(_sel_rows(y, l1, -1), _sel_rows(y, l1, 0)),
            _sel_rows(y, l1, 1))

        # ---- BasicBlocks (layer1..layer4); activations never leave VMEM ----
        for blk in blocks:
            lin, lout, stride = blk["lin"], blk["lout"], blk["stride"]
            a = x_cur * bns_ref[blk["bn1"]] + bnb_ref[blk["bn1"]]        # bn1
            c1 = _conv3(a, wconv_ref[blk["w1"]], pad_ref, lin)           # conv1
            if stride == 2:                      # stride-2 = full conv + even rows
                c1 = _sel_rows(c1, lout, 0)
            h = jnp.maximum(c1 * bns_ref[blk["bn2"]] + bnb_ref[blk["bn2"]],
                            0.0)                                         # bn2+relu
            c2 = _conv3(h, wconv_ref[blk["w2"]], pad_ref, lout)          # conv2
            z = c2 * bns_ref[blk["bn3"]] + bnb_ref[blk["bn3"]]           # bn3
            if stride == 2:                      # downsample: 1x1 s2 conv + BN
                xe = _sel_rows(x_cur, lout, 0)
                ident = (jnp.dot(xe.astype(jnp.bfloat16), wds_ref[blk["wds"]],
                                 preferred_element_type=jnp.float32)
                         * bns_ref[blk["bnds"]] + bnb_ref[blk["bnds"]])
            else:
                ident = x_cur
            # Padded lanes of z and ident are exactly 0, so this reproduces the
            # reference's zero-channel-padding of the identity before the add.
            x_cur = z + ident

        # ---- head: AdaptiveAvgPool1d(1) + Linear (class dim lane-padded) ----
        pooled = jnp.sum(x_cur, axis=0, keepdims=True) * (1.0 / x_cur.shape[0])
        logits = (jnp.dot(pooled.astype(jnp.bfloat16), wfc_ref[...],
                          preferred_element_type=jnp.float32) + fcb_ref[...])
        o_ref[0] = logits.astype(o_ref.dtype)

    return kernel


# ---------------------------------------------------------------------------
# Forward pass: one pallas_call for the whole network
# ---------------------------------------------------------------------------
def pyramidnet_forward(x_ncl, params, num_classes):
    B, cin, L = x_ncl.shape
    assert cin <= CIN_P and L % 4 == 0 and L >= 8
    ls, l1 = L // 2, L // 4                      # stem output / maxpool output len

    # Input prep (tiny, one-time, plain JAX): NCL -> NLC, channel pad, spatial pad
    # for the k=7/s=2/p=3 stem, and im2col so the stem is a single in-kernel matmul.
    x = jnp.transpose(x_ncl, (0, 2, 1)).astype(jnp.float32)        # (B, L, cin)
    xp = jnp.pad(x, ((0, 0), (3, 4), (0, CIN_P - cin)))            # (B, L+7, CIN_P)
    x_im = jnp.concatenate(
        [xp[:, t:t + 2 * ls:2, :] for t in range(STEM_TAPS)], axis=-1)  # (B, ls, 32)

    # Static per-block plan (lengths + packed-parameter indices).
    blocks, lcur = [], l1
    for meta in params["block_meta"]:
        lout = lcur // 2 if meta["stride"] == 2 else lcur
        blocks.append(dict(meta, lin=lcur, lout=lout))
        lcur = lout
    plan = {"l1": l1, "stem_bn": params["stem_bn"], "blocks": blocks}

    const3 = lambda b: (0, 0, 0)
    const2 = lambda b: (0, 0)
    out = pl.pallas_call(
        _make_kernel(plan),
        out_shape=jax.ShapeDtypeStruct((B, 1, NCP), jnp.float32),
        grid=(B,),                                   # one sample per grid step
        in_specs=[
            pl.BlockSpec((1, ls, STEM_TAPS * CIN_P), lambda b: (b, 0, 0)),
            pl.BlockSpec(params["bn_s"].shape, const3),
            pl.BlockSpec(params["bn_b"].shape, const3),
            pl.BlockSpec(params["wconv"].shape, const3),
            pl.BlockSpec(params["wds"].shape, const3),
            pl.BlockSpec(params["wstem"].shape, const2),
            pl.BlockSpec(params["wfc"].shape, const2),
            pl.BlockSpec(params["fc_b"].shape, const2),
        ],
        out_specs=pl.BlockSpec((1, 1, NCP), lambda b: (b, 0, 0)),
        scratch_shapes=[pltpu.VMEM((l1 + 2, CP), jnp.float32)],    # conv halo buffer
        compiler_params=pltpu.CompilerParams(
            dimension_semantics=("parallel",),       # megacore: batch across TCs
            vmem_limit_bytes=32 * 1024 * 1024),
    )(x_im, params["bn_s"], params["bn_b"], params["wconv"], params["wds"],
      params["wstem"], params["wfc"], params["fc_b"])
    return out[:, 0, :num_classes]


# ---------------------------------------------------------------------------
# Parameter construction (deterministic, mirrors the PyTorch __init__), with all
# channel dims zero-padded to CP=128, conv weights pre-reshaped to im2col layout
# and cast to bf16, and BN folded to an eval-mode per-channel affine.
# ---------------------------------------------------------------------------
def build_pyramidnet_params(key, layers=(2, 2, 2, 2), in_channels=3,
                            num_classes=10, alpha=48):
    assert in_channels <= CIN_P
    n_blocks = sum(layers)
    step = int(alpha / n_blocks)
    inpl, outpl = 64, 64 + step
    keys = iter(jax.random.split(key, 2 * n_blocks + len(layers) + 8))

    bn_scales, bn_shifts = [], []

    def add_bn(c_real, eps=1e-5):
        # eval-mode BN with init gamma=1, beta=0, running_mean=0, running_var=1;
        # padded lanes get scale=0, shift=0 so they stay exactly zero everywhere.
        scale = 1.0 / math.sqrt(1.0 + eps)
        bn_scales.append(jnp.zeros((1, CP), jnp.float32).at[0, :c_real].set(scale))
        bn_shifts.append(jnp.zeros((1, CP), jnp.float32))
        return len(bn_scales) - 1

    def conv_w(k, cin, cout):
        # kaiming_normal_(mode='fan_out', nonlinearity='relu'): std = sqrt(2/(cout*k))
        std = math.sqrt(2.0 / (cout * k))
        w = jax.random.normal(next(keys), (k, cin, cout), jnp.float32) * std
        return jnp.zeros((k, CP, CP), jnp.float32).at[:, :cin, :cout].set(w)

    # stem: Conv1d(in, 64, k=7, s=2, p=3) -> 8-tap im2col weight (8*CIN_P, CP)
    std = math.sqrt(2.0 / (64 * 7))
    w = jax.random.normal(next(keys), (7, in_channels, 64), jnp.float32) * std
    wstem = (jnp.zeros((STEM_TAPS, CIN_P, CP), jnp.float32)
             .at[:7, :in_channels, :64].set(w)).reshape(STEM_TAPS * CIN_P, CP)
    stem_bn = add_bn(64)

    wconv, wds, block_meta = [], [], []
    for li, nb in enumerate(layers):
        for bi in range(nb):
            stride = 2 if (li > 0 and bi == 0) else 1
            meta = {"stride": stride, "bn1": add_bn(inpl), "w1": len(wconv)}
            wconv.append(conv_w(3, inpl, outpl).reshape(3 * CP, CP))   # im2col layout
            meta["bn2"] = add_bn(outpl)
            meta["w2"] = len(wconv)
            wconv.append(conv_w(3, outpl, outpl).reshape(3 * CP, CP))
            meta["bn3"] = add_bn(outpl)
            if stride == 2:
                meta["wds"] = len(wds)
                wds.append(conv_w(1, inpl, inpl)[0])                   # 1x1 conv
                meta["bnds"] = add_bn(inpl)
            block_meta.append(meta)
            inpl, outpl = outpl, outpl + step
    feat = inpl                                                        # 64 + N*step

    if not wds:                                  # keep the stacked array non-empty
        wds.append(jnp.zeros((CP, CP), jnp.float32))

    bound = 1.0 / math.sqrt(feat)                # nn.Linear default init
    fcw = jax.random.uniform(next(keys), (feat, num_classes), jnp.float32,
                             -bound, bound)
    fcb = jax.random.uniform(next(keys), (num_classes,), jnp.float32,
                             -bound, bound)

    return {
        "bn_s": jnp.stack(bn_scales),                     # (Nbn, 1, CP) f32
        "bn_b": jnp.stack(bn_shifts),                     # (Nbn, 1, CP) f32
        "wconv": jnp.stack(wconv).astype(jnp.bfloat16),   # (2*n_blocks, 3*CP, CP)
        "wds": jnp.stack(wds).astype(jnp.bfloat16),       # (n_ds, CP, CP)
        "wstem": wstem.astype(jnp.bfloat16),              # (8*CIN_P, CP)
        "wfc": (jnp.zeros((CP, NCP), jnp.float32)
                .at[:feat, :num_classes].set(fcw)).astype(jnp.bfloat16),
        "fc_b": jnp.zeros((1, NCP), jnp.float32).at[0, :num_classes].set(fcb),
        "stem_bn": stem_bn,
        "block_meta": block_meta,
    }


if __name__ == "__main__":
    key = jax.random.PRNGKey(0)
    kx, kp = jax.random.split(key)

    B, C_in, L = 2, 3, 64
    num_classes = 10
    x = jax.random.normal(kx, (B, C_in, L), jnp.float32)

    params = build_pyramidnet_params(kp, layers=(2, 2, 2, 2),
                                     in_channels=C_in, num_classes=num_classes)

    out = pyramidnet_forward(x, params, num_classes)
    out = jax.block_until_ready(out)
    assert out.shape == (B, num_classes)
    assert bool(jnp.all(jnp.isfinite(out)))
    print("KERNEL_OK")
</pallas_src>

<mosaic_0001>
module attributes {stable_mosaic.version = 11 : i64} {
  func.func @kernel(%arg0: i32, %arg1: memref<1x32x32xf32, #tpu.memory_space<vmem>>, %arg2: memref<28x1x128xf32, #tpu.memory_space<vmem>>, %arg3: memref<28x1x128xf32, #tpu.memory_space<vmem>>, %arg4: memref<16x384x128xbf16, #tpu.memory_space<vmem>>, %arg5: memref<3x128x128xbf16, #tpu.memory_space<vmem>>, %arg6: memref<32x128xbf16, #tpu.memory_space<vmem>>, %arg7: memref<128x128xbf16, #tpu.memory_space<vmem>>, %arg8: memref<1x128xf32, #tpu.memory_space<vmem>>, %arg9: memref<1x1x128xf32, #tpu.memory_space<vmem>>, %arg10: memref<18x128xf32, #tpu.memory_space<vmem>>) attributes {dimension_semantics = [#tpu.dimension_semantics<parallel>], iteration_bounds = array<i64: 2>, scalar_prefetch = 0 : i64, scratch_operands = 1 : i64, tpu.core_type = #tpu.core_type<tc>, window_params = [{transform_indices = @transform_0, window_bounds = array<i64: 1, 32, 32>}, {pipeline_mode = #tpu.pipeline_mode<synchronous>, transform_indices = @transform_1, window_bounds = array<i64: 28, 1, 128>}, {pipeline_mode = #tpu.pipeline_mode<synchronous>, transform_indices = @transform_2, window_bounds = array<i64: 28, 1, 128>}, {pipeline_mode = #tpu.pipeline_mode<synchronous>, transform_indices = @transform_3, window_bounds = array<i64: 16, 384, 128>}, {pipeline_mode = #tpu.pipeline_mode<synchronous>, transform_indices = @transform_4, window_bounds = array<i64: 3, 128, 128>}, {pipeline_mode = #tpu.pipeline_mode<synchronous>, transform_indices = @transform_5, window_bounds = array<i64: 32, 128>}, {pipeline_mode = #tpu.pipeline_mode<synchronous>, transform_indices = @transform_6, window_bounds = array<i64: 128, 128>}, {pipeline_mode = #tpu.pipeline_mode<synchronous>, transform_indices = @transform_7, window_bounds = array<i64: 1, 128>}, {transform_indices = @transform_8, window_bounds = array<i64: 1, 1, 128>}]} {
    %c0 = arith.constant 0 : index
    %c0_0 = arith.constant 0 : index
    %c0_1 = arith.constant 0 : index
    %0 = vector.load %arg1[%c0, %c0_0, %c0_1] : memref<1x32x32xf32, #tpu.memory_space<vmem>>, vector<1x32x32xf32>
    %1 = vector.shape_cast %0 : vector<1x32x32xf32> to vector<32x32xf32>
    %2 = arith.truncf %1 : vector<32x32xf32> to vector<32x32xbf16>
    %c0_2 = arith.constant 0 : index
    %c0_3 = arith.constant 0 : index
    %3 = vector.load %arg6[%c0_2, %c0_3] : memref<32x128xbf16, #tpu.memory_space<vmem>>, vector<32x128xbf16>
    %cst = arith.constant dense<0.000000e+00> : vector<32x128xf32>
    %4 = tpu.matmul %2, %3, %cst {dimension_numbers = #tpu.dot_dimension_numbers<[1], [0], [0], [1], [0, 0, 1, 1], [], []>} : vector<32x32xbf16>, vector<32x128xbf16>, vector<32x128xf32> -> vector<32x128xf32>
    %c0_4 = arith.constant 0 : index
    %c0_5 = arith.constant 0 : index
    %c0_6 = arith.constant 0 : index
    %5 = vector.load %arg2[%c0_4, %c0_5, %c0_6] : memref<28x1x128xf32, #tpu.memory_space<vmem>>, vector<1x1x128xf32>
    %6 = vector.shape_cast %5 : vector<1x1x128xf32> to vector<1x128xf32>
    %7 = vector.broadcast %6 : vector<1x128xf32> to vector<32x128xf32>
    %8 = arith.mulf %4, %7 : vector<32x128xf32>
    %c0_7 = arith.constant 0 : index
    %c0_8 = arith.constant 0 : index
    %c0_9 = arith.constant 0 : index
    %9 = vector.load %arg3[%c0_7, %c0_8, %c0_9] : memref<28x1x128xf32, #tpu.memory_space<vmem>>, vector<1x1x128xf32>
    %10 = vector.shape_cast %9 : vector<1x1x128xf32> to vector<1x128xf32>
    %11 = vector.broadcast %10 : vector<1x128xf32> to vector<32x128xf32>
    %12 = arith.addf %8, %11 : vector<32x128xf32>
    %cst_10 = arith.constant 0.000000e+00 : f32
    %13 = vector.broadcast %cst_10 : f32 to vector<32x128xf32>
    %14 = arith.maximumf %12, %13 : vector<32x128xf32>
    %15 = tpu.iota {dimensions = array<i32: 0>} : vector<16x32xi32>
    %16 = tpu.iota {dimensions = array<i32: 1>} : vector<16x32xi32>
    %c2_i32 = arith.constant 2 : i32
    %17 = vector.broadcast %c2_i32 : i32 to vector<16x32xi32>
    %18 = arith.muli %17, %15 : vector<16x32xi32>
    %c-1_i32 = arith.constant -1 : i32
    %19 = vector.broadcast %c-1_i32 : i32 to vector<16x32xi32>
    %20 = arith.addi %18, %19 : vector<16x32xi32>
    %21 = arith.cmpi eq, %16, %20 : vector<16x32xi32>
    %22 = arith.extui %21 : vector<16x32xi1> to vector<16x32xi32>
    %23 = arith.sitofp %22 : vector<16x32xi32> to vector<16x32xf32>
    %cst_11 = arith.constant dense<0.000000e+00> : vector<16x128xf32>
    %24 = tpu.matmul %23, %14, %cst_11 {dimension_numbers = #tpu.dot_dimension_numbers<[1], [0], [0], [1], [0, 0, 1, 1], [], []>} : vector<16x32xf32>, vector<32x128xf32>, vector<16x128xf32> -> vector<16x128xf32>
    %25 = tpu.iota {dimensions = array<i32: 0>} : vector<16x32xi32>
    %26 = tpu.iota {dimensions = array<i32: 1>} : vector<16x32xi32>
    %c2_i32_12 = arith.constant 2 : i32
    %27 = vector.broadcast %c2_i32_12 : i32 to vector<16x32xi32>
    %28 = arith.muli %27, %25 : vector<16x32xi32>
    %c0_i32 = arith.constant 0 : i32
    %29 = vector.broadcast %c0_i32 : i32 to vector<16x32xi32>
    %30 = arith.addi %28, %29 : vector<16x32xi32>
    %31 = arith.cmpi eq, %26, %30 : vector<16x32xi32>
    %32 = arith.extui %31 : vector<16x32xi1> to vector<16x32xi32>
    %33 = arith.sitofp %32 : vector<16x32xi32> to vector<16x32xf32>
    %cst_13 = arith.constant dense<0.000000e+00> : vector<16x128xf32>
    %34 = tpu.matmul %33, %14, %cst_13 {dimension_numbers = #tpu.dot_dimension_numbers<[1], [0], [0], [1], [0, 0, 1, 1], [], []>} : vector<16x32xf32>, vector<32x128xf32>, vector<16x128xf32> -> vector<16x128xf32>
    %35 = arith.maximumf %24, %34 : vector<16x128xf32>
    %36 = tpu.iota {dimensions = array<i32: 0>} : vector<16x32xi32>
    %37 = tpu.iota {dimensions = array<i32: 1>} : vector<16x32xi32>
    %c2_i32_14 = arith.constant 2 : i32
    %38 = vector.broadcast %c2_i32_14 : i32 to vector<16x32xi32>
    %39 = arith.muli %38, %36 : vector<16x32xi32>
    %c1_i32 = arith.constant 1 : i32
    %40 = vector.broadcast %c1_i32 : i32 to vector<16x32xi32>
    %41 = arith.addi %39, %40 : vector<16x32xi32>
    %42 = arith.cmpi eq, %37, %41 : vector<16x32xi32>
    %43 = arith.extui %42 : vector<16x32xi1> to vector<16x32xi32>
    %44 = arith.sitofp %43 : vector<16x32xi32> to vector<16x32xf32>
    %cst_15 = arith.constant dense<0.000000e+00> : vector<16x128xf32>
    %45 = tpu.matmul %44, %14, %cst_15 {dimension_numbers = #tpu.dot_dimension_numbers<[1], [0], [0], [1], [0, 0, 1, 1], [], []>} : vector<16x32xf32>, vector<32x128xf32>, vector<16x128xf32> -> vector<16x128xf32>
    %46 = arith.maximumf %35, %45 : vector<16x128xf32>
    %c1 = arith.constant 1 : index
    %c0_16 = arith.constant 0 : index
    %c0_17 = arith.constant 0 : index
    %47 = vector.load %arg2[%c1, %c0_16, %c0_17] : memref<28x1x128xf32, #tpu.memory_space<vmem>>, vector<1x1x128xf32>
    %48 = vector.shape_cast %47 : vector<1x1x128xf32> to vector<1x128xf32>
    %49 = vector.broadcast %48 : vector<1x128xf32> to vector<16x128xf32>
    %50 = arith.mulf %46, %49 : vector<16x128xf32>
    %c1_18 = arith.constant 1 : index
    %c0_19 = arith.constant 0 : index
    %c0_20 = arith.constant 0 : index
    %51 = vector.load %arg3[%c1_18, %c0_19, %c0_20] : memref<28x1x128xf32, #tpu.memory_space<vmem>>, vector<1x1x128xf32>
    %52 = vector.shape_cast %51 : vector<1x1x128xf32> to vector<1x128xf32>
    %53 = vector.broadcast %52 : vector<1x128xf32> to vector<16x128xf32>
    %54 = arith.addf %50, %53 : vector<16x128xf32>
    %c0_21 = arith.constant 0 : index
    %c0_22 = arith.constant 0 : index
    %c0_23 = arith.constant 0 : index
    %55 = vector.load %arg4[%c0_21, %c0_22, %c0_23] : memref<16x384x128xbf16, #tpu.memory_space<vmem>>, vector<1x384x128xbf16>
    %56 = vector.shape_cast %55 : vector<1x384x128xbf16> to vector<384x128xbf16>
    %cst_24 = arith.constant 0.000000e+00 : f32
    %57 = vector.broadcast %cst_24 : f32 to vector<1x128xf32>
    %c0_25 = arith.constant 0 : index
    %c0_26 = arith.constant 0 : index
    %58 = vector.load %arg10[%c0_25, %c0_26] : memref<18x128xf32, #tpu.memory_space<vmem>>, vector<1x128xf32>
    tpu.vector_store %arg10[%c0_25, %c0_26], %57 {strides = array<i32>} : memref<18x128xf32, #tpu.memory_space<vmem>>, vector<1x128xf32>,
    %c1_27 = arith.constant 1 : index
    %c0_28 = arith.constant 0 : index
    %59 = vector.load %arg10[%c1_27, %c0_28] : memref<18x128xf32, #tpu.memory_space<vmem>>, vector<16x128xf32>
    tpu.vector_store %arg10[%c1_27, %c0_28], %54 {strides = array<i32>} : memref<18x128xf32, #tpu.memory_space<vmem>>, vector<16x128xf32>,
    %c17 = arith.constant 17 : index
    %c0_29 = arith.constant 0 : index
    %60 = vector.load %arg10[%c17, %c0_29] : memref<18x128xf32, #tpu.memory_space<vmem>>, vector<1x128xf32>
    tpu.vector_store %arg10[%c17, %c0_29], %57 {strides = array<i32>} : memref<18x128xf32, #tpu.memory_space<vmem>>, vector<1x128xf32>,
    %c0_30 = arith.constant 0 : index
    %c0_31 = arith.constant 0 : index
    %61 = vector.load %arg10[%c0_30, %c0_31] : memref<18x128xf32, #tpu.memory_space<vmem>>, vector<16x128xf32>
    %c1_32 = arith.constant 1 : index
    %c0_33 = arith.constant 0 : index
    %62 = vector.load %arg10[%c1_32, %c0_33] : memref<18x128xf32, #tpu.memory_space<vmem>>, vector<16x128xf32>
    %c2 = arith.constant 2 : index
    %c0_34 = arith.constant 0 : index
    %63 = vector.load %arg10[%c2, %c0_34] : memref<18x128xf32, #tpu.memory_space<vmem>>, vector<16x128xf32>
    %64 = tpu.concatenate %61, %62, %63 in 1 : vector<16x128xf32>, vector<16x128xf32>, vector<16x128xf32> -> vector<16x384xf32>
    %65 = arith.truncf %64 : vector<16x384xf32> to vector<16x384xbf16>
    %cst_35 = arith.constant dense<0.000000e+00> : vector<16x128xf32>
    %66 = tpu.matmul %65, %56, %cst_35 {dimension_numbers = #tpu.dot_dimension_numbers<[1], [0], [0], [1], [0, 0, 1, 1], [], []>} : vector<16x384xbf16>, vector<384x128xbf16>, vector<16x128xf32> -> vector<16x128xf32>
    %c2_36 = arith.constant 2 : index
    %c0_37 = arith.constant 0 : index
    %c0_38 = arith.constant 0 : index
    %67 = vector.load %arg2[%c2_36, %c0_37, %c0_38] : memref<28x1x128xf32, #tpu.memory_space<vmem>>, vector<1x1x128xf32>
    %68 = vector.shape_cast %67 : vector<1x1x128xf32> to vector<1x128xf32>
    %69 = vector.broadcast %68 : vector<1x128xf32> to vector<16x128xf32>
    %70 = arith.mulf %66, %69 : vector<16x128xf32>
    %c2_39 = arith.constant 2 : index
    %c0_40 = arith.constant 0 : index
    %c0_41 = arith.constant 0 : index
    %71 = vector.load %arg3[%c2_39, %c0_40, %c0_41] : memref<28x1x128xf32, #tpu.memory_space<vmem>>, vector<1x1x128xf32>
    %72 = vector.shape_cast %71 : vector<1x1x128xf32> to vector<1x128xf32>
    %73 = vector.broadcast %72 : vector<1x128xf32> to vector<16x128xf32>
    %74 = arith.addf %70, %73 : vector<16x128xf32>
    %cst_42 = arith.constant 0.000000e+00 : f32
    %75 = vector.broadcast %cst_42 : f32 to vector<16x128xf32>
    %76 = arith.maximumf %74, %75 : vector<16x128xf32>
    %c1_43 = arith.constant 1 : index
    %c0_44 = arith.constant 0 : index
    %c0_45 = arith.constant 0 : index
    %77 = vector.load %arg4[%c1_43, %c0_44, %c0_45] : memref<16x384x128xbf16, #tpu.memory_space<vmem>>, vector<1x384x128xbf16>
    %78 = vector.shape_cast %77 : vector<1x384x128xbf16> to vector<384x128xbf16>
    %cst_46 = arith.constant 0.000000e+00 : f32
    %79 = vector.broadcast %cst_46 : f32 to vector<1x128xf32>
    %c0_47 = arith.constant 0 : index
    %c0_48 = arith.constant 0 : index
    %80 = vector.load %arg10[%c0_47, %c0_48] : memref<18x128xf32, #tpu.memory_space<vmem>>, vector<1x128xf32>
    tpu.vector_store %arg10[%c0_47, %c0_48], %79 {strides = array<i32>} : memref<18x128xf32, #tpu.memory_space<vmem>>, vector<1x128xf32>,
    %c1_49 = arith.constant 1 : index
    %c0_50 = arith.constant 0 : index
    %81 = vector.load %arg10[%c1_49, %c0_50] : memref<18x128xf32, #tpu.memory_space<vmem>>, vector<16x128xf32>
    tpu.vector_store %arg10[%c1_49, %c0_50], %76 {strides = array<i32>} : memref<18x128xf32, #tpu.memory_space<vmem>>, vector<16x128xf32>,
    %c17_51 = arith.constant 17 : index
    %c0_52 = arith.constant 0 : index
    %82 = vector.load %arg10[%c17_51, %c0_52] : memref<18x128xf32, #tpu.memory_space<vmem>>, vector<1x128xf32>
    tpu.vector_store %arg10[%c17_51, %c0_52], %79 {strides = array<i32>} : memref<18x128xf32, #tpu.memory_space<vmem>>, vector<1x128xf32>,
    %c0_53 = arith.constant 0 : index
    %c0_54 = arith.constant 0 : index
    %83 = vector.load %arg10[%c0_53, %c0_54] : memref<18x128xf32, #tpu.memory_space<vmem>>, vector<16x128xf32>
    %c1_55 = arith.constant 1 : index
    %c0_56 = arith.constant 0 : index
    %84 = vector.load %arg10[%c1_55, %c0_56] : memref<18x128xf32, #tpu.memory_space<vmem>>, vector<16x128xf32>
    %c2_57 = arith.constant 2 : index
    %c0_58 = arith.constant 0 : index
    %85 = vector.load %arg10[%c2_57, %c0_58] : memref<18x128xf32, #tpu.memory_space<vmem>>, vector<16x128xf32>
    %86 = tpu.concatenate %83, %84, %85 in 1 : vector<16x128xf32>, vector<16x128xf32>, vector<16x128xf32> -> vector<16x384xf32>
    %87 = arith.truncf %86 : vector<16x384xf32> to vector<16x384xbf16>
    %cst_59 = arith.constant dense<0.000000e+00> : vector<16x128xf32>
    %88 = tpu.matmul %87, %78, %cst_59 {dimension_numbers = #tpu.dot_dimension_numbers<[1], [0], [0], [1], [0, 0, 1, 1], [], []>} : vector<16x384xbf16>, vector<384x128xbf16>, vector<16x128xf32> -> vector<16x128xf32>
    %c3 = arith.constant 3 : index
    %c0_60 = arith.constant 0 : index
    %c0_61 = arith.constant 0 : index
    %89 = vector.load %arg2[%c3, %c0_60, %c0_61] : memref<28x1x128xf32, #tpu.memory_space<vmem>>, vector<1x1x128xf32>
    %90 = vector.shape_cast %89 : vector<1x1x128xf32> to vector<1x128xf32>
    %91 = vector.broadcast %90 : vector<1x128xf32> to vector<16x128xf32>
    %92 = arith.mulf %88, %91 : vector<16x128xf32>
    %c3_62 = arith.constant 3 : index
    %c0_63 = arith.constant 0 : index
    %c0_64 = arith.constant 0 : index
    %93 = vector.load %arg3[%c3_62, %c0_63, %c0_64] : memref<28x1x128xf32, #tpu.memory_space<vmem>>, vector<1x1x128xf32>
    %94 = vector.shape_cast %93 : vector<1x1x128xf32> to vector<1x128xf32>
    %95 = vector.broadcast %94 : vector<1x128xf32> to vector<16x128xf32>
    %96 = arith.addf %92, %95 : vector<16x128xf32>
    %97 = arith.addf %96, %46 : vector<16x128xf32>
    %c4 = arith.constant 4 : index
    %c0_65 = arith.constant 0 : index
    %c0_66 = arith.constant 0 : index
    %98 = vector.load %arg2[%c4, %c0_65, %c0_66] : memref<28x1x128xf32, #tpu.memory_space<vmem>>, vector<1x1x128xf32>
    %99 = vector.shape_cast %98 : vector<1x1x128xf32> to vector<1x128xf32>
    %100 = vector.broadcast %99 : vector<1x128xf32> to vector<16x128xf32>
    %101 = arith.mulf %97, %100 : vector<16x128xf32>
    %c4_67 = arith.constant 4 : index
    %c0_68 = arith.constant 0 : index
    %c0_69 = arith.constant 0 : index
    %102 = vector.load %arg3[%c4_67, %c0_68, %c0_69] : memref<28x1x128xf32, #tpu.memory_space<vmem>>, vector<1x1x128xf32>
    %103 = vector.shape_cast %102 : vector<1x1x128xf32> to vector<1x128xf32>
    %104 = vector.broadcast %103 : vector<1x128xf32> to vector<16x128xf32>
    %105 = arith.addf %101, %104 : vector<16x128xf32>
    %c2_70 = arith.constant 2 : index
    %c0_71 = arith.constant 0 : index
    %c0_72 = arith.constant 0 : index
    %106 = vector.load %arg4[%c2_70, %c0_71, %c0_72] : memref<16x384x128xbf16, #tpu.memory_space<vmem>>, vector<1x384x128xbf16>
    %107 = vector.shape_cast %106 : vector<1x384x128xbf16> to vector<384x128xbf16>
    %cst_73 = arith.constant 0.000000e+00 : f32
    %108 = vector.broadcast %cst_73 : f32 to vector<1x128xf32>
    %c0_74 = arith.constant 0 : index
    %c0_75 = arith.constant 0 : index
    %109 = vector.load %arg10[%c0_74, %c0_75] : memref<18x128xf32, #tpu.memory_space<vmem>>, vector<1x128xf32>
    tpu.vector_store %arg10[%c0_74, %c0_75], %108 {strides = array<i32>} : memref<18x128xf32, #tpu.memory_space<vmem>>, vector<1x128xf32>,
    %c1_76 = arith.constant 1 : index
    %c0_77 = arith.constant 0 : index
    %110 = vector.load %arg10[%c1_76, %c0_77] : memref<18x128xf32, #tpu.memory_space<vmem>>, vector<16x128xf32>
    tpu.vector_store %arg10[%c1_76, %c0_77], %105 {strides = array<i32>} : memref<18x128xf32, #tpu.memory_space<vmem>>, vector<16x128xf32>,
    %c17_78 = arith.constant 17 : index
    %c0_79 = arith.constant 0 : index
    %111 = vector.load %arg10[%c17_78, %c0_79] : memref<18x128xf32, #tpu.memory_space<vmem>>, vector<1x128xf32>
    tpu.vector_store %arg10[%c17_78, %c0_79], %108 {strides = array<i32>} : memref<18x128xf32, #tpu.memory_space<vmem>>, vector<1x128xf32>,
    %c0_80 = arith.constant 0 : index
    %c0_81 = arith.constant 0 : index
    %112 = vector.load %arg10[%c0_80, %c0_81] : memref<18x128xf32, #tpu.memory_space<vmem>>, vector<16x128xf32>
    %c1_82 = arith.constant 1 : index
    %c0_83 = arith.constant 0 : index
    %113 = vector.load %arg10[%c1_82, %c0_83] : memref<18x128xf32, #tpu.memory_space<vmem>>, vector<16x128xf32>
    %c2_84 = arith.constant 2 : index
    %c0_85 = arith.constant 0 : index
    %114 = vector.load %arg10[%c2_84, %c0_85] : memref<18x128xf32, #tpu.memory_space<vmem>>, vector<16x128xf32>
    %115 = tpu.concatenate %112, %113, %114 in 1 : vector<16x128xf32>, vector<16x128xf32>, vector<16x128xf32> -> vector<16x384xf32>
    %116 = arith.truncf %115 : vector<16x384xf32> to vector<16x384xbf16>
    %cst_86 = arith.constant dense<0.000000e+00> : vector<16x128xf32>
    %117 = tpu.matmul %116, %107, %cst_86 {dimension_numbers = #tpu.dot_dimension_numbers<[1], [0], [0], [1], [0, 0, 1, 1], [], []>} : vector<16x384xbf16>, vector<384x128xbf16>, vector<16x128xf32> -> vector<16x128xf32>
    %c5 = arith.constant 5 : index
    %c0_87 = arith.constant 0 : index
    %c0_88 = arith.constant 0 : index
    %118 = vector.load %arg2[%c5, %c0_87, %c0_88] : memref<28x1x128xf32, #tpu.memory_space<vmem>>, vector<1x1x128xf32>
    %119 = vector.shape_cast %118 : vector<1x1x128xf32> to vector<1x128xf32>
    %120 = vector.broadcast %119 : vector<1x128xf32> to vector<16x128xf32>
    %121 = arith.mulf %117, %120 : vector<16x128xf32>
    %c5_89 = arith.constant 5 : index
    %c0_90 = arith.constant 0 : index
    %c0_91 = arith.constant 0 : index
    %122 = vector.load %arg3[%c5_89, %c0_90, %c0_91] : memref<28x1x128xf32, #tpu.memory_space<vmem>>, vector<1x1x128xf32>
    %123 = vector.shape_cast %122 : vector<1x1x128xf32> to vector<1x128xf32>
    %124 = vector.broadcast %123 : vector<1x128xf32> to vector<16x128xf32>
    %125 = arith.addf %121, %124 : vector<16x128xf32>
    %cst_92 = arith.constant 0.000000e+00 : f32
    %126 = vector.broadcast %cst_92 : f32 to vector<16x128xf32>
    %127 = arith.maximumf %125, %126 : vector<16x128xf32>
    %c3_93 = arith.constant 3 : index
    %c0_94 = arith.constant 0 : index
    %c0_95 = arith.constant 0 : index
    %128 = vector.load %arg4[%c3_93, %c0_94, %c0_95] : memref<16x384x128xbf16, #tpu.memory_space<vmem>>, vector<1x384x128xbf16>
    %129 = vector.shape_cast %128 : vector<1x384x128xbf16> to vector<384x128xbf16>
    %cst_96 = arith.constant 0.000000e+00 : f32
    %130 = vector.broadcast %cst_96 : f32 to vector<1x128xf32>
    %c0_97 = arith.constant 0 : index
    %c0_98 = arith.constant 0 : index
    %131 = vector.load %arg10[%c0_97, %c0_98] : memref<18x128xf32, #tpu.memory_space<vmem>>, vector<1x128xf32>
    tpu.vector_store %arg10[%c0_97, %c0_98], %130 {strides = array<i32>} : memref<18x128xf32, #tpu.memory_space<vmem>>, vector<1x128xf32>,
    %c1_99 = arith.constant 1 : index
    %c0_100 = arith.constant 0 : index
    %132 = vector.load %arg10[%c1_99, %c0_100] : memref<18x128xf32, #tpu.memory_space<vmem>>, vector<16x128xf32>
    tpu.vector_store %arg10[%c1_99, %c0_100], %127 {strides = array<i32>} : memref<18x128xf32, #tpu.memory_space<vmem>>, vector<16x128xf32>,
    %c17_101 = arith.constant 17 : index
    %c0_102 = arith.constant 0 : index
    %133 = vector.load %arg10[%c17_101, %c0_102] : memref<18x128xf32, #tpu.memory_space<vmem>>, vector<1x128xf32>
    tpu.vector_store %arg10[%c17_101, %c0_102], %130 {strides = array<i32>} : memref<18x128xf32, #tpu.memory_space<vmem>>, vector<1x128xf32>,
    %c0_103 = arith.constant 0 : index
    %c0_104 = arith.constant 0 : index
    %134 = vector.load %arg10[%c0_103, %c0_104] : memref<18x128xf32, #tpu.memory_space<vmem>>, vector<16x128xf32>
    %c1_105 = arith.constant 1 : index
    %c0_106 = arith.constant 0 : index
    %135 = vector.load %arg10[%c1_105, %c0_106] : memref<18x128xf32, #tpu.memory_space<vmem>>, vector<16x128xf32>
    %c2_107 = arith.constant 2 : index
    %c0_108 = arith.constant 0 : index
    %136 = vector.load %arg10[%c2_107, %c0_108] : memref<18x128xf32, #tpu.memory_space<vmem>>, vector<16x128xf32>
    %137 = tpu.concatenate %134, %135, %136 in 1 : vector<16x128xf32>, vector<16x128xf32>, vector<16x128xf32> -> vector<16x384xf32>
    %138 = arith.truncf %137 : vector<16x384xf32> to vector<16x384xbf16>
    %cst_109 = arith.constant dense<0.000000e+00> : vector<16x128xf32>
    %139 = tpu.matmul %138, %129, %cst_109 {dimension_numbers = #tpu.dot_dimension_numbers<[1], [0], [0], [1], [0, 0, 1, 1], [], []>} : vector<16x384xbf16>, vector<384x128xbf16>, vector<16x128xf32> -> vector<16x128xf32>
    %c6 = arith.constant 6 : index
    %c0_110 = arith.constant 0 : index
    %c0_111 = arith.constant 0 : index
    %140 = vector.load %arg2[%c6, %c0_110, %c0_111] : memref<28x1x128xf32, #tpu.memory_space<vmem>>, vector<1x1x128xf32>
    %141 = vector.shape_cast %140 : vector<1x1x128xf32> to vector<1x128xf32>
    %142 = vector.broadcast %141 : vector<1x128xf32> to vector<16x128xf32>
    %143 = arith.mulf %139, %142 : vector<16x128xf32>
    %c6_112 = arith.constant 6 : index
    %c0_113 = arith.constant 0 : index
    %c0_114 = arith.constant 0 : index
    %144 = vector.load %arg3[%c6_112, %c0_113, %c0_114] : memref<28x1x128xf32, #tpu.memory_space<vmem>>, vector<1x1x128xf32>
    %145 = vector.shape_cast %144 : vector<1x1x128xf32> to vector<1x128xf32>
    %146 = vector.broadcast %145 : vector<1x128xf32> to vector<16x128xf32>
    %147 = arith.addf %143, %146 : vector<16x128xf32>
    %148 = arith.addf %147, %97 : vector<16x128xf32>
    %c7 = arith.constant 7 : index
    %c0_115 = arith.constant 0 : index
    %c0_116 = arith.constant 0 : index
    %149 = vector.load %arg2[%c7, %c0_115, %c0_116] : memref<28x1x128xf32, #tpu.memory_space<vmem>>, vector<1x1x128xf32>
    %150 = vector.shape_cast %149 : vector<1x1x128xf32> to vector<1x128xf32>
    %151 = vector.broadcast %150 : vector<1x128xf32> to vector<16x128xf32>
    %152 = arith.mulf %148, %151 : vector<16x128xf32>
    %c7_117 = arith.constant 7 : index
    %c0_118 = arith.constant 0 : index
    %c0_119 = arith.constant 0 : index
    %153 = vector.load %arg3[%c7_117, %c0_118, %c0_119] : memref<28x1x128xf32, #tpu.memory_space<vmem>>, vector<1x1x128xf32>
    %154 = vector.shape_cast %153 : vector<1x1x128xf32> to vector<1x128xf32>
    %155 = vector.broadcast %154 : vector<1x128xf32> to vector<16x128xf32>
    %156 = arith.addf %152, %155 : vector<16x128xf32>
    %c4_120 = arith.constant 4 : index
    %c0_121 = arith.constant 0 : index
    %c0_122 = arith.constant 0 : index
    %157 = vector.load %arg4[%c4_120, %c0_121, %c0_122] : memref<16x384x128xbf16, #tpu.memory_space<vmem>>, vector<1x384x128xbf16>
    %158 = vector.shape_cast %157 : vector<1x384x128xbf16> to vector<384x128xbf16>
    %cst_123 = arith.constant 0.000000e+00 : f32
    %159 = vector.broadcast %cst_123 : f32 to vector<1x128xf32>
    %c0_124 = arith.constant 0 : index
    %c0_125 = arith.constant 0 : index
    %160 = vector.load %arg10[%c0_124, %c0_125] : memref<18x128xf32, #tpu.memory_space<vmem>>, vector<1x128xf32>
    tpu.vector_store %arg10[%c0_124, %c0_125], %159 {strides = array<i32>} : memref<18x128xf32, #tpu.memory_space<vmem>>, vector<1x128xf32>,
    %c1_126 = arith.constant 1 : index
    %c0_127 = arith.constant 0 : index
    %161 = vector.load %arg10[%c1_126, %c0_127] : memref<18x128xf32, #tpu.memory_space<vmem>>, vector<16x128xf32>
    tpu.vector_store %arg10[%c1_126, %c0_127], %156 {strides = array<i32>} : memref<18x128xf32, #tpu.memory_space<vmem>>, vector<16x128xf32>,
    %c17_128 = arith.constant 17 : index
    %c0_129 = arith.constant 0 : index
    %162 = vector.load %arg10[%c17_128, %c0_129] : memref<18x128xf32, #tpu.memory_space<vmem>>, vector<1x128xf32>
    tpu.vector_store %arg10[%c17_128, %c0_129], %159 {strides = array<i32>} : memref<18x128xf32, #tpu.memory_space<vmem>>, vector<1x128xf32>,
    %c0_130 = arith.constant 0 : index
    %c0_131 = arith.constant 0 : index
    %163 = vector.load %arg10[%c0_130, %c0_131] : memref<18x128xf32, #tpu.memory_space<vmem>>, vector<16x128xf32>
    %c1_132 = arith.constant 1 : index
    %c0_133 = arith.constant 0 : index
    %164 = vector.load %arg10[%c1_132, %c0_133] : memref<18x128xf32, #tpu.memory_space<vmem>>, vector<16x128xf32>
    %c2_134 = arith.constant 2 : index
    %c0_135 = arith.constant 0 : index
    %165 = vector.load %arg10[%c2_134, %c0_135] : memref<18x128xf32, #tpu.memory_space<vmem>>, vector<16x128xf32>
    %166 = tpu.concatenate %163, %164, %165 in 1 : vector<16x128xf32>, vector<16x128xf32>, vector<16x128xf32> -> vector<16x384xf32>
    %167 = arith.truncf %166 : vector<16x384xf32> to vector<16x384xbf16>
    %cst_136 = arith.constant dense<0.000000e+00> : vector<16x128xf32>
    %168 = tpu.matmul %167, %158, %cst_136 {dimension_numbers = #tpu.dot_dimension_numbers<[1], [0], [0], [1], [0, 0, 1, 1], [], []>} : vector<16x384xbf16>, vector<384x128xbf16>, vector<16x128xf32> -> vector<16x128xf32>
    %169 = tpu.iota {dimensions = array<i32: 0>} : vector<8x16xi32>
    %170 = tpu.iota {dimensions = array<i32: 1>} : vector<8x16xi32>
    %c2_i32_137 = arith.constant 2 : i32
    %171 = vector.broadcast %c2_i32_137 : i32 to vector<8x16xi32>
    %172 = arith.muli %171, %169 : vector<8x16xi32>
    %c0_i32_138 = arith.constant 0 : i32
    %173 = vector.broadcast %c0_i32_138 : i32 to vector<8x16xi32>
    %174 = arith.addi %172, %173 : vector<8x16xi32>
    %175 = arith.cmpi eq, %170, %174 : vector<8x16xi32>
    %176 = arith.extui %175 : vector<8x16xi1> to vector<8x16xi32>
    %177 = arith.sitofp %176 : vector<8x16xi32> to vector<8x16xf32>
    %cst_139 = arith.constant dense<0.000000e+00> : vector<8x128xf32>
    %178 = tpu.matmul %177, %168, %cst_139 {dimension_numbers = #tpu.dot_dimension_numbers<[1], [0], [0], [1], [0, 0, 1, 1], [], []>} : vector<8x16xf32>, vector<16x128xf32>, vector<8x128xf32> -> vector<8x128xf32>
    %c8 = arith.constant 8 : index
    %c0_140 = arith.constant 0 : index
    %c0_141 = arith.constant 0 : index
    %179 = vector.load %arg2[%c8, %c0_140, %c0_141] : memref<28x1x128xf32, #tpu.memory_space<vmem>>, vector<1x1x128xf32>
    %180 = vector.shape_cast %179 : vector<1x1x128xf32> to vector<1x128xf32>
    %181 = vector.broadcast %180 : vector<1x128xf32> to vector<8x128xf32>
    %182 = arith.mulf %178, %181 : vector<8x128xf32>
    %c8_142 = arith.constant 8 : index
    %c0_143 = arith.constant 0 : index
    %c0_144 = arith.constant 0 : index
    %183 = vector.load %arg3[%c8_142, %c0_143, %c0_144] : memref<28x1x128xf32, #tpu.memory_space<vmem>>, vector<1x1x128xf32>
    %184 = vector.shape_cast %183 : vector<1x1x128xf32> to vector<1x128xf32>
    %185 = vector.broadcast %184 : vector<1x128xf32> to vector<8x128xf32>
    %186 = arith.addf %182, %185 : vector<8x128xf32>
    %cst_145 = arith.constant 0.000000e+00 : f32
    %187 = vector.broadcast %cst_145 : f32 to vector<8x128xf32>
    %188 = arith.maximumf %186, %187 : vector<8x128xf32>
    %c5_146 = arith.constant 5 : index
    %c0_147 = arith.constant 0 : index
    %c0_148 = arith.constant 0 : index
    %189 = vector.load %arg4[%c5_146, %c0_147, %c0_148] : memref<16x384x128xbf16, #tpu.memory_space<vmem>>, vector<1x384x128xbf16>
    %190 = vector.shape_cast %189 : vector<1x384x128xbf16> to vector<384x128xbf16>
    %cst_149 = arith.constant 0.000000e+00 : f32
    %191 = vector.broadcast %cst_149 : f32 to vector<1x128xf32>
    %c0_150 = arith.constant 0 : index
    %c0_151 = arith.constant 0 : index
    %192 = vector.load %arg10[%c0_150, %c0_151] : memref<18x128xf32, #tpu.memory_space<vmem>>, vector<1x128xf32>
    tpu.vector_store %arg10[%c0_150, %c0_151], %191 {strides = array<i32>} : memref<18x128xf32, #tpu.memory_space<vmem>>, vector<1x128xf32>,
    %c1_152 = arith.constant 1 : index
    %c0_153 = arith.constant 0 : index
    %193 = vector.load %arg10[%c1_152, %c0_153] : memref<18x128xf32, #tpu.memory_space<vmem>>, vector<8x128xf32>
    tpu.vector_store %arg10[%c1_152, %c0_153], %188 {strides = array<i32>} : memref<18x128xf32, #tpu.memory_space<vmem>>, vector<8x128xf32>,
    %c9 = arith.constant 9 : index
    %c0_154 = arith.constant 0 : index
    %194 = vector.load %arg10[%c9, %c0_154] : memref<18x128xf32, #tpu.memory_space<vmem>>, vector<1x128xf32>
    tpu.vector_store %arg10[%c9, %c0_154], %191 {strides = array<i32>} : memref<18x128xf32, #tpu.memory_space<vmem>>, vector<1x128xf32>,
    %c0_155 = arith.constant 0 : index
    %c0_156 = arith.constant 0 : index
    %195 = vector.load %arg10[%c0_155, %c0_156] : memref<18x128xf32, #tpu.memory_space<vmem>>, vector<8x128xf32>
    %c1_157 = arith.constant 1 : index
    %c0_158 = arith.constant 0 : index
    %196 = vector.load %arg10[%c1_157, %c0_158] : memref<18x128xf32, #tpu.memory_space<vmem>>, vector<8x128xf32>
    %c2_159 = arith.constant 2 : index
    %c0_160 = arith.constant 0 : index
    %197 = vector.load %arg10[%c2_159, %c0_160] : memref<18x128xf32, #tpu.memory_space<vmem>>, vector<8x128xf32>
    %198 = tpu.concatenate %195, %196, %197 in 1 : vector<8x128xf32>, vector<8x128xf32>, vector<8x128xf32> -> vector<8x384xf32>
    %199 = arith.truncf %198 : vector<8x384xf32> to vector<8x384xbf16>
    %cst_161 = arith.constant dense<0.000000e+00> : vector<8x128xf32>
    %200 = tpu.matmul %199, %190, %cst_161 {dimension_numbers = #tpu.dot_dimension_numbers<[1], [0], [0], [1], [0, 0, 1, 1], [], []>} : vector<8x384xbf16>, vector<384x128xbf16>, vector<8x128xf32> -> vector<8x128xf32>
    %c9_162 = arith.constant 9 : index
    %c0_163 = arith.constant 0 : index
    %c0_164 = arith.constant 0 : index
    %201 = vector.load %arg2[%c9_162, %c0_163, %c0_164] : memref<28x1x128xf32, #tpu.memory_space<vmem>>, vector<1x1x128xf32>
    %202 = vector.shape_cast %201 : vector<1x1x128xf32> to vector<1x128xf32>
    %203 = vector.broadcast %202 : vector<1x128xf32> to vector<8x128xf32>
    %204 = arith.mulf %200, %203 : vector<8x128xf32>
    %c9_165 = arith.constant 9 : index
    %c0_166 = arith.constant 0 : index
    %c0_167 = arith.constant 0 : index
    %205 = vector.load %arg3[%c9_165, %c0_166, %c0_167] : memref<28x1x128xf32, #tpu.memory_space<vmem>>, vector<1x1x128xf32>
    %206 = vector.shape_cast %205 : vector<1x1x128xf32> to vector<1x128xf32>
    %207 = vector.broadcast %206 : vector<1x128xf32> to vector<8x128xf32>
    %208 = arith.addf %204, %207 : vector<8x128xf32>
    %209 = tpu.iota {dimensions = array<i32: 0>} : vector<8x16xi32>
    %210 = tpu.iota {dimensions = array<i32: 1>} : vector<8x16xi32>
    %c2_i32_168 = arith.constant 2 : i32
    %211 = vector.broadcast %c2_i32_168 : i32 to vector<8x16xi32>
    %212 = arith.muli %211, %209 : vector<8x16xi32>
    %c0_i32_169 = arith.constant 0 : i32
    %213 = vector.broadcast %c0_i32_169 : i32 to vector<8x16xi32>
    %214 = arith.addi %212, %213 : vector<8x16xi32>
    %215 = arith.cmpi eq, %210, %214 : vector<8x16xi32>
    %216 = arith.extui %215 : vector<8x16xi1> to vector<8x16xi32>
    %217 = arith.sitofp %216 : vector<8x16xi32> to vector<8x16xf32>
    %cst_170 = arith.constant dense<0.000000e+00> : vector<8x128xf32>
    %218 = tpu.matmul %217, %148, %cst_170 {dimension_numbers = #tpu.dot_dimension_numbers<[1], [0], [0], [1], [0, 0, 1, 1], [], []>} : vector<8x16xf32>, vector<16x128xf32>, vector<8x128xf32> -> vector<8x128xf32>
    %219 = arith.truncf %218 : vector<8x128xf32> to vector<8x128xbf16>
    %c0_171 = arith.constant 0 : index
    %c0_172 = arith.constant 0 : index
    %c0_173 = arith.constant 0 : index
    %220 = vector.load %arg5[%c0_171, %c0_172, %c0_173] : memref<3x128x128xbf16, #tpu.memory_space<vmem>>, vector<1x128x128xbf16>
    %221 = vector.shape_cast %220 : vector<1x128x128xbf16> to vector<128x128xbf16>
    %cst_174 = arith.constant dense<0.000000e+00> : vector<8x128xf32>
    %222 = tpu.matmul %219, %221, %cst_174 {dimension_numbers = #tpu.dot_dimension_numbers<[1], [0], [0], [1], [0, 0, 1, 1], [], []>} : vector<8x128xbf16>, vector<128x128xbf16>, vector<8x128xf32> -> vector<8x128xf32>
    %c10 = arith.constant 10 : index
    %c0_175 = arith.constant 0 : index
    %c0_176 = arith.constant 0 : index
    %223 = vector.load %arg2[%c10, %c0_175, %c0_176] : memref<28x1x128xf32, #tpu.memory_space<vmem>>, vector<1x1x128xf32>
    %224 = vector.shape_cast %223 : vector<1x1x128xf32> to vector<1x128xf32>
    %225 = vector.broadcast %224 : vector<1x128xf32> to vector<8x128xf32>
    %226 = arith.mulf %222, %225 : vector<8x128xf32>
    %c10_177 = arith.constant 10 : index
    %c0_178 = arith.constant 0 : index
    %c0_179 = arith.constant 0 : index
    %227 = vector.load %arg3[%c10_177, %c0_178, %c0_179] : memref<28x1x128xf32, #tpu.memory_space<vmem>>, vector<1x1x128xf32>
    %228 = vector.shape_cast %227 : vector<1x1x128xf32> to vector<1x128xf32>
    %229 = vector.broadcast %228 : vector<1x128xf32> to vector<8x128xf32>
    %230 = arith.addf %226, %229 : vector<8x128xf32>
    %231 = arith.addf %208, %230 : vector<8x128xf32>
    %c11 = arith.constant 11 : index
    %c0_180 = arith.constant 0 : index
    %c0_181 = arith.constant 0 : index
    %232 = vector.load %arg2[%c11, %c0_180, %c0_181] : memref<28x1x128xf32, #tpu.memory_space<vmem>>, vector<1x1x128xf32>
    %233 = vector.shape_cast %232 : vector<1x1x128xf32> to vector<1x128xf32>
    %234 = vector.broadcast %233 : vector<1x128xf32> to vector<8x128xf32>
    %235 = arith.mulf %231, %234 : vector<8x128xf32>
    %c11_182 = arith.constant 11 : index
    %c0_183 = arith.constant 0 : index
    %c0_184 = arith.constant 0 : index
    %236 = vector.load %arg3[%c11_182, %c0_183, %c0_184] : memref<28x1x128xf32, #tpu.memory_space<vmem>>, vector<1x1x128xf32>
    %237 = vector.shape_cast %236 : vector<1x1x128xf32> to vector<1x128xf32>
    %238 = vector.broadcast %237 : vector<1x128xf32> to vector<8x128xf32>
    %239 = arith.addf %235, %238 : vector<8x128xf32>
    %c6_185 = arith.constant 6 : index
    %c0_186 = arith.constant 0 : index
    %c0_187 = arith.constant 0 : index
    %240 = vector.load %arg4[%c6_185, %c0_186, %c0_187] : memref<16x384x128xbf16, #tpu.memory_space<vmem>>, vector<1x384x128xbf16>
    %241 = vector.shape_cast %240 : vector<1x384x128xbf16> to vector<384x128xbf16>
    %cst_188 = arith.constant 0.000000e+00 : f32
    %242 = vector.broadcast %cst_188 : f32 to vector<1x128xf32>
    %c0_189 = arith.constant 0 : index
    %c0_190 = arith.constant 0 : index
    %243 = vector.load %arg10[%c0_189, %c0_190] : memref<18x128xf32, #tpu.memory_space<vmem>>, vector<1x128xf32>
    tpu.vector_store %arg10[%c0_189, %c0_190], %242 {strides = array<i32>} : memref<18x128xf32, #tpu.memory_space<vmem>>, vector<1x128xf32>,
    %c1_191 = arith.constant 1 : index
    %c0_192 = arith.constant 0 : index
    %244 = vector.load %arg10[%c1_191, %c0_192] : memref<18x128xf32, #tpu.memory_space<vmem>>, vector<8x128xf32>
    tpu.vector_store %arg10[%c1_191, %c0_192], %239 {strides = array<i32>} : memref<18x128xf32, #tpu.memory_space<vmem>>, vector<8x128xf32>,
    %c9_193 = arith.constant 9 : index
    %c0_194 = arith.constant 0 : index
    %245 = vector.load %arg10[%c9_193, %c0_194] : memref<18x128xf32, #tpu.memory_space<vmem>>, vector<1x128xf32>
    tpu.vector_store %arg10[%c9_193, %c0_194], %242 {strides = array<i32>} : memref<18x128xf32, #tpu.memory_space<vmem>>, vector<1x128xf32>,
    %c0_195 = arith.constant 0 : index
    %c0_196 = arith.constant 0 : index
    %246 = vector.load %arg10[%c0_195, %c0_196] : memref<18x128xf32, #tpu.memory_space<vmem>>, vector<8x128xf32>
    %c1_197 = arith.constant 1 : index
    %c0_198 = arith.constant 0 : index
    %247 = vector.load %arg10[%c1_197, %c0_198] : memref<18x128xf32, #tpu.memory_space<vmem>>, vector<8x128xf32>
    %c2_199 = arith.constant 2 : index
    %c0_200 = arith.constant 0 : index
    %248 = vector.load %arg10[%c2_199, %c0_200] : memref<18x128xf32, #tpu.memory_space<vmem>>, vector<8x128xf32>
    %249 = tpu.concatenate %246, %247, %248 in 1 : vector<8x128xf32>, vector<8x128xf32>, vector<8x128xf32> -> vector<8x384xf32>
    %250 = arith.truncf %249 : vector<8x384xf32> to vector<8x384xbf16>
    %cst_201 = arith.constant dense<0.000000e+00> : vector<8x128xf32>
    %251 = tpu.matmul %250, %241, %cst_201 {dimension_numbers = #tpu.dot_dimension_numbers<[1], [0], [0], [1], [0, 0, 1, 1], [], []>} : vector<8x384xbf16>, vector<384x128xbf16>, vector<8x128xf32> -> vector<8x128xf32>
    %c12 = arith.constant 12 : index
    %c0_202 = arith.constant 0 : index
    %c0_203 = arith.constant 0 : index
    %252 = vector.load %arg2[%c12, %c0_202, %c0_203] : memref<28x1x128xf32, #tpu.memory_space<vmem>>, vector<1x1x128xf32>
    %253 = vector.shape_cast %252 : vector<1x1x128xf32> to vector<1x128xf32>
    %254 = vector.broadcast %253 : vector<1x128xf32> to vector<8x128xf32>
    %255 = arith.mulf %251, %254 : vector<8x128xf32>
    %c12_204 = arith.constant 12 : index
    %c0_205 = arith.constant 0 : index
    %c0_206 = arith.constant 0 : index
    %256 = vector.load %arg3[%c12_204, %c0_205, %c0_206] : memref<28x1x128xf32, #tpu.memory_space<vmem>>, vector<1x1x128xf32>
    %257 = vector.shape_cast %256 : vector<1x1x128xf32> to vector<1x128xf32>
    %258 = vector.broadcast %257 : vector<1x128xf32> to vector<8x128xf32>
    %259 = arith.addf %255, %258 : vector<8x128xf32>
    %cst_207 = arith.constant 0.000000e+00 : f32
    %260 = vector.broadcast %cst_207 : f32 to vector<8x128xf32>
    %261 = arith.maximumf %259, %260 : vector<8x128xf32>
    %c7_208 = arith.constant 7 : index
    %c0_209 = arith.constant 0 : index
    %c0_210 = arith.constant 0 : index
    %262 = vector.load %arg4[%c7_208, %c0_209, %c0_210] : memref<16x384x128xbf16, #tpu.memory_space<vmem>>, vector<1x384x128xbf16>
    %263 = vector.shape_cast %262 : vector<1x384x128xbf16> to vector<384x128xbf16>
    %cst_211 = arith.constant 0.000000e+00 : f32
    %264 = vector.broadcast %cst_211 : f32 to vector<1x128xf32>
    %c0_212 = arith.constant 0 : index
    %c0_213 = arith.constant 0 : index
    %265 = vector.load %arg10[%c0_212, %c0_213] : memref<18x128xf32, #tpu.memory_space<vmem>>, vector<1x128xf32>
    tpu.vector_store %arg10[%c0_212, %c0_213], %264 {strides = array<i32>} : memref<18x128xf32, #tpu.memory_space<vmem>>, vector<1x128xf32>,
    %c1_214 = arith.constant 1 : index
    %c0_215 = arith.constant 0 : index
    %266 = vector.load %arg10[%c1_214, %c0_215] : memref<18x128xf32, #tpu.memory_space<vmem>>, vector<8x128xf32>
    tpu.vector_store %arg10[%c1_214, %c0_215], %261 {strides = array<i32>} : memref<18x128xf32, #tpu.memory_space<vmem>>, vector<8x128xf32>,
    %c9_216 = arith.constant 9 : index
    %c0_217 = arith.constant 0 : index
    %267 = vector.load %arg10[%c9_216, %c0_217] : memref<18x128xf32, #tpu.memory_space<vmem>>, vector<1x128xf32>
    tpu.vector_store %arg10[%c9_216, %c0_217], %264 {strides = array<i32>} : memref<18x128xf32, #tpu.memory_space<vmem>>, vector<1x128xf32>,
    %c0_218 = arith.constant 0 : index
    %c0_219 = arith.constant 0 : index
    %268 = vector.load %arg10[%c0_218, %c0_219] : memref<18x128xf32, #tpu.memory_space<vmem>>, vector<8x128xf32>
    %c1_220 = arith.constant 1 : index
    %c0_221 = arith.constant 0 : index
    %269 = vector.load %arg10[%c1_220, %c0_221] : memref<18x128xf32, #tpu.memory_space<vmem>>, vector<8x128xf32>
    %c2_222 = arith.constant 2 : index
    %c0_223 = arith.constant 0 : index
    %270 = vector.load %arg10[%c2_222, %c0_223] : memref<18x128xf32, #tpu.memory_space<vmem>>, vector<8x128xf32>
    %271 = tpu.concatenate %268, %269, %270 in 1 : vector<8x128xf32>, vector<8x128xf32>, vector<8x128xf32> -> vector<8x384xf32>
    %272 = arith.truncf %271 : vector<8x384xf32> to vector<8x384xbf16>
    %cst_224 = arith.constant dense<0.000000e+00> : vector<8x128xf32>
    %273 = tpu.matmul %272, %263, %cst_224 {dimension_numbers = #tpu.dot_dimension_numbers<[1], [0], [0], [1], [0, 0, 1, 1], [], []>} : vector<8x384xbf16>, vector<384x128xbf16>, vector<8x128xf32> -> vector<8x128xf32>
    %c13 = arith.constant 13 : index
    %c0_225 = arith.constant 0 : index
    %c0_226 = arith.constant 0 : index
    %274 = vector.load %arg2[%c13, %c0_225, %c0_226] : memref<28x1x128xf32, #tpu.memory_space<vmem>>, vector<1x1x128xf32>
    %275 = vector.shape_cast %274 : vector<1x1x128xf32> to vector<1x128xf32>
    %276 = vector.broadcast %275 : vector<1x128xf32> to vector<8x128xf32>
    %277 = arith.mulf %273, %276 : vector<8x128xf32>
    %c13_227 = arith.constant 13 : index
    %c0_228 = arith.constant 0 : index
    %c0_229 = arith.constant 0 : index
    %278 = vector.load %arg3[%c13_227, %c0_228, %c0_229] : memref<28x1x128xf32, #tpu.memory_space<vmem>>, vector<1x1x128xf32>
    %279 = vector.shape_cast %278 : vector<1x1x128xf32> to vector<1x128xf32>
    %280 = vector.broadcast %279 : vector<1x128xf32> to vector<8x128xf32>
    %281 = arith.addf %277, %280 : vector<8x128xf32>
    %282 = arith.addf %281, %231 : vector<8x128xf32>
    %c14 = arith.constant 14 : index
    %c0_230 = arith.constant 0 : index
    %c0_231 = arith.constant 0 : index
    %283 = vector.load %arg2[%c14, %c0_230, %c0_231] : memref<28x1x128xf32, #tpu.memory_space<vmem>>, vector<1x1x128xf32>
    %284 = vector.shape_cast %283 : vector<1x1x128xf32> to vector<1x128xf32>
    %285 = vector.broadcast %284 : vector<1x128xf32> to vector<8x128xf32>
    %286 = arith.mulf %282, %285 : vector<8x128xf32>
    %c14_232 = arith.constant 14 : index
    %c0_233 = arith.constant 0 : index
    %c0_234 = arith.constant 0 : index
    %287 = vector.load %arg3[%c14_232, %c0_233, %c0_234] : memref<28x1x128xf32, #tpu.memory_space<vmem>>, vector<1x1x128xf32>
    %288 = vector.shape_cast %287 : vector<1x1x128xf32> to vector<1x128xf32>
    %289 = vector.broadcast %288 : vector<1x128xf32> to vector<8x128xf32>
    %290 = arith.addf %286, %289 : vector<8x128xf32>
    %c8_235 = arith.constant 8 : index
    %c0_236 = arith.constant 0 : index
    %c0_237 = arith.constant 0 : index
    %291 = vector.load %arg4[%c8_235, %c0_236, %c0_237] : memref<16x384x128xbf16, #tpu.memory_space<vmem>>, vector<1x384x128xbf16>
    %292 = vector.shape_cast %291 : vector<1x384x128xbf16> to vector<384x128xbf16>
    %cst_238 = arith.constant 0.000000e+00 : f32
    %293 = vector.broadcast %cst_238 : f32 to vector<1x128xf32>
    %c0_239 = arith.constant 0 : index
    %c0_240 = arith.constant 0 : index
    %294 = vector.load %arg10[%c0_239, %c0_240] : memref<18x128xf32, #tpu.memory_space<vmem>>, vector<1x128xf32>
    tpu.vector_store %arg10[%c0_239, %c0_240], %293 {strides = array<i32>} : memref<18x128xf32, #tpu.memory_space<vmem>>, vector<1x128xf32>,
    %c1_241 = arith.constant 1 : index
    %c0_242 = arith.constant 0 : index
    %295 = vector.load %arg10[%c1_241, %c0_242] : memref<18x128xf32, #tpu.memory_space<vmem>>, vector<8x128xf32>
    tpu.vector_store %arg10[%c1_241, %c0_242], %290 {strides = array<i32>} : memref<18x128xf32, #tpu.memory_space<vmem>>, vector<8x128xf32>,
    %c9_243 = arith.constant 9 : index
    %c0_244 = arith.constant 0 : index
    %296 = vector.load %arg10[%c9_243, %c0_244] : memref<18x128xf32, #tpu.memory_space<vmem>>, vector<1x128xf32>
    tpu.vector_store %arg10[%c9_243, %c0_244], %293 {strides = array<i32>} : memref<18x128xf32, #tpu.memory_space<vmem>>, vector<1x128xf32>,
    %c0_245 = arith.constant 0 : index
    %c0_246 = arith.constant 0 : index
    %297 = vector.load %arg10[%c0_245, %c0_246] : memref<18x128xf32, #tpu.memory_space<vmem>>, vector<8x128xf32>
    %c1_247 = arith.constant 1 : index
    %c0_248 = arith.constant 0 : index
    %298 = vector.load %arg10[%c1_247, %c0_248] : memref<18x128xf32, #tpu.memory_space<vmem>>, vector<8x128xf32>
    %c2_249 = arith.constant 2 : index
    %c0_250 = arith.constant 0 : index
    %299 = vector.load %arg10[%c2_249, %c0_250] : memref<18x128xf32, #tpu.memory_space<vmem>>, vector<8x128xf32>
    %300 = tpu.concatenate %297, %298, %299 in 1 : vector<8x128xf32>, vector<8x128xf32>, vector<8x128xf32> -> vector<8x384xf32>
    %301 = arith.truncf %300 : vector<8x384xf32> to vector<8x384xbf16>
    %cst_251 = arith.constant dense<0.000000e+00> : vector<8x128xf32>
    %302 = tpu.matmul %301, %292, %cst_251 {dimension_numbers = #tpu.dot_dimension_numbers<[1], [0], [0], [1], [0, 0, 1, 1], [], []>} : vector<8x384xbf16>, vector<384x128xbf16>, vector<8x128xf32> -> vector<8x128xf32>
    %303 = tpu.iota {dimensions = array<i32: 0>} : vector<4x8xi32>
    %304 = tpu.iota {dimensions = array<i32: 1>} : vector<4x8xi32>
    %c2_i32_252 = arith.constant 2 : i32
    %305 = vector.broadcast %c2_i32_252 : i32 to vector<4x8xi32>
    %306 = arith.muli %305, %303 : vector<4x8xi32>
    %c0_i32_253 = arith.constant 0 : i32
    %307 = vector.broadcast %c0_i32_253 : i32 to vector<4x8xi32>
    %308 = arith.addi %306, %307 : vector<4x8xi32>
    %309 = arith.cmpi eq, %304, %308 : vector<4x8xi32>
    %310 = arith.extui %309 : vector<4x8xi1> to vector<4x8xi32>
    %311 = arith.sitofp %310 : vector<4x8xi32> to vector<4x8xf32>
    %cst_254 = arith.constant dense<0.000000e+00> : vector<4x128xf32>
    %312 = tpu.matmul %311, %302, %cst_254 {dimension_numbers = #tpu.dot_dimension_numbers<[1], [0], [0], [1], [0, 0, 1, 1], [], []>} : vector<4x8xf32>, vector<8x128xf32>, vector<4x128xf32> -> vector<4x128xf32>
    %c15 = arith.constant 15 : index
    %c0_255 = arith.constant 0 : index
    %c0_256 = arith.constant 0 : index
    %313 = vector.load %arg2[%c15, %c0_255, %c0_256] : memref<28x1x128xf32, #tpu.memory_space<vmem>>, vector<1x1x128xf32>
    %314 = vector.shape_cast %313 : vector<1x1x128xf32> to vector<1x128xf32>
    %315 = vector.broadcast %314 : vector<1x128xf32> to vector<4x128xf32>
    %316 = arith.mulf %312, %315 : vector<4x128xf32>
    %c15_257 = arith.constant 15 : index
    %c0_258 = arith.constant 0 : index
    %c0_259 = arith.constant 0 : index
    %317 = vector.load %arg3[%c15_257, %c0_258, %c0_259] : memref<28x1x128xf32, #tpu.memory_space<vmem>>, vector<1x1x128xf32>
    %318 = vector.shape_cast %317 : vector<1x1x128xf32> to vector<1x128xf32>
    %319 = vector.broadcast %318 : vector<1x128xf32> to vector<4x128xf32>
    %320 = arith.addf %316, %319 : vector<4x128xf32>
    %cst_260 = arith.constant 0.000000e+00 : f32
    %321 = vector.broadcast %cst_260 : f32 to vector<4x128xf32>
    %322 = arith.maximumf %320, %321 : vector<4x128xf32>
    %c9_261 = arith.constant 9 : index
    %c0_262 = arith.constant 0 : index
    %c0_263 = arith.constant 0 : index
    %323 = vector.load %arg4[%c9_261, %c0_262, %c0_263] : memref<16x384x128xbf16, #tpu.memory_space<vmem>>, vector<1x384x128xbf16>
    %324 = vector.shape_cast %323 : vector<1x384x128xbf16> to vector<384x128xbf16>
    %cst_264 = arith.constant 0.000000e+00 : f32
    %325 = vector.broadcast %cst_264 : f32 to vector<1x128xf32>
    %c0_265 = arith.constant 0 : index
    %c0_266 = arith.constant 0 : index
    %326 = vector.load %arg10[%c0_265, %c0_266] : memref<18x128xf32, #tpu.memory_space<vmem>>, vector<1x128xf32>
    tpu.vector_store %arg10[%c0_265, %c0_266], %325 {strides = array<i32>} : memref<18x128xf32, #tpu.memory_space<vmem>>, vector<1x128xf32>,
    %c1_267 = arith.constant 1 : index
    %c0_268 = arith.constant 0 : index
    %327 = vector.load %arg10[%c1_267, %c0_268] : memref<18x128xf32, #tpu.memory_space<vmem>>, vector<4x128xf32>
    tpu.vector_store %arg10[%c1_267, %c0_268], %322 {strides = array<i32>} : memref<18x128xf32, #tpu.memory_space<vmem>>, vector<4x128xf32>,
    %c5_269 = arith.constant 5 : index
    %c0_270 = arith.constant 0 : index
    %328 = vector.load %arg10[%c5_269, %c0_270] : memref<18x128xf32, #tpu.memory_space<vmem>>, vector<1x128xf32>
    tpu.vector_store %arg10[%c5_269, %c0_270], %325 {strides = array<i32>} : memref<18x128xf32, #tpu.memory_space<vmem>>, vector<1x128xf32>,
    %c0_271 = arith.constant 0 : index
    %c0_272 = arith.constant 0 : index
    %329 = vector.load %arg10[%c0_271, %c0_272] : memref<18x128xf32, #tpu.memory_space<vmem>>, vector<4x128xf32>
    %c1_273 = arith.constant 1 : index
    %c0_274 = arith.constant 0 : index
    %330 = vector.load %arg10[%c1_273, %c0_274] : memref<18x128xf32, #tpu.memory_space<vmem>>, vector<4x128xf32>
    %c2_275 = arith.constant 2 : index
    %c0_276 = arith.constant 0 : index
    %331 = vector.load %arg10[%c2_275, %c0_276] : memref<18x128xf32, #tpu.memory_space<vmem>>, vector<4x128xf32>
    %332 = tpu.concatenate %329, %330, %331 in 1 : vector<4x128xf32>, vector<4x128xf32>, vector<4x128xf32> -> vector<4x384xf32>
    %333 = arith.truncf %332 : vector<4x384xf32> to vector<4x384xbf16>
    %cst_277 = arith.constant dense<0.000000e+00> : vector<4x128xf32>
    %334 = tpu.matmul %333, %324, %cst_277 {dimension_numbers = #tpu.dot_dimension_numbers<[1], [0], [0], [1], [0, 0, 1, 1], [], []>} : vector<4x384xbf16>, vector<384x128xbf16>, vector<4x128xf32> -> vector<4x128xf32>
    %c16 = arith.constant 16 : index
    %c0_278 = arith.constant 0 : index
    %c0_279 = arith.constant 0 : index
    %335 = vector.load %arg2[%c16, %c0_278, %c0_279] : memref<28x1x128xf32, #tpu.memory_space<vmem>>, vector<1x1x128xf32>
    %336 = vector.shape_cast %335 : vector<1x1x128xf32> to vector<1x128xf32>
    %337 = vector.broadcast %336 : vector<1x128xf32> to vector<4x128xf32>
    %338 = arith.mulf %334, %337 : vector<4x128xf32>
    %c16_280 = arith.constant 16 : index
    %c0_281 = arith.constant 0 : index
    %c0_282 = arith.constant 0 : index
    %339 = vector.load %arg3[%c16_280, %c0_281, %c0_282] : memref<28x1x128xf32, #tpu.memory_space<vmem>>, vector<1x1x128xf32>
    %340 = vector.shape_cast %339 : vector<1x1x128xf32> to vector<1x128xf32>
    %341 = vector.broadcast %340 : vector<1x128xf32> to vector<4x128xf32>
    %342 = arith.addf %338, %341 : vector<4x128xf32>
    %343 = tpu.iota {dimensions = array<i32: 0>} : vector<4x8xi32>
    %344 = tpu.iota {dimensions = array<i32: 1>} : vector<4x8xi32>
    %c2_i32_283 = arith.constant 2 : i32
    %345 = vector.broadcast %c2_i32_283 : i32 to vector<4x8xi32>
    %346 = arith.muli %345, %343 : vector<4x8xi32>
    %c0_i32_284 = arith.constant 0 : i32
    %347 = vector.broadcast %c0_i32_284 : i32 to vector<4x8xi32>
    %348 = arith.addi %346, %347 : vector<4x8xi32>
    %349 = arith.cmpi eq, %344, %348 : vector<4x8xi32>
    %350 = arith.extui %349 : vector<4x8xi1> to vector<4x8xi32>
    %351 = arith.sitofp %350 : vector<4x8xi32> to vector<4x8xf32>
    %cst_285 = arith.constant dense<0.000000e+00> : vector<4x128xf32>
    %352 = tpu.matmul %351, %282, %cst_285 {dimension_numbers = #tpu.dot_dimension_numbers<[1], [0], [0], [1], [0, 0, 1, 1], [], []>} : vector<4x8xf32>, vector<8x128xf32>, vector<4x128xf32> -> vector<4x128xf32>
    %353 = arith.truncf %352 : vector<4x128xf32> to vector<4x128xbf16>
    %c1_286 = arith.constant 1 : index
    %c0_287 = arith.constant 0 : index
    %c0_288 = arith.constant 0 : index
    %354 = vector.load %arg5[%c1_286, %c0_287, %c0_288] : memref<3x128x128xbf16, #tpu.memory_space<vmem>>, vector<1x128x128xbf16>
    %355 = vector.shape_cast %354 : vector<1x128x128xbf16> to vector<128x128xbf16>
    %cst_289 = arith.constant dense<0.000000e+00> : vector<4x128xf32>
    %356 = tpu.matmul %353, %355, %cst_289 {dimension_numbers = #tpu.dot_dimension_numbers<[1], [0], [0], [1], [0, 0, 1, 1], [], []>} : vector<4x128xbf16>, vector<128x128xbf16>, vector<4x128xf32> -> vector<4x128xf32>
    %c17_290 = arith.constant 17 : index
    %c0_291 = arith.constant 0 : index
    %c0_292 = arith.constant 0 : index
    %357 = vector.load %arg2[%c17_290, %c0_291, %c0_292] : memref<28x1x128xf32, #tpu.memory_space<vmem>>, vector<1x1x128xf32>
    %358 = vector.shape_cast %357 : vector<1x1x128xf32> to vector<1x128xf32>
    %359 = vector.broadcast %358 : vector<1x128xf32> to vector<4x128xf32>
    %360 = arith.mulf %356, %359 : vector<4x128xf32>
    %c17_293 = arith.constant 17 : index
    %c0_294 = arith.constant 0 : index
    %c0_295 = arith.constant 0 : index
    %361 = vector.load %arg3[%c17_293, %c0_294, %c0_295] : memref<28x1x128xf32, #tpu.memory_space<vmem>>, vector<1x1x128xf32>
    %362 = vector.shape_cast %361 : vector<1x1x128xf32> to vector<1x128xf32>
    %363 = vector.broadcast %362 : vector<1x128xf32> to vector<4x128xf32>
    %364 = arith.addf %360, %363 : vector<4x128xf32>
    %365 = arith.addf %342, %364 : vector<4x128xf32>
    %c18 = arith.constant 18 : index
    %c0_296 = arith.constant 0 : index
    %c0_297 = arith.constant 0 : index
    %366 = vector.load %arg2[%c18, %c0_296, %c0_297] : memref<28x1x128xf32, #tpu.memory_space<vmem>>, vector<1x1x128xf32>
    %367 = vector.shape_cast %366 : vector<1x1x128xf32> to vector<1x128xf32>
    %368 = vector.broadcast %367 : vector<1x128xf32> to vector<4x128xf32>
    %369 = arith.mulf %365, %368 : vector<4x128xf32>
    %c18_298 = arith.constant 18 : index
    %c0_299 = arith.constant 0 : index
    %c0_300 = arith.constant 0 : index
    %370 = vector.load %arg3[%c18_298, %c0_299, %c0_300] : memref<28x1x128xf32, #tpu.memory_space<vmem>>, vector<1x1x128xf32>
    %371 = vector.shape_cast %370 : vector<1x1x128xf32> to vector<1x128xf32>
    %372 = vector.broadcast %371 : vector<1x128xf32> to vector<4x128xf32>
    %373 = arith.addf %369, %372 : vector<4x128xf32>
    %c10_301 = arith.constant 10 : index
    %c0_302 = arith.constant 0 : index
    %c0_303 = arith.constant 0 : index
    %374 = vector.load %arg4[%c10_301, %c0_302, %c0_303] : memref<16x384x128xbf16, #tpu.memory_space<vmem>>, vector<1x384x128xbf16>
    %375 = vector.shape_cast %374 : vector<1x384x128xbf16> to vector<384x128xbf16>
    %cst_304 = arith.constant 0.000000e+00 : f32
    %376 = vector.broadcast %cst_304 : f32 to vector<1x128xf32>
    %c0_305 = arith.constant 0 : index
    %c0_306 = arith.constant 0 : index
    %377 = vector.load %arg10[%c0_305, %c0_306] : memref<18x128xf32, #tpu.memory_space<vmem>>, vector<1x128xf32>
    tpu.vector_store %arg10[%c0_305, %c0_306], %376 {strides = array<i32>} : memref<18x128xf32, #tpu.memory_space<vmem>>, vector<1x128xf32>,
    %c1_307 = arith.constant 1 : index
    %c0_308 = arith.constant 0 : index
    %378 = vector.load %arg10[%c1_307, %c0_308] : memref<18x128xf32, #tpu.memory_space<vmem>>, vector<4x128xf32>
    tpu.vector_store %arg10[%c1_307, %c0_308], %373 {strides = array<i32>} : memref<18x128xf32, #tpu.memory_space<vmem>>, vector<4x128xf32>,
    %c5_309 = arith.constant 5 : index
    %c0_310 = arith.constant 0 : index
    %379 = vector.load %arg10[%c5_309, %c0_310] : memref<18x128xf32, #tpu.memory_space<vmem>>, vector<1x128xf32>
    tpu.vector_store %arg10[%c5_309, %c0_310], %376 {strides = array<i32>} : memref<18x128xf32, #tpu.memory_space<vmem>>, vector<1x128xf32>,
    %c0_311 = arith.constant 0 : index
    %c0_312 = arith.constant 0 : index
    %380 = vector.load %arg10[%c0_311, %c0_312] : memref<18x128xf32, #tpu.memory_space<vmem>>, vector<4x128xf32>
    %c1_313 = arith.constant 1 : index
    %c0_314 = arith.constant 0 : index
    %381 = vector.load %arg10[%c1_313, %c0_314] : memref<18x128xf32, #tpu.memory_space<vmem>>, vector<4x128xf32>
    %c2_315 = arith.constant 2 : index
    %c0_316 = arith.constant 0 : index
    %382 = vector.load %arg10[%c2_315, %c0_316] : memref<18x128xf32, #tpu.memory_space<vmem>>, vector<4x128xf32>
    %383 = tpu.concatenate %380, %381, %382 in 1 : vector<4x128xf32>, vector<4x128xf32>, vector<4x128xf32> -> vector<4x384xf32>
    %384 = arith.truncf %383 : vector<4x384xf32> to vector<4x384xbf16>
    %cst_317 = arith.constant dense<0.000000e+00> : vector<4x128xf32>
    %385 = tpu.matmul %384, %375, %cst_317 {dimension_numbers = #tpu.dot_dimension_numbers<[1], [0], [0], [1], [0, 0, 1, 1], [], []>} : vector<4x384xbf16>, vector<384x128xbf16>, vector<4x128xf32> -> vector<4x128xf32>
    %c19 = arith.constant 19 : index
    %c0_318 = arith.constant 0 : index
    %c0_319 = arith.constant 0 : index
    %386 = vector.load %arg2[%c19, %c0_318, %c0_319] : memref<28x1x128xf32, #tpu.memory_space<vmem>>, vector<1x1x128xf32>
    %387 = vector.shape_cast %386 : vector<1x1x128xf32> to vector<1x128xf32>
    %388 = vector.broadcast %387 : vector<1x128xf32> to vector<4x128xf32>
    %389 = arith.mulf %385, %388 : vector<4x128xf32>
    %c19_320 = arith.constant 19 : index
    %c0_321 = arith.constant 0 : index
    %c0_322 = arith.constant 0 : index
    %390 = vector.load %arg3[%c19_320, %c0_321, %c0_322] : memref<28x1x128xf32, #tpu.memory_space<vmem>>, vector<1x1x128xf32>
    %391 = vector.shape_cast %390 : vector<1x1x128xf32> to vector<1x128xf32>
    %392 = vector.broadcast %391 : vector<1x128xf32> to vector<4x128xf32>
    %393 = arith.addf %389, %392 : vector<4x128xf32>
    %cst_323 = arith.constant 0.000000e+00 : f32
    %394 = vector.broadcast %cst_323 : f32 to vector<4x128xf32>
    %395 = arith.maximumf %393, %394 : vector<4x128xf32>
    %c11_324 = arith.constant 11 : index
    %c0_325 = arith.constant 0 : index
    %c0_326 = arith.constant 0 : index
    %396 = vector.load %arg4[%c11_324, %c0_325, %c0_326] : memref<16x384x128xbf16, #tpu.memory_space<vmem>>, vector<1x384x128xbf16>
    %397 = vector.shape_cast %396 : vector<1x384x128xbf16> to vector<384x128xbf16>
    %cst_327 = arith.constant 0.000000e+00 : f32
    %398 = vector.broadcast %cst_327 : f32 to vector<1x128xf32>
    %c0_328 = arith.constant 0 : index
    %c0_329 = arith.constant 0 : index
    %399 = vector.load %arg10[%c0_328, %c0_329] : memref<18x128xf32, #tpu.memory_space<vmem>>, vector<1x128xf32>
    tpu.vector_store %arg10[%c0_328, %c0_329], %398 {strides = array<i32>} : memref<18x128xf32, #tpu.memory_space<vmem>>, vector<1x128xf32>,
    %c1_330 = arith.constant 1 : index
    %c0_331 = arith.constant 0 : index
    %400 = vector.load %arg10[%c1_330, %c0_331] : memref<18x128xf32, #tpu.memory_space<vmem>>, vector<4x128xf32>
    tpu.vector_store %arg10[%c1_330, %c0_331], %395 {strides = array<i32>} : memref<18x128xf32, #tpu.memory_space<vmem>>, vector<4x128xf32>,
    %c5_332 = arith.constant 5 : index
    %c0_333 = arith.constant 0 : index
    %401 = vector.load %arg10[%c5_332, %c0_333] : memref<18x128xf32, #tpu.memory_space<vmem>>, vector<1x128xf32>
    tpu.vector_store %arg10[%c5_332, %c0_333], %398 {strides = array<i32>} : memref<18x128xf32, #tpu.memory_space<vmem>>, vector<1x128xf32>,
    %c0_334 = arith.constant 0 : index
    %c0_335 = arith.constant 0 : index
    %402 = vector.load %arg10[%c0_334, %c0_335] : memref<18x128xf32, #tpu.memory_space<vmem>>, vector<4x128xf32>
    %c1_336 = arith.constant 1 : index
    %c0_337 = arith.constant 0 : index
    %403 = vector.load %arg10[%c1_336, %c0_337] : memref<18x128xf32, #tpu.memory_space<vmem>>, vector<4x128xf32>
    %c2_338 = arith.constant 2 : index
    %c0_339 = arith.constant 0 : index
    %404 = vector.load %arg10[%c2_338, %c0_339] : memref<18x128xf32, #tpu.memory_space<vmem>>, vector<4x128xf32>
    %405 = tpu.concatenate %402, %403, %404 in 1 : vector<4x128xf32>, vector<4x128xf32>, vector<4x128xf32> -> vector<4x384xf32>
    %406 = arith.truncf %405 : vector<4x384xf32> to vector<4x384xbf16>
    %cst_340 = arith.constant dense<0.000000e+00> : vector<4x128xf32>
    %407 = tpu.matmul %406, %397, %cst_340 {dimension_numbers = #tpu.dot_dimension_numbers<[1], [0], [0], [1], [0, 0, 1, 1], [], []>} : vector<4x384xbf16>, vector<384x128xbf16>, vector<4x128xf32> -> vector<4x128xf32>
    %c20 = arith.constant 20 : index
    %c0_341 = arith.constant 0 : index
    %c0_342 = arith.constant 0 : index
    %408 = vector.load %arg2[%c20, %c0_341, %c0_342] : memref<28x1x128xf32, #tpu.memory_space<vmem>>, vector<1x1x128xf32>
    %409 = vector.shape_cast %408 : vector<1x1x128xf32> to vector<1x128xf32>
    %410 = vector.broadcast %409 : vector<1x128xf32> to vector<4x128xf32>
    %411 = arith.mulf %407, %410 : vector<4x128xf32>
    %c20_343 = arith.constant 20 : index
    %c0_344 = arith.constant 0 : index
    %c0_345 = arith.constant 0 : index
    %412 = vector.load %arg3[%c20_343, %c0_344, %c0_345] : memref<28x1x128xf32, #tpu.memory_space<vmem>>, vector<1x1x128xf32>
    %413 = vector.shape_cast %412 : vector<1x1x128xf32> to vector<1x128xf32>
    %414 = vector.broadcast %413 : vector<1x128xf32> to vector<4x128xf32>
    %415 = arith.addf %411, %414 : vector<4x128xf32>
    %416 = arith.addf %415, %365 : vector<4x128xf32>
    %c21 = arith.constant 21 : index
    %c0_346 = arith.constant 0 : index
    %c0_347 = arith.constant 0 : index
    %417 = vector.load %arg2[%c21, %c0_346, %c0_347] : memref<28x1x128xf32, #tpu.memory_space<vmem>>, vector<1x1x128xf32>
    %418 = vector.shape_cast %417 : vector<1x1x128xf32> to vector<1x128xf32>
    %419 = vector.broadcast %418 : vector<1x128xf32> to vector<4x128xf32>
    %420 = arith.mulf %416, %419 : vector<4x128xf32>
    %c21_348 = arith.constant 21 : index
    %c0_349 = arith.constant 0 : index
    %c0_350 = arith.constant 0 : index
    %421 = vector.load %arg3[%c21_348, %c0_349, %c0_350] : memref<28x1x128xf32, #tpu.memory_space<vmem>>, vector<1x1x128xf32>
    %422 = vector.shape_cast %421 : vector<1x1x128xf32> to vector<1x128xf32>
    %423 = vector.broadcast %422 : vector<1x128xf32> to vector<4x128xf32>
    %424 = arith.addf %420, %423 : vector<4x128xf32>
    %c12_351 = arith.constant 12 : index
    %c0_352 = arith.constant 0 : index
    %c0_353 = arith.constant 0 : index
    %425 = vector.load %arg4[%c12_351, %c0_352, %c0_353] : memref<16x384x128xbf16, #tpu.memory_space<vmem>>, vector<1x384x128xbf16>
    %426 = vector.shape_cast %425 : vector<1x384x128xbf16> to vector<384x128xbf16>
    %cst_354 = arith.constant 0.000000e+00 : f32
    %427 = vector.broadcast %cst_354 : f32 to vector<1x128xf32>
    %c0_355 = arith.constant 0 : index
    %c0_356 = arith.constant 0 : index
    %428 = vector.load %arg10[%c0_355, %c0_356] : memref<18x128xf32, #tpu.memory_space<vmem>>, vector<1x128xf32>
    tpu.vector_store %arg10[%c0_355, %c0_356], %427 {strides = array<i32>} : memref<18x128xf32, #tpu.memory_space<vmem>>, vector<1x128xf32>,
    %c1_357 = arith.constant 1 : index
    %c0_358 = arith.constant 0 : index
    %429 = vector.load %arg10[%c1_357, %c0_358] : memref<18x128xf32, #tpu.memory_space<vmem>>, vector<4x128xf32>
    tpu.vector_store %arg10[%c1_357, %c0_358], %424 {strides = array<i32>} : memref<18x128xf32, #tpu.memory_space<vmem>>, vector<4x128xf32>,
    %c5_359 = arith.constant 5 : index
    %c0_360 = arith.constant 0 : index
    %430 = vector.load %arg10[%c5_359, %c0_360] : memref<18x128xf32, #tpu.memory_space<vmem>>, vector<1x128xf32>
    tpu.vector_store %arg10[%c5_359, %c0_360], %427 {strides = array<i32>} : memref<18x128xf32, #tpu.memory_space<vmem>>, vector<1x128xf32>,
    %c0_361 = arith.constant 0 : index
    %c0_362 = arith.constant 0 : index
    %431 = vector.load %arg10[%c0_361, %c0_362] : memref<18x128xf32, #tpu.memory_space<vmem>>, vector<4x128xf32>
    %c1_363 = arith.constant 1 : index
    %c0_364 = arith.constant 0 : index
    %432 = vector.load %arg10[%c1_363, %c0_364] : memref<18x128xf32, #tpu.memory_space<vmem>>, vector<4x128xf32>
    %c2_365 = arith.constant 2 : index
    %c0_366 = arith.constant 0 : index
    %433 = vector.load %arg10[%c2_365, %c0_366] : memref<18x128xf32, #tpu.memory_space<vmem>>, vector<4x128xf32>
    %434 = tpu.concatenate %431, %432, %433 in 1 : vector<4x128xf32>, vector<4x128xf32>, vector<4x128xf32> -> vector<4x384xf32>
    %435 = arith.truncf %434 : vector<4x384xf32> to vector<4x384xbf16>
    %cst_367 = arith.constant dense<0.000000e+00> : vector<4x128xf32>
    %436 = tpu.matmul %435, %426, %cst_367 {dimension_numbers = #tpu.dot_dimension_numbers<[1], [0], [0], [1], [0, 0, 1, 1], [], []>} : vector<4x384xbf16>, vector<384x128xbf16>, vector<4x128xf32> -> vector<4x128xf32>
    %437 = tpu.iota {dimensions = array<i32: 0>} : vector<2x4xi32>
    %438 = tpu.iota {dimensions = array<i32: 1>} : vector<2x4xi32>
    %c2_i32_368 = arith.constant 2 : i32
    %439 = vector.broadcast %c2_i32_368 : i32 to vector<2x4xi32>
    %440 = arith.muli %439, %437 : vector<2x4xi32>
    %c0_i32_369 = arith.constant 0 : i32
    %441 = vector.broadcast %c0_i32_369 : i32 to vector<2x4xi32>
    %442 = arith.addi %440, %441 : vector<2x4xi32>
    %443 = arith.cmpi eq, %438, %442 : vector<2x4xi32>
    %444 = arith.extui %443 : vector<2x4xi1> to vector<2x4xi32>
    %445 = arith.sitofp %444 : vector<2x4xi32> to vector<2x4xf32>
    %cst_370 = arith.constant dense<0.000000e+00> : vector<2x128xf32>
    %446 = tpu.matmul %445, %436, %cst_370 {dimension_numbers = #tpu.dot_dimension_numbers<[1], [0], [0], [1], [0, 0, 1, 1], [], []>} : vector<2x4xf32>, vector<4x128xf32>, vector<2x128xf32> -> vector<2x128xf32>
    %c22 = arith.constant 22 : index
    %c0_371 = arith.constant 0 : index
    %c0_372 = arith.constant 0 : index
    %447 = vector.load %arg2[%c22, %c0_371, %c0_372] : memref<28x1x128xf32, #tpu.memory_space<vmem>>, vector<1x1x128xf32>
    %448 = vector.shape_cast %447 : vector<1x1x128xf32> to vector<1x128xf32>
    %449 = vector.broadcast %448 : vector<1x128xf32> to vector<2x128xf32>
    %450 = arith.mulf %446, %449 : vector<2x128xf32>
    %c22_373 = arith.constant 22 : index
    %c0_374 = arith.constant 0 : index
    %c0_375 = arith.constant 0 : index
    %451 = vector.load %arg3[%c22_373, %c0_374, %c0_375] : memref<28x1x128xf32, #tpu.memory_space<vmem>>, vector<1x1x128xf32>
    %452 = vector.shape_cast %451 : vector<1x1x128xf32> to vector<1x128xf32>
    %453 = vector.broadcast %452 : vector<1x128xf32> to vector<2x128xf32>
    %454 = arith.addf %450, %453 : vector<2x128xf32>
    %cst_376 = arith.constant 0.000000e+00 : f32
    %455 = vector.broadcast %cst_376 : f32 to vector<2x128xf32>
    %456 = arith.maximumf %454, %455 : vector<2x128xf32>
    %c13_377 = arith.constant 13 : index
    %c0_378 = arith.constant 0 : index
    %c0_379 = arith.constant 0 : index
    %457 = vector.load %arg4[%c13_377, %c0_378, %c0_379] : memref<16x384x128xbf16, #tpu.memory_space<vmem>>, vector<1x384x128xbf16>
    %458 = vector.shape_cast %457 : vector<1x384x128xbf16> to vector<384x128xbf16>
    %cst_380 = arith.constant 0.000000e+00 : f32
    %459 = vector.broadcast %cst_380 : f32 to vector<1x128xf32>
    %c0_381 = arith.constant 0 : index
    %c0_382 = arith.constant 0 : index
    %460 = vector.load %arg10[%c0_381, %c0_382] : memref<18x128xf32, #tpu.memory_space<vmem>>, vector<1x128xf32>
    tpu.vector_store %arg10[%c0_381, %c0_382], %459 {strides = array<i32>} : memref<18x128xf32, #tpu.memory_space<vmem>>, vector<1x128xf32>,
    %c1_383 = arith.constant 1 : index
    %c0_384 = arith.constant 0 : index
    %461 = vector.load %arg10[%c1_383, %c0_384] : memref<18x128xf32, #tpu.memory_space<vmem>>, vector<2x128xf32>
    tpu.vector_store %arg10[%c1_383, %c0_384], %456 {strides = array<i32>} : memref<18x128xf32, #tpu.memory_space<vmem>>, vector<2x128xf32>,
    %c3_385 = arith.constant 3 : index
    %c0_386 = arith.constant 0 : index
    %462 = vector.load %arg10[%c3_385, %c0_386] : memref<18x128xf32, #tpu.memory_space<vmem>>, vector<1x128xf32>
    tpu.vector_store %arg10[%c3_385, %c0_386], %459 {strides = array<i32>} : memref<18x128xf32, #tpu.memory_space<vmem>>, vector<1x128xf32>,
    %c0_387 = arith.constant 0 : index
    %c0_388 = arith.constant 0 : index
    %463 = vector.load %arg10[%c0_387, %c0_388] : memref<18x128xf32, #tpu.memory_space<vmem>>, vector<2x128xf32>
    %c1_389 = arith.constant 1 : index
    %c0_390 = arith.constant 0 : index
    %464 = vector.load %arg10[%c1_389, %c0_390] : memref<18x128xf32, #tpu.memory_space<vmem>>, vector<2x128xf32>
    %c2_391 = arith.constant 2 : index
    %c0_392 = arith.constant 0 : index
    %465 = vector.load %arg10[%c2_391, %c0_392] : memref<18x128xf32, #tpu.memory_space<vmem>>, vector<2x128xf32>
    %466 = tpu.concatenate %463, %464, %465 in 1 : vector<2x128xf32>, vector<2x128xf32>, vector<2x128xf32> -> vector<2x384xf32>
    %467 = arith.truncf %466 : vector<2x384xf32> to vector<2x384xbf16>
    %cst_393 = arith.constant dense<0.000000e+00> : vector<2x128xf32>
    %468 = tpu.matmul %467, %458, %cst_393 {dimension_numbers = #tpu.dot_dimension_numbers<[1], [0], [0], [1], [0, 0, 1, 1], [], []>} : vector<2x384xbf16>, vector<384x128xbf16>, vector<2x128xf32> -> vector<2x128xf32>
    %c23 = arith.constant 23 : index
    %c0_394 = arith.constant 0 : index
    %c0_395 = arith.constant 0 : index
    %469 = vector.load %arg2[%c23, %c0_394, %c0_395] : memref<28x1x128xf32, #tpu.memory_space<vmem>>, vector<1x1x128xf32>
    %470 = vector.shape_cast %469 : vector<1x1x128xf32> to vector<1x128xf32>
    %471 = vector.broadcast %470 : vector<1x128xf32> to vector<2x128xf32>
    %472 = arith.mulf %468, %471 : vector<2x128xf32>
    %c23_396 = arith.constant 23 : index
    %c0_397 = arith.constant 0 : index
    %c0_398 = arith.constant 0 : index
    %473 = vector.load %arg3[%c23_396, %c0_397, %c0_398] : memref<28x1x128xf32, #tpu.memory_space<vmem>>, vector<1x1x128xf32>
    %474 = vector.shape_cast %473 : vector<1x1x128xf32> to vector<1x128xf32>
    %475 = vector.broadcast %474 : vector<1x128xf32> to vector<2x128xf32>
    %476 = arith.addf %472, %475 : vector<2x128xf32>
    %477 = tpu.iota {dimensions = array<i32: 0>} : vector<2x4xi32>
    %478 = tpu.iota {dimensions = array<i32: 1>} : vector<2x4xi32>
    %c2_i32_399 = arith.constant 2 : i32
    %479 = vector.broadcast %c2_i32_399 : i32 to vector<2x4xi32>
    %480 = arith.muli %479, %477 : vector<2x4xi32>
    %c0_i32_400 = arith.constant 0 : i32
    %481 = vector.broadcast %c0_i32_400 : i32 to vector<2x4xi32>
    %482 = arith.addi %480, %481 : vector<2x4xi32>
    %483 = arith.cmpi eq, %478, %482 : vector<2x4xi32>
    %484 = arith.extui %483 : vector<2x4xi1> to vector<2x4xi32>
    %485 = arith.sitofp %484 : vector<2x4xi32> to vector<2x4xf32>
    %cst_401 = arith.constant dense<0.000000e+00> : vector<2x128xf32>
    %486 = tpu.matmul %485, %416, %cst_401 {dimension_numbers = #tpu.dot_dimension_numbers<[1], [0], [0], [1], [0, 0, 1, 1], [], []>} : vector<2x4xf32>, vector<4x128xf32>, vector<2x128xf32> -> vector<2x128xf32>
    %487 = arith.truncf %486 : vector<2x128xf32> to vector<2x128xbf16>
    %c2_402 = arith.constant 2 : index
    %c0_403 = arith.constant 0 : index
    %c0_404 = arith.constant 0 : index
    %488 = vector.load %arg5[%c2_402, %c0_403, %c0_404] : memref<3x128x128xbf16, #tpu.memory_space<vmem>>, vector<1x128x128xbf16>
    %489 = vector.shape_cast %488 : vector<1x128x128xbf16> to vector<128x128xbf16>
    %cst_405 = arith.constant dense<0.000000e+00> : vector<2x128xf32>
    %490 = tpu.matmul %487, %489, %cst_405 {dimension_numbers = #tpu.dot_dimension_numbers<[1], [0], [0], [1], [0, 0, 1, 1], [], []>} : vector<2x128xbf16>, vector<128x128xbf16>, vector<2x128xf32> -> vector<2x128xf32>
    %c24 = arith.constant 24 : index
    %c0_406 = arith.constant 0 : index
    %c0_407 = arith.constant 0 : index
    %491 = vector.load %arg2[%c24, %c0_406, %c0_407] : memref<28x1x128xf32, #tpu.memory_space<vmem>>, vector<1x1x128xf32>
    %492 = vector.shape_cast %491 : vector<1x1x128xf32> to vector<1x128xf32>
    %493 = vector.broadcast %492 : vector<1x128xf32> to vector<2x128xf32>
    %494 = arith.mulf %490, %493 : vector<2x128xf32>
    %c24_408 = arith.constant 24 : index
    %c0_409 = arith.constant 0 : index
    %c0_410 = arith.constant 0 : index
    %495 = vector.load %arg3[%c24_408, %c0_409, %c0_410] : memref<28x1x128xf32, #tpu.memory_space<vmem>>, vector<1x1x128xf32>
    %496 = vector.shape_cast %495 : vector<1x1x128xf32> to vector<1x128xf32>
    %497 = vector.broadcast %496 : vector<1x128xf32> to vector<2x128xf32>
    %498 = arith.addf %494, %497 : vector<2x128xf32>
    %499 = arith.addf %476, %498 : vector<2x128xf32>
    %c25 = arith.constant 25 : index
    %c0_411 = arith.constant 0 : index
    %c0_412 = arith.constant 0 : index
    %500 = vector.load %arg2[%c25, %c0_411, %c0_412] : memref<28x1x128xf32, #tpu.memory_space<vmem>>, vector<1x1x128xf32>
    %501 = vector.shape_cast %500 : vector<1x1x128xf32> to vector<1x128xf32>
    %502 = vector.broadcast %501 : vector<1x128xf32> to vector<2x128xf32>
    %503 = arith.mulf %499, %502 : vector<2x128xf32>
    %c25_413 = arith.constant 25 : index
    %c0_414 = arith.constant 0 : index
    %c0_415 = arith.constant 0 : index
    %504 = vector.load %arg3[%c25_413, %c0_414, %c0_415] : memref<28x1x128xf32, #tpu.memory_space<vmem>>, vector<1x1x128xf32>
    %505 = vector.shape_cast %504 : vector<1x1x128xf32> to vector<1x128xf32>
    %506 = vector.broadcast %505 : vector<1x128xf32> to vector<2x128xf32>
    %507 = arith.addf %503, %506 : vector<2x128xf32>
    %c14_416 = arith.constant 14 : index
    %c0_417 = arith.constant 0 : index
    %c0_418 = arith.constant 0 : index
    %508 = vector.load %arg4[%c14_416, %c0_417, %c0_418] : memref<16x384x128xbf16, #tpu.memory_space<vmem>>, vector<1x384x128xbf16>
    %509 = vector.shape_cast %508 : vector<1x384x128xbf16> to vector<384x128xbf16>
    %cst_419 = arith.constant 0.000000e+00 : f32
    %510 = vector.broadcast %cst_419 : f32 to vector<1x128xf32>
    %c0_420 = arith.constant 0 : index
    %c0_421 = arith.constant 0 : index
    %511 = vector.load %arg10[%c0_420, %c0_421] : memref<18x128xf32, #tpu.memory_space<vmem>>, vector<1x128xf32>
    tpu.vector_store %arg10[%c0_420, %c0_421], %510 {strides = array<i32>} : memref<18x128xf32, #tpu.memory_space<vmem>>, vector<1x128xf32>,
    %c1_422 = arith.constant 1 : index
    %c0_423 = arith.constant 0 : index
    %512 = vector.load %arg10[%c1_422, %c0_423] : memref<18x128xf32, #tpu.memory_space<vmem>>, vector<2x128xf32>
    tpu.vector_store %arg10[%c1_422, %c0_423], %507 {strides = array<i32>} : memref<18x128xf32, #tpu.memory_space<vmem>>, vector<2x128xf32>,
    %c3_424 = arith.constant 3 : index
    %c0_425 = arith.constant 0 : index
    %513 = vector.load %arg10[%c3_424, %c0_425] : memref<18x128xf32, #tpu.memory_space<vmem>>, vector<1x128xf32>
    tpu.vector_store %arg10[%c3_424, %c0_425], %510 {strides = array<i32>} : memref<18x128xf32, #tpu.memory_space<vmem>>, vector<1x128xf32>,
    %c0_426 = arith.constant 0 : index
    %c0_427 = arith.constant 0 : index
    %514 = vector.load %arg10[%c0_426, %c0_427] : memref<18x128xf32, #tpu.memory_space<vmem>>, vector<2x128xf32>
    %c1_428 = arith.constant 1 : index
    %c0_429 = arith.constant 0 : index
    %515 = vector.load %arg10[%c1_428, %c0_429] : memref<18x128xf32, #tpu.memory_space<vmem>>, vector<2x128xf32>
    %c2_430 = arith.constant 2 : index
    %c0_431 = arith.constant 0 : index
    %516 = vector.load %arg10[%c2_430, %c0_431] : memref<18x128xf32, #tpu.memory_space<vmem>>, vector<2x128xf32>
    %517 = tpu.concatenate %514, %515, %516 in 1 : vector<2x128xf32>, vector<2x128xf32>, vector<2x128xf32> -> vector<2x384xf32>
    %518 = arith.truncf %517 : vector<2x384xf32> to vector<2x384xbf16>
    %cst_432 = arith.constant dense<0.000000e+00> : vector<2x128xf32>
    %519 = tpu.matmul %518, %509, %cst_432 {dimension_numbers = #tpu.dot_dimension_numbers<[1], [0], [0], [1], [0, 0, 1, 1], [], []>} : vector<2x384xbf16>, vector<384x128xbf16>, vector<2x128xf32> -> vector<2x128xf32>
    %c26 = arith.constant 26 : index
    %c0_433 = arith.constant 0 : index
    %c0_434 = arith.constant 0 : index
    %520 = vector.load %arg2[%c26, %c0_433, %c0_434] : memref<28x1x128xf32, #tpu.memory_space<vmem>>, vector<1x1x128xf32>
    %521 = vector.shape_cast %520 : vector<1x1x128xf32> to vector<1x128xf32>
    %522 = vector.broadcast %521 : vector<1x128xf32> to vector<2x128xf32>
    %523 = arith.mulf %519, %522 : vector<2x128xf32>
    %c26_435 = arith.constant 26 : index
    %c0_436 = arith.constant 0 : index
    %c0_437 = arith.constant 0 : index
    %524 = vector.load %arg3[%c26_435, %c0_436, %c0_437] : memref<28x1x128xf32, #tpu.memory_space<vmem>>, vector<1x1x128xf32>
    %525 = vector.shape_cast %524 : vector<1x1x128xf32> to vector<1x128xf32>
    %526 = vector.broadcast %525 : vector<1x128xf32> to vector<2x128xf32>
    %527 = arith.addf %523, %526 : vector<2x128xf32>
    %cst_438 = arith.constant 0.000000e+00 : f32
    %528 = vector.broadcast %cst_438 : f32 to vector<2x128xf32>
    %529 = arith.maximumf %527, %528 : vector<2x128xf32>
    %c15_439 = arith.constant 15 : index
    %c0_440 = arith.constant 0 : index
    %c0_441 = arith.constant 0 : index
    %530 = vector.load %arg4[%c15_439, %c0_440, %c0_441] : memref<16x384x128xbf16, #tpu.memory_space<vmem>>, vector<1x384x128xbf16>
    %531 = vector.shape_cast %530 : vector<1x384x128xbf16> to vector<384x128xbf16>
    %cst_442 = arith.constant 0.000000e+00 : f32
    %532 = vector.broadcast %cst_442 : f32 to vector<1x128xf32>
    %c0_443 = arith.constant 0 : index
    %c0_444 = arith.constant 0 : index
    %533 = vector.load %arg10[%c0_443, %c0_444] : memref<18x128xf32, #tpu.memory_space<vmem>>, vector<1x128xf32>
    tpu.vector_store %arg10[%c0_443, %c0_444], %532 {strides = array<i32>} : memref<18x128xf32, #tpu.memory_space<vmem>>, vector<1x128xf32>,
    %c1_445 = arith.constant 1 : index
    %c0_446 = arith.constant 0 : index
    %534 = vector.load %arg10[%c1_445, %c0_446] : memref<18x128xf32, #tpu.memory_space<vmem>>, vector<2x128xf32>
    tpu.vector_store %arg10[%c1_445, %c0_446], %529 {strides = array<i32>} : memref<18x128xf32, #tpu.memory_space<vmem>>, vector<2x128xf32>,
    %c3_447 = arith.constant 3 : index
    %c0_448 = arith.constant 0 : index
    %535 = vector.load %arg10[%c3_447, %c0_448] : memref<18x128xf32, #tpu.memory_space<vmem>>, vector<1x128xf32>
    tpu.vector_store %arg10[%c3_447, %c0_448], %532 {strides = array<i32>} : memref<18x128xf32, #tpu.memory_space<vmem>>, vector<1x128xf32>,
    %c0_449 = arith.constant 0 : index
    %c0_450 = arith.constant 0 : index
    %536 = vector.load %arg10[%c0_449, %c0_450] : memref<18x128xf32, #tpu.memory_space<vmem>>, vector<2x128xf32>
    %c1_451 = arith.constant 1 : index
    %c0_452 = arith.constant 0 : index
    %537 = vector.load %arg10[%c1_451, %c0_452] : memref<18x128xf32, #tpu.memory_space<vmem>>, vector<2x128xf32>
    %c2_453 = arith.constant 2 : index
    %c0_454 = arith.constant 0 : index
    %538 = vector.load %arg10[%c2_453, %c0_454] : memref<18x128xf32, #tpu.memory_space<vmem>>, vector<2x128xf32>
    %539 = tpu.concatenate %536, %537, %538 in 1 : vector<2x128xf32>, vector<2x128xf32>, vector<2x128xf32> -> vector<2x384xf32>
    %540 = arith.truncf %539 : vector<2x384xf32> to vector<2x384xbf16>
    %cst_455 = arith.constant dense<0.000000e+00> : vector<2x128xf32>
    %541 = tpu.matmul %540, %531, %cst_455 {dimension_numbers = #tpu.dot_dimension_numbers<[1], [0], [0], [1], [0, 0, 1, 1], [], []>} : vector<2x384xbf16>, vector<384x128xbf16>, vector<2x128xf32> -> vector<2x128xf32>
    %c27 = arith.constant 27 : index
    %c0_456 = arith.constant 0 : index
    %c0_457 = arith.constant 0 : index
    %542 = vector.load %arg2[%c27, %c0_456, %c0_457] : memref<28x1x128xf32, #tpu.memory_space<vmem>>, vector<1x1x128xf32>
    %543 = vector.shape_cast %542 : vector<1x1x128xf32> to vector<1x128xf32>
    %544 = vector.broadcast %543 : vector<1x128xf32> to vector<2x128xf32>
    %545 = arith.mulf %541, %544 : vector<2x128xf32>
    %c27_458 = arith.constant 27 : index
    %c0_459 = arith.constant 0 : index
    %c0_460 = arith.constant 0 : index
    %546 = vector.load %arg3[%c27_458, %c0_459, %c0_460] : memref<28x1x128xf32, #tpu.memory_space<vmem>>, vector<1x1x128xf32>
    %547 = vector.shape_cast %546 : vector<1x1x128xf32> to vector<1x128xf32>
    %548 = vector.broadcast %547 : vector<1x128xf32> to vector<2x128xf32>
    %549 = arith.addf %545, %548 : vector<2x128xf32>
    %550 = arith.addf %549, %499 : vector<2x128xf32>
    %cst_461 = arith.constant dense<0.000000e+00> : vector<128xf32>
    %551 = vector.multi_reduction <add>, %550, %cst_461 [0] : vector<2x128xf32> to vector<128xf32>
    %552 = vector.shape_cast %551 : vector<128xf32> to vector<1x128xf32>
    %cst_462 = arith.constant 5.000000e-01 : f32
    %553 = vector.broadcast %cst_462 : f32 to vector<1x128xf32>
    %554 = arith.mulf %552, %553 : vector<1x128xf32>
    %555 = arith.truncf %554 : vector<1x128xf32> to vector<1x128xbf16>
    %c0_463 = arith.constant 0 : index
    %c0_464 = arith.constant 0 : index
    %556 = vector.load %arg7[%c0_463, %c0_464] : memref<128x128xbf16, #tpu.memory_space<vmem>>, vector<128x128xbf16>
    %cst_465 = arith.constant dense<0.000000e+00> : vector<1x128xf32>
    %557 = tpu.matmul %555, %556, %cst_465 {dimension_numbers = #tpu.dot_dimension_numbers<[1], [0], [0], [1], [0, 0, 1, 1], [], []>} : vector<1x128xbf16>, vector<128x128xbf16>, vector<1x128xf32> -> vector<1x128xf32>
    %c0_466 = arith.constant 0 : index
    %c0_467 = arith.constant 0 : index
    %558 = vector.load %arg8[%c0_466, %c0_467] : memref<1x128xf32, #tpu.memory_space<vmem>>, vector<1x128xf32>
    %559 = arith.addf %557, %558 : vector<1x128xf32>
    %c0_468 = arith.constant 0 : index
    %c0_469 = arith.constant 0 : index
    %c0_470 = arith.constant 0 : index
    %560 = vector.load %arg9[%c0_468, %c0_469, %c0_470] : memref<1x1x128xf32, #tpu.memory_space<vmem>>, vector<1x1x128xf32>
    %561 = vector.shape_cast %560 : vector<1x1x128xf32> to vector<1x128xf32>
    %562 = vector.shape_cast %559 : vector<1x128xf32> to vector<1x1x128xf32>
    tpu.vector_store %arg9[%c0_468, %c0_469, %c0_470], %562 {strides = array<i32>} : memref<1x1x128xf32, #tpu.memory_space<vmem>>, vector<1x1x128xf32>,
    return
  }
  func.func @transform_0(%arg0: i32) -> (i32, i32, i32) {
    %c0_i32 = arith.constant 0 : i32
    %c0_i32_0 = arith.constant 0 : i32
    %c0_i32_1 = arith.constant 0 : i32
    return %arg0, %c0_i32, %c0_i32_0 : i32, i32, i32
  }
  func.func @transform_1(%arg0: i32) -> (i32, i32, i32) {
    %c0_i32 = arith.constant 0 : i32
    %c0_i32_0 = arith.constant 0 : i32
    %c0_i32_1 = arith.constant 0 : i32
    %c0_i32_2 = arith.constant 0 : i32
    return %c0_i32, %c0_i32_0, %c0_i32_1 : i32, i32, i32
  }
  func.func @transform_2(%arg0: i32) -> (i32, i32, i32) {
    %c0_i32 = arith.constant 0 : i32
    %c0_i32_0 = arith.constant 0 : i32
    %c0_i32_1 = arith.constant 0 : i32
    %c0_i32_2 = arith.constant 0 : i32
    return %c0_i32, %c0_i32_0, %c0_i32_1 : i32, i32, i32
  }
  func.func @transform_3(%arg0: i32) -> (i32, i32, i32) {
    %c0_i32 = arith.constant 0 : i32
    %c0_i32_0 = arith.constant 0 : i32
    %c0_i32_1 = arith.constant 0 : i32
    %c0_i32_2 = arith.constant 0 : i32
    return %c0_i32, %c0_i32_0, %c0_i32_1 : i32, i32, i32
  }
  func.func @transform_4(%arg0: i32) -> (i32, i32, i32) {
    %c0_i32 = arith.constant 0 : i32
    %c0_i32_0 = arith.constant 0 : i32
    %c0_i32_1 = arith.constant 0 : i32
    %c0_i32_2 = arith.constant 0 : i32
    return %c0_i32, %c0_i32_0, %c0_i32_1 : i32, i32, i32
  }
  func.func @transform_5(%arg0: i32) -> (i32, i32) {
    %c0_i32 = arith.constant 0 : i32
    %c0_i32_0 = arith.constant 0 : i32
    %c0_i32_1 = arith.constant 0 : i32
    return %c0_i32, %c0_i32_0 : i32, i32
  }
  func.func @transform_6(%arg0: i32) -> (i32, i32) {
    %c0_i32 = arith.constant 0 : i32
    %c0_i32_0 = arith.constant 0 : i32
    %c0_i32_1 = arith.constant 0 : i32
    return %c0_i32, %c0_i32_0 : i32, i32
  }
  func.func @transform_7(%arg0: i32) -> (i32, i32) {
    %c0_i32 = arith.constant 0 : i32
    %c0_i32_0 = arith.constant 0 : i32
    %c0_i32_1 = arith.constant 0 : i32
    return %c0_i32, %c0_i32_0 : i32, i32
  }
  func.func @transform_8(%arg0: i32) -> (i32, i32, i32) {
    %c0_i32 = arith.constant 0 : i32
    %c0_i32_0 = arith.constant 0 : i32
    %c0_i32_1 = arith.constant 0 : i32
    return %arg0, %c0_i32, %c0_i32_0 : i32, i32, i32
  }
}

</mosaic_0001>

<bundles_post_ra>
// kernel: tpu_custom_call.1
= control target key start
LH: loop header
LB: loop body
LE: loop exit
PB: predicated region body
PF: predicated region fallthrough
CT: control target
= control target key end

     0   :  { %s10078_s0 = inlined_call_operand.hbm [shape: f32[2,32,32], index: 0, kind: input, shape index: {}]   ;;  %s10079_s1 = inlined_call_operand.hbm [shape: f32[28,1,128], index: 1, kind: input, shape index: {}]   ;;  %s10080_s2 = inlined_call_operand.hbm [shape: f32[28,1,128], index: 2, kind: input, shape index: {}]   ;;  %s10081_s3 = inlined_call_operand.hbm [shape: bf16[16,384,128], index: 3, kind: input, shape index: {}]   ;;  %s10082_s4 = inlined_call_operand.hbm [shape: bf16[3,128,128], index: 4, kind: input, shape index: {}]   ;;  %s10083_s5 = inlined_call_operand.hbm [shape: bf16[32,128], index: 5, kind: input, shape index: {}]   ;;  %s10084_s6 = inlined_call_operand.hbm [shape: bf16[128,128], index: 6, kind: input, shape index: {}]   ;;  %s10085_s7 = inlined_call_operand.hbm [shape: f32[1,128], index: 7, kind: input, shape index: {}]   ;;  %s10086_s8 = inlined_call_operand.hbm [shape: f32[2,1,128], index: 8, kind: output, shape index: {}]  }
   0x1   :  { %10092 = sst [smem:[#allocation24_spill]] %s10079_s1 }
   0x2   :  { %13 = vsyncpa [#allocation4], 0 }
   0x3   :  { %15 = vsyncpa [#allocation4 + $0x1], 0 }
   0x4   :  { %16 = vsyncpa [#allocation7], 0 }
   0x5   :  { %17 = vsyncpa [#allocation10], 0 }
   0x6   :  { %18 = vsyncpa [#allocation13], 0 }
   0x7   :  { %19 = vsyncpa [#allocation16], 0 }
   0x8   :  { %20 = vsyncpa [#allocation5], 0 }
   0x9   :  { %22 = vsyncpa [#allocation5 + $0x1], 0  ;;  %s9392_s27 = smov 0   ;;  %s9394_s28 = smov 0  }
   0xa   :  { %s9396_s29 = smov 0   ;;  %s9398_s30 = smov 0  }
   0xb LB: > { %s9329_s9 = smov [#allocation6]   ;;  %s9413_s11 = sadd.s32 4294967295, %s9327_s30   ;;  %s9327_s30 = sphi %s9398_s30, %s10119_s30   ;;  %s9323_s29 = sphi %s9396_s29, %s10118_s29   ;;  %s9319_s28 = sphi %s9394_s28, %s10117_s28   ;;  %s9315_s27 = sphi %s9392_s27, %s10116_s27  }
   0xc   : > { %s244_s10 = sshll.u32 %s9329_s9, 4  ;;  %p6881_p0 = scmp.ge.s32.totalorder %s9327_s30, 1  ;;  %s9418_s10 = int_to_ptr.vmem [resolvable:$true] %s244_s10 }
   0xd   : > { %p10088_p1 = scmp.eq.s32.totalorder %s9413_s11, 0  ;;  %p232_p2 = scmp.lt.s32.totalorder %s9327_s30, 3 }
   0xe   : > { %s9330_s13 = smov [#allocation9]   ;;  %s9331_s16 = smov [#allocation12]  }
   0xf   : > { %p9420_p3 = pnand %p6881_p0, %p232_p2  ;;  %s270_s14 = sshll.u32 %s9330_s13, 4  ;;  %s9433_s14 = int_to_ptr.vmem [resolvable:$true] %s270_s14 }
  0x10   : > { %s9435_s17 = sshll.u32 %s9331_s16, 4  ;;  %s10095_s1 = sld [smem:[#allocation24_spill]]  ;;  %s297_s17 = int_to_ptr.vmem [resolvable:$true] %s9435_s17 }
  0x11   : > { %s10093_s12 = scalar_select %p9420_p3, 1, 0 }
  0x12   : > { %p8507_p5 = pneg %p9420_p3 }
  0x14   : > { %p9429_p6 = pnand %p8507_p5, %p10088_p1 }
  0x16   : > { %s9019_s20 = scalar_lea.hbm %s10095_s1, 448  ;;  %p9445_p8 = pneg %p9429_p6 }
  0x17   : > { %p9020_p7 = scmp.ne.s32.totalorder %s10095_s1, %s9019_s20  ;;  %p9026_p11 = scmp.lt.u32.totalorder %s9019_s20, %s10095_s1 }
  0x19   : > { %p9022_p9 = pnand %p9445_p8, %p9020_p7 }
  0x1b   : > { %p9023_p10 = pneg %p9022_p9 }
  0x1d   : > { %p9028_p12 = pnand %p9026_p11, %p9023_p10 }
  0x1f   : > { %9031 = shalt.err (!%p9028_p12)
}
  0x20   : > { %s9032_s26 = scalar_lea.vmem %s9418_s10, 448  ;;  %p9040_p5 = scmp.lt.s32.totalorder %s9418_s10, %s9418_s10 }
  0x21   : > { %p9033_p13 = scmp.ne.s32.totalorder %s9418_s10, %s9032_s26  ;;  %p9041_p4 = scmp.lt.s32.totalorder %s9032_s26, %s9032_s26 }
  0x23   : > { %p9035_p0 = pnand %p9033_p13, %p9445_p8  ;;  %p9042_p7 = por %p9041_p4, %p9040_p5 }
  0x25   : > { %p9036_p2 = pneg %p9035_p0 }
  0x27   : > { %p9043_p9 = pnand %p9042_p7, %p9036_p2 }
  0x29   : > { %9046 = shalt.err (!%p9043_p9)
}
  0x2a   : > { %s10087_s9 = smov 16   ;;  %s10090_s13 = smov 1  }
  0x2b   : > { %8510 = dma.hbm_to_vmem [thread:$0]  (!%p9429_p6), %s10095_s1, 448, %s9418_s10, [#allocation7], %s10087_s9, %s10087_s9, %s10090_s13  }
  0x2c   : > { %s9047_s21 = scalar_lea.hbm %s10081_s3, 49152 }
  0x2d   : > { %p9048_p4 = scmp.ne.s32.totalorder %s10081_s3, %s9047_s21  ;;  %p9054_p12 = scmp.lt.u32.totalorder %s9047_s21, %s10081_s3 }
  0x2f   : > { %p9050_p10 = pnand %p9048_p4, %p9445_p8 }
  0x31   : > { %p9051_p11 = pneg %p9050_p10 }
  0x33   : > { %p9056_p13 = pnand %p9054_p12, %p9051_p11 }
  0x35   : > { %9059 = shalt.err (!%p9056_p13)
}
  0x36   : > { %s9060_s10 = scalar_lea.vmem %s9433_s14, 49152  ;;  %p9068_p7 = scmp.lt.s32.totalorder %s9433_s14, %s9433_s14 }
  0x37   : > { %p9061_p0 = scmp.ne.s32.totalorder %s9433_s14, %s9060_s10  ;;  %p9069_p9 = scmp.lt.s32.totalorder %s9060_s10, %s9060_s10 }
  0x39   : > { %p9063_p2 = pnand %p9061_p0, %p9445_p8  ;;  %p9070_p4 = por %p9069_p9, %p9068_p7 }
  0x3b   : > { %p9064_p5 = pneg %p9063_p2 }
  0x3d   : > { %p9071_p10 = pnand %p9070_p4, %p9064_p5 }
  0x3f   : > { %9074 = shalt.err (!%p9071_p10)
}
  0x40   : > { %s9334_s16 = smov 64   ;;  %s9335_s18 = smov 4  }
  0x41   : > { %8516 = dma.hbm_to_vmem [thread:$0]  (!%p9429_p6), %s10081_s3, 49152, %s9433_s14, [#allocation10], %s9334_s16, %s9334_s16, %s9335_s18  }
  0x42   : > { %s9075_s24 = scalar_lea.hbm %s10083_s5, 256 }
  0x43   : > { %p9076_p11 = scmp.ne.s32.totalorder %s10083_s5, %s9075_s24  ;;  %p9082_p0 = scmp.lt.u32.totalorder %s9075_s24, %s10083_s5 }
  0x45   : > { %p9078_p12 = pnand %p9076_p11, %p9445_p8 }
  0x47   : > { %p9079_p13 = pneg %p9078_p12 }
  0x49   : > { %p9084_p2 = pnand %p9082_p0, %p9079_p13 }
  0x4b   : > { %9087 = shalt.err (!%p9084_p2)
}
  0x4c   : > { %s9088_s19 = scalar_lea.vmem %s297_s17, 256  ;;  %p9096_p4 = scmp.lt.s32.totalorder %s297_s17, %s297_s17 }
  0x4d   : > { %p9089_p5 = scmp.ne.s32.totalorder %s297_s17, %s9088_s19  ;;  %p9097_p10 = scmp.lt.s32.totalorder %s9088_s19, %s9088_s19 }
  0x4f   : > { %p9091_p7 = pnand %p9089_p5, %p9445_p8  ;;  %p9098_p1 = por %p9097_p10, %p9096_p4 }
  0x51   : > { %p9092_p9 = pneg %p9091_p7 }
  0x53   : > { %p9099_p3 = pnand %p9098_p1, %p9092_p9 }
  0x55   : > { %9102 = shalt.err (!%p9099_p3)
}
  0x56   : > { %8522 = dma.hbm_to_vmem [thread:$0]  (!%p9429_p6), %s10083_s5, 256, %s297_s17, [#allocation13], %s9334_s16, %s9334_s16, %s9335_s18  }
  0x57   : > { %s9336_s20 = smov [#allocation8]   ;;  %s9337_s22 = smov [#allocation11]  }
  0x58   : > { %s257_s21 = sshll.u32 %s9336_s20, 4  ;;  %s283_s24 = sshll.u32 %s9337_s22, 4  ;;  %s258_s21 = int_to_ptr.vmem [resolvable:$true] %s257_s21  ;;  %s284_s24 = int_to_ptr.vmem [resolvable:$true] %s283_s24 }
  0x59   : > { %s9103_s10 = scalar_lea.hbm %s10080_s2, 448 }
  0x5a   : > { %p9104_p1 = scmp.ne.s32.totalorder %s10080_s2, %s9103_s10  ;;  %p9110_p12 = scmp.lt.u32.totalorder %s9103_s10, %s10080_s2 }
  0x5c   : > { %p9106_p3 = pnand %p9104_p1, %p9445_p8 }
  0x5e   : > { %p9107_p11 = pneg %p9106_p3 }
  0x60   : > { %p9112_p13 = pnand %p9110_p12, %p9107_p11 }
  0x62   : > { %9115 = shalt.err (!%p9112_p13)
}
  0x63   : > { %s9116_s17 = scalar_lea.vmem %s258_s21, 448  ;;  %p9124_p7 = scmp.lt.s32.totalorder %s258_s21, %s258_s21 }
  0x64   : > { %p9117_p0 = scmp.ne.s32.totalorder %s258_s21, %s9116_s17  ;;  %p9125_p9 = scmp.lt.s32.totalorder %s9116_s17, %s9116_s17 }
  0x66   : > { %p9119_p2 = pnand %p9117_p0, %p9445_p8  ;;  %p9126_p4 = por %p9125_p9, %p9124_p7 }
  0x68   : > { %p9120_p5 = pneg %p9119_p2 }
  0x6a   : > { %p9127_p10 = pnand %p9126_p4, %p9120_p5 }
  0x6c   : > { %9130 = shalt.err (!%p9127_p10)
}
  0x6d   : > { %s10097_s13 = smov 1   ;;  %s10098_s9 = smov 16  }
  0x6e   : > { %8513 = dma.hbm_to_vmem [thread:$0]  (!%p9429_p6), %s10080_s2, 448, %s258_s21, [#allocation7], %s10098_s9, %s10098_s9, %s10097_s13  }
  0x6f   : > { %s9131_s26 = scalar_lea.hbm %s10082_s4, 3072 }
  0x70   : > { %p9132_p1 = scmp.ne.s32.totalorder %s10082_s4, %s9131_s26  ;;  %p9138_p12 = scmp.lt.u32.totalorder %s9131_s26, %s10082_s4 }
  0x72   : > { %p9134_p3 = pnand %p9132_p1, %p9445_p8 }
  0x74   : > { %p9135_p11 = pneg %p9134_p3 }
  0x76   : > { %p9140_p13 = pnand %p9138_p12, %p9135_p11 }
  0x78   : > { %9143 = shalt.err (!%p9140_p13)
}
  0x79   : > { %s9144_s1 = scalar_lea.vmem %s284_s24, 3072  ;;  %p9152_p7 = scmp.lt.s32.totalorder %s284_s24, %s284_s24 }
  0x7a   : > { %p9145_p0 = scmp.ne.s32.totalorder %s284_s24, %s9144_s1  ;;  %p9153_p9 = scmp.lt.s32.totalorder %s9144_s1, %s9144_s1 }
  0x7c   : > { %p9147_p2 = pnand %p9145_p0, %p9445_p8  ;;  %p9154_p4 = por %p9153_p9, %p9152_p7 }
  0x7e   : > { %p9148_p5 = pneg %p9147_p2 }
  0x80   : > { %p9155_p10 = pnand %p9154_p4, %p9148_p5 }
  0x82   : > { %9158 = shalt.err (!%p9155_p10)
}
  0x83   : > { %8519 = dma.hbm_to_vmem [thread:$0]  (!%p9429_p6), %s10082_s4, 3072, %s284_s24, [#allocation10], %s9334_s16, %s9334_s16, %s9335_s18  }
  0x84   : > { %s9338_s9 = smov [#allocation14]   ;;  %s9339_s22 = smov [#allocation15]  }
  0x85   : > { %s309_s20 = sshll.u32 %s9338_s9, 4  ;;  %s323_s25 = sshll.u32 %s9339_s22, 4  ;;  %s310_s20 = int_to_ptr.vmem [resolvable:$true] %s309_s20  ;;  %s324_s25 = int_to_ptr.vmem [resolvable:$true] %s323_s25 }
  0x86   : > { %s9159_s19 = scalar_lea.hbm %s10084_s6, 1024 }
  0x87   : > { %p9160_p1 = scmp.ne.s32.totalorder %s10084_s6, %s9159_s19  ;;  %p9166_p12 = scmp.lt.u32.totalorder %s9159_s19, %s10084_s6 }
  0x89   : > { %p9162_p3 = pnand %p9160_p1, %p9445_p8 }
  0x8b   : > { %p9163_p11 = pneg %p9162_p3 }
  0x8d   : > { %p9168_p13 = pnand %p9166_p12, %p9163_p11 }
  0x8f   : > { %9171 = shalt.err (!%p9168_p13)
}
  0x90   : > { %s9172_s24 = scalar_lea.vmem %s310_s20, 1024  ;;  %p9180_p7 = scmp.lt.s32.totalorder %s310_s20, %s310_s20 }
  0x91   : > { %p9173_p0 = scmp.ne.s32.totalorder %s310_s20, %s9172_s24  ;;  %p9181_p9 = scmp.lt.s32.totalorder %s9172_s24, %s9172_s24 }
  0x93   : > { %p9175_p2 = pnand %p9173_p0, %p9445_p8  ;;  %p9182_p4 = por %p9181_p9, %p9180_p7 }
  0x95   : > { %p9176_p5 = pneg %p9175_p2 }
  0x97   : > { %p9183_p10 = pnand %p9182_p4, %p9176_p5 }
  0x99   : > { %9186 = shalt.err (!%p9183_p10)
}
  0x9a   : > { %8525 = dma.hbm_to_vmem [thread:$0]  (!%p9429_p6), %s10084_s6, 1024, %s310_s20, [#allocation13], %s9334_s16, %s9334_s16, %s9335_s18  }
  0x9b   : > { %s9187_s10 = scalar_lea.hbm %s10085_s7, 16 }
  0x9c   : > { %p9188_p1 = scmp.ne.s32.totalorder %s10085_s7, %s9187_s10  ;;  %p9194_p12 = scmp.lt.u32.totalorder %s9187_s10, %s10085_s7 }
  0x9e   : > { %p9190_p3 = pnand %p9188_p1, %p9445_p8 }
  0xa0   : > { %p9191_p11 = pneg %p9190_p3 }
  0xa2   : > { %p9196_p13 = pnand %p9194_p12, %p9191_p11 }
  0xa4   : > { %9199 = shalt.err (!%p9196_p13)
}
  0xa5   : > { %s9200_s21 = scalar_lea.vmem %s324_s25, 16  ;;  %s9207_s16 = scalar_lea.vmem %s324_s25, 32 }
  0xa6   : > { %p9201_p0 = scmp.ne.s32.totalorder %s324_s25, %s9200_s21  ;;  %p9208_p7 = scmp.lt.s32.totalorder %s324_s25, %s324_s25 }
  0xa7   : > { %p9209_p9 = scmp.lt.s32.totalorder %s9207_s16, %s9200_s21 }
  0xa8   : > { %p9203_p2 = pnand %p9201_p0, %p9445_p8 }
  0xa9   : > { %p9210_p4 = por %p9209_p9, %p9208_p7 }
  0xaa   : > { %p9204_p5 = pneg %p9203_p2 }
  0xac   : > { %p9211_p10 = pnand %p9210_p4, %p9204_p5 }
  0xae   : > { %9214 = shalt.err (!%p9211_p10)
}
  0xaf   : > { %8528 = dma.hbm_to_vmem [thread:$0]  (!%p9429_p6), %s10085_s7, 16, %s324_s25, [#allocation16]  }
  0xb0   : > { %s6880_s23 = sadd.s32 4294967294, %s9327_s30   ;;  %s9600_s15 = sadd.s32 1, %s9327_s30  }
  0xb1   : > { %s35_s24 = sadd.s32 1, %s9323_s29  ;;  %s32_s13 = ssub.s32 %s9327_s30, %s9600_s15 }
  0xb2   : > { %p42_p8 = scmp.ne.s32.totalorder %s9323_s29, %s9319_s28  ;;  %p33_p1 = scmp.eq.s32.totalorder %s32_s13, 0 }
  0xb3   : > { %p43_p3 = scmp.eq.s32.totalorder %s9327_s30, 0  ;;  %p48_p11 = scmp.ne.s32.totalorder %s9319_s28, %s9315_s27 }
  0xb4   : > { %p219_p12 = scmp.eq.s32.totalorder %s9413_s11, 1  ;;  %p10099_p0 = scmp.eq.s32.totalorder %s9413_s11, 0 }
  0xb5   : > { %s9612_s9 = scalar_select %p33_p1, %s9323_s29, %s35_s24  }
  0xb6   : > { %p44_p13 = por %p43_p3, %p42_p8  ;;  %p9616_p2 = por %p10099_p0, %p48_p11 }
  0xb7   : > { %p9620_p6 = por %p219_p12, %p42_p8  ;;  %p225_p5 = scmp.eq.s32.totalorder %s6880_s23, 1 }
  0xb8   : > { %p8544_p7 = scmp.lt.s32.totalorder %s9327_s30, 2  ;;  %s334_s26 = sand.u32 1, %s9323_s29  }
  0xb9   : > { %s10101_s25 = scalar_select %p9620_p6, 1, 0 }
  0xba   : > { %p9626_p9 = por %p225_p5, %p48_p11  ;;  %s6890_s19 = sshll.u32 %s334_s26, 5 }
  0xbb   : > { %s7401_s14 = sshll.u32 %s9327_s30, 9  ;;  %s338_s16 = scalar_lea.vmem [#allocation3], %s6890_s19 }
  0xbc   : > { %s10102_s10 = scalar_select %p9626_p9, 1, 0 }
  0xbd   : > { %s9634_s21 = scalar_lea.hbm %s10078_s0, %s7401_s14  ;;  %s345_s18 = sshll.u32 %s338_s16, 4  ;;  %s9640_s18 = int_to_ptr.vmem [resolvable:$true] %s345_s18 }
  0xbe   : > { %p9636_p4 = pnand %p8544_p7, %p44_p13  ;;  %s9642_s23 = scalar_lea.sflag [#allocation4], %s334_s26 }
  0xbf   : > { %s9215_s24 = scalar_lea.hbm %s9634_s21, 512  ;;  %s9220_s14 = scalar_lea.hbm %s10078_s0, 1024 }
  0xc0   : > { %p9216_p10 = scmp.ne.s32.totalorder %s9634_s21, %s9215_s24  ;;  %p9217_p8 = pneg %p9636_p4 }
  0xc1   : > { %p9221_p11 = scmp.lt.u32.totalorder %s9634_s21, %s10078_s0  ;;  %p9222_p12 = scmp.lt.u32.totalorder %s9220_s14, %s9215_s24 }
  0xc2   : > { %p9218_p1 = pnand %p9217_p8, %p9216_p10  ;;  %p9224_p0 = scmp.lt.u32.totalorder %s9215_s24, %s9634_s21 }
  0xc3   : > { %p9223_p13 = por %p9222_p12, %p9221_p11 }
  0xc4   : > { %p9219_p3 = pneg %p9218_p1 }
  0xc5   : > { %p9225_p5 = por %p9224_p0, %p9223_p13 }
  0xc7   : > { %p9226_p7 = pnand %p9225_p5, %p9219_p3 }
  0xc9   : > { %9229 = shalt.err (!%p9226_p7)
}
  0xca   : > { %s9230_s26 = scalar_lea.vmem %s9640_s18, 512  ;;  %s9340_s16 = smov [#allocation3]  }
  0xcb   : > { %p9231_p10 = scmp.ne.s32.totalorder %s9640_s18, %s9230_s26  ;;  %s9235_s13 = sshll.u32 %s9340_s16, 4  ;;  %s9236_s13 = int_to_ptr.vmem [resolvable:$false] %s9235_s13 }
  0xcc   : > { %s9237_s19 = scalar_lea.vmem %s9236_s13, 1024  ;;  %p9238_p6 = scmp.lt.s32.totalorder %s9640_s18, %s9236_s13 }
  0xcd   : > { %p9233_p1 = pnand %p9231_p10, %p9217_p8  ;;  %p9239_p11 = scmp.lt.s32.totalorder %s9237_s19, %s9230_s26 }
  0xcf   : > { %p9234_p9 = pneg %p9233_p1  ;;  %p9240_p12 = por %p9239_p11, %p9238_p6 }
  0xd1   : > { %p9241_p13 = pnand %p9240_p12, %p9234_p9 }
  0xd3   : > { %9244 = shalt.err (!%p9241_p13)
}
  0xd4   : > { %s9341_s24 = smov 128   ;;  %s9342_s14 = smov 8  }
  0xd5   : > { %8532 = dma.hbm_to_vmem [thread:$0]  (!%p9636_p4), %s9634_s21, 512, %s9640_s18, %s9642_s23, %s9341_s24, %s9341_s24, %s9342_s14  }
  0xd6   : > { %p10104_p8 = scmp.ne.s32.totalorder %s10093_s12, 0 }
  0xd7   : > { %s9673_s17 = sand.u32 (!%p10104_p8), 1, %s9319_s28  }
  0xd8   : > { %357 = sbr.rel (%p10104_p8) target bundleno = 6024 (0x1788), region = 52  ;;  %s6894_s1 = sshll.u32 (!%p10104_p8), %s9673_s17, 5 }
  0xd9   : > { %s360_s26 = scalar_lea.sflag (!%p10104_p8), [#allocation4], %s9673_s17  ;;  %s363_s16 = scalar_lea.vmem (!%p10104_p8), [#allocation3], %s6894_s1 }
  0xdf   : > { %9290 = dma.done.wait (%p9616_p2), %s360_s26, 512  }
  0xe0   : > { %9292 = vsyncadd (%p9616_p2), %s360_s26, 4294966784  ;;  %p10105_p6 = scmp.eq.s32.totalorder %s9413_s11, 0 }
  0xe2   : > { %9294 = dma.done.wait (%p10105_p6), [#allocation7], 896   ;;  %p10106_p9 = pmov %p10105_p6 }
  0xe3   : > { %p10107_p4 = pmov %p10105_p6 }
  0xe4   : > { %9296 = vsyncadd (%p10106_p9), [#allocation7], 4294966400 }
  0xe5   : > { %9298 = dma.done.wait (%p10107_p4), [#allocation10], 52224   ;;  %p10108_p3 = pmov %p10107_p4 }
  0xe7   : > { %9300 = vsyncadd (%p10108_p3), [#allocation10], 4294915072  ;;  %p10109_p0 = pmov %p10108_p3 }
  0xe9   : > { %9302 = dma.done.wait (%p10109_p0), [#allocation13], 1280   ;;  %p10110_p5 = pmov %p10109_p0 }
  0xea   : > { %p10111_p2 = pmov %p10109_p0 }
  0xeb   : > { %9304 = vsyncadd (%p10110_p5), [#allocation13], 4294966016 }
  0xec   : > { %9306 = dma.done.wait (%p10111_p2), [#allocation16], 16   ;;  %p10112_p7 = pmov %p10109_p0 }
  0xed   : > { %v8601_v0 = vld [vmem:[#allocation12] sm:$0xff]   ;;  %v8602_v1 = vld [vmem:[#allocation12 + $0x8] sm:$0xff]   ;;  %v425_v3 = vld [vmem:[%s363_s16 + $0x8] sm:$0xff]  ;;  %vm446_vm0 = vcmask 261120   ;;  %v528_v8 = vlaneseq  ;;  %v9343_v16 = vmov 0.0   ;;  %vm9344_vm7 = vmmov 0  }
  0xee   : > { %9308 = vsyncadd (%p10112_p7), [#allocation16], 4294967280  ;;  %7970 = vmatprep.subr.bf16.mxu0 %v8601_v0  ;;  %v424_v2 = vld [vmem:[%s363_s16] sm:$0xff]  ;;  %v426_v4 = vld [vmem:[%s363_s16 + $0x10] sm:$0xff]  ;;  %872 = vst [vmem:[#allocation2] sm:$0x1] %v9343_v16 }
  0xef   : > { %7971 = vmatpush3.bf16.msra.mxu0 %v8601_v0  ;;  %v428_v5 = vpack.c.bf16 %v425_v3, %v424_v2  ;;  %v427_v6 = vld [vmem:[%s363_s16 + $0x18] sm:$0xff]  ;;  %v529_v9 = vshrl.u32 %v528_v8, 7  ;;  %v532_v13 = vand.u32 127, %v528_v8  ;;  %875 = vst [vmem:[#allocation2 + $0x11] sm:$0x1] %v9343_v16  ;;  %v8606_v47 = vld [vmem:[#allocation9 + $0x48] sm:$0xff]  }
  0xf0   : > { %7972 = vmatprep.subr.bf16.mxu0 %v8602_v1  ;;  %v429_v7 = vpack.c.bf16 %v427_v6, %v426_v4  ;;  %v6906_v21 = vld [vmem:[#allocation6] ss:$0 sm:$0xff]  ;;  %v6907_v22 = vld [vmem:[#allocation8] ss:$0 sm:$0xff]  ;;  %v8609_v51 = vld [vmem:[#allocation9 + $0x50] sm:$0xff]   ;;  %vm2391_vm8 = vcmask 130048  }
  0xf1   : > { %7974 = vmatprep.mubr.msk.bf16.mxu0 %vm446_vm0, %v428_v5  ;;  %v530_v10 = vadd.s32 8, %v529_v9  ;;  %v533_v11 = vmul.u32 2, %v529_v9  ;;  %v8603_v45 = vld [vmem:[#allocation9 + $0x40] sm:$0xff]   ;;  %v8607_v49 = vld [vmem:[#allocation9 + $0x88] sm:$0xff]   ;;  %v8610_v52 = vld [vmem:[#allocation9 + $0x90] sm:$0xff]   ;;  %vm3897_vm9 = vcmask 64512  }
  0xf2   : > { %v8605_v46 = vld [vmem:[#allocation9] sm:$0xff]   ;;  %v8608_v50 = vld [vmem:[#allocation9 + $0x8] sm:$0xff]   ;;  %v8611_v53 = vld [vmem:[#allocation9 + $0x10] sm:$0xff]   ;;  %vm5407_vm10 = vcmask 1043456   ;;  %vm5404_vm11 = vcmask 31744   ;;  %vm6618_vm12 = vcmask 1041408  }
  0xf3   : > { %7973 = vmatpush3.bf16.msra.mxu0 %v8602_v1  ;;  %v534_v12 = vmul.u32 2, %v530_v10  ;;  %v535_v14 = vadd.s32 4294967295, %v533_v11  ;;  %vm624_vm2 = vcmp.eq.s32.totalorder %v532_v13, %v533_v11  ;;  %v713_v19 = vadd.s32 1, %v533_v11  ;;  %v8604_v48 = vld [vmem:[#allocation9 + $0x80] sm:$0xff]   ;;  %v8612_v54 = vld [vmem:[#allocation9 + $0x58] sm:$0xff]   ;;  %v8618_v60 = vld [vmem:[#allocation9 + $0x68] sm:$0xff]  }
  0xf4   : > { %v9703_v18 = vsel %vm624_vm2, 1.0, %v9343_v16  ;;  %v8613_v55 = vld [vmem:[#allocation9 + $0x98] sm:$0xff]   ;;  %v8615_v57 = vld [vmem:[#allocation9 + $0x60] sm:$0xff]   ;;  %v8619_v61 = vld [vmem:[#allocation9 + $0xa8] sm:$0xff]   ;;  %s7398_s12 = sshll.u32 %s9413_s11, 4  ;;  %s422_s22 = scalar_lea.vmem [#allocation17], %s9673_s17 }
  0xf5   : > { %v536_v15 = vadd.s32 4294967295, %v534_v12  ;;  %vm537_vm1 = vcmp.eq.s32.totalorder %v532_v13, %v535_v14  ;;  %vm625_vm4 = vcmp.eq.s32.totalorder %v532_v13, %v534_v12  ;;  %v714_v20 = vadd.s32 1, %v534_v12  ;;  %v8614_v56 = vld [vmem:[#allocation9 + $0x18] sm:$0xff]   ;;  %v8616_v58 = vld [vmem:[#allocation9 + $0xa0] sm:$0xff]   ;;  %v8620_v62 = vld [vmem:[#allocation9 + $0x28] sm:$0xff]   ;;  %s6747_s21 = sshll.u32 %s422_s22, 4  ;;  %s10034_s23 = scalar_lea.hbm %s10086_s8, %s7398_s12  ;;  %s10036_s21 = int_to_ptr.vmem [resolvable:$true] %s6747_s21 }
  0xf6   : > { %7975 = vmatmul.mubr.msk.bf16.vlgmr.msra.gmra.mrb[0].mxu0 %vm446_vm0, %v429_v7  ;;  %v6908_v17 = vsel %vm537_vm1, 1.0, %v9343_v16  ;;  %vm715_vm5 = vcmp.eq.s32.totalorder %v532_v13, %v713_v19  ;;  %v6913_v35 = vsel %vm625_vm4, 1.0, %v9343_v16  ;;  %v8617_v59 = vld [vmem:[#allocation9 + $0x20] sm:$0xff]   ;;  %v8621_v63 = vld [vmem:[#allocation9 + $0x70] sm:$0xff]   ;;  %v8624_v2 = vld [vmem:[#allocation9 + $0x78] sm:$0xff]   ;;  %s6735_s13 = scalar_lea.sflag [#allocation5], %s9673_s17 }
  0xf7   : > { %vm538_vm3 = vcmp.eq.s32.totalorder %v532_v13, %v536_v15  ;;  %7986 = vmatprep.mubr.msk.f32.mxu1 %vm446_vm0, %v6908_v17  ;;  %7997 = vmatprep.mubr.msk.f32.mxu0 %vm446_vm0, %v9703_v18  ;;  %vm716_vm6 = vcmp.eq.s32.totalorder %v532_v13, %v714_v20  ;;  %v6916_v37 = vsel %vm715_vm5, 1.0, %v9343_v16  ;;  %v8622_v0 = vld [vmem:[#allocation9 + $0xb0] sm:$0xff]   ;;  %v8625_v3 = vld [vmem:[#allocation9 + $0xb8] sm:$0xff]   ;;  %v8627_v5 = vld [vmem:[#allocation9 + $0x100] sm:$0xff]   ;;  %s9245_s11 = scalar_lea.vmem %s10036_s21, 16  ;;  %p10113_p1 = scmp.ne.s32.totalorder %s10101_s25, 0 }
  0xf8   : > { %v6909_v34 = vsel %vm538_vm3, 1.0, %v9343_v16  ;;  %v6917_v38 = vsel %vm716_vm6, 1.0, %v9343_v16  ;;  %v8623_v1 = vld [vmem:[#allocation9 + $0x30] sm:$0xff]   ;;  %v8626_v4 = vld [vmem:[#allocation9 + $0x38] sm:$0xff]   ;;  %v6920_v13 = vld [vmem:[#allocation6 + $0x1] ss:$0 sm:$0xff]  ;;  %p9246_p10 = scmp.ne.s32.totalorder %s10036_s21, %s9245_s11 }
  0xf9   : > { %v6921_v17 = vld [vmem:[#allocation8 + $0x1] ss:$0 sm:$0xff]  ;;  %s9346_s19 = smov [#allocation17]  }
  0xfa   : > { %p9247_p11 = pnand %p9246_p10, %p10113_p1  ;;  %s9249_s24 = sshll.u32 %s9346_s19, 4  ;;  %s9250_s24 = int_to_ptr.vmem [resolvable:$false] %s9249_s24 }
  0xfb   : > { %s9251_s14 = scalar_lea.vmem %s9250_s24, 32  ;;  %p9252_p13 = scmp.lt.s32.totalorder %s10036_s21, %s9250_s24 }
  0xfc   : > { %p9248_p12 = pneg %p9247_p11  ;;  %p9253_p8 = scmp.lt.s32.totalorder %s9251_s14, %s9245_s11 }
  0xfe   : > { %p9254_p6 = por %p9253_p8, %p9252_p13 }
 0x100   : > { %p9255_p9 = pnand %p9254_p6, %p9248_p12 }
 0x1c9   : > { %v7976_v23 = vpop.f32.mrb[0].mxu0 }
 0x1ca   : > { %v511_v24 = vmul.f32 %v7976_v23, %v6906_v21  ;;  %v487_v25 = vpop.f32.mrb[1].mxu0 }
 0x1cb   : > { %v509_v26 = vmul.f32 %v6906_v21, %v487_v25  ;;  %v7977_v27 = vpop.f32.mrb[2].mxu0 }
 0x1cc   : > { %v522_v28 = vadd.f32 %v6907_v22, %v511_v24  ;;  %v512_v29 = vmul.f32 %v7977_v27, %v6906_v21  ;;  %v490_v30 = vpop.f32.mrb[3].mxu0  ;;  %v8629_v27 = vld [vmem:[#allocation9 + $0xc0] sm:$0xff]  }
 0x1cd   : > { %v520_v31 = vadd.f32 %v6907_v22, %v509_v26  ;;  %v510_v32 = vmul.f32 %v6906_v21, %v490_v30  ;;  %v8628_v26 = vld [vmem:[#allocation9 + $0x140] sm:$0xff]  }
 0x1ce   : > { %v523_v33 = vadd.f32 %v6907_v22, %v512_v29  ;;  %v526_v39 = vmax.f32 %v522_v28, 0.0 }
 0x1cf   : > { %v521_v36 = vadd.f32 %v6907_v22, %v510_v32  ;;  %v524_v41 = vmax.f32 %v520_v31, 0.0 }
 0x1d0   : > { %v527_v40 = vmax.f32 %v523_v33, 0.0  ;;  %v8630_v33 = vld [vmem:[#allocation9 + $0x108] sm:$0xff]  }
 0x1d1   : > { %v525_v42 = vmax.f32 %v521_v36, 0.0  ;;  %v8633_v36 = vld [vmem:[#allocation9 + $0x110] sm:$0xff]  }
 0x1d2   : > { %v8449_v43 = vpack.c.bf16 %v527_v40, %v526_v39  ;;  %v8636_v39 = vld [vmem:[#allocation9 + $0x118] sm:$0xff]  }
 0x1d3   : > { %v8445_v44 = vpack.c.bf16 %v525_v42, %v524_v41  ;;  %v8637_v40 = vld [vmem:[#allocation9 + $0x158] sm:$0xff]   ;;  %v8639_v42 = vld [vmem:[#allocation9 + $0x120] sm:$0xff]  }
 0x1d4   : > { %v8638_v41 = vld [vmem:[#allocation9 + $0xd8] sm:$0xff]  }
 0x1d5   : > { %8446 = vmatprep.subr.bf16.mxu1 %v8445_v44  ;;  %8454 = vmatprep.subr.bf16.mxu0 %v8445_v44 }
 0x1d6   : > { %8448 = vmatpush3.bf16.msra.mxu1 %v8445_v44  ;;  %8456 = vmatpush3.bf16.msra.mxu0 %v8445_v44 }
 0x1d7   : > { %8450 = vmatprep.subr.bf16.mxu1 %v8449_v43  ;;  %8458 = vmatprep.subr.bf16.mxu0 %v8449_v43 }
 0x1da   : > { %8452 = vmatpush3.bf16.msra.mxu1 %v8449_v43  ;;  %8460 = vmatpush3.bf16.msra.mxu0 %v8449_v43 }
 0x1db   : > { %8462 = vmatprep.subr.bf16.mxu1 %v8445_v44  ;;  %7424 = vmatprep.subr.bf16.mxu0 %v8603_v45  ;;  %v8642_v45 = vld [vmem:[#allocation9 + $0x128] sm:$0xff]  }
 0x1dd   : > { %7987 = vmatmul.mubr.msk.f32.vlgmr.msra.gmra.mrb[0].mxu1 %vm446_vm0, %v6909_v34  ;;  %7998 = vmatmul.mubr.msk.f32.vlgmr.msra.gmra.mrb[4].mxu0 %vm446_vm0, %v6913_v35  ;;  %v8631_v34 = vld [vmem:[#allocation9 + $0x148] sm:$0xff]  }
 0x1de   : > { %8464 = vmatpush3.bf16.msra.mxu1 %v8445_v44  ;;  %8008 = vmatprep.mubr.msk.f32.mxu1 %vm446_vm0, %v6916_v37  ;;  %v8632_v35 = vld [vmem:[#allocation9 + $0xc8] sm:$0xff]   ;;  %v8634_v37 = vld [vmem:[#allocation9 + $0x150] sm:$0xff]   ;;  %v8641_v44 = vld [vmem:[#allocation9 + $0xe0] sm:$0xff]  }
 0x1df   : > { %8466 = vmatprep.subr.bf16.mxu1 %v8449_v43  ;;  %7425 = vmatpush3.bf16.msra.mxu0 %v8605_v46  ;;  %v8643_v46 = vld [vmem:[#allocation9 + $0x168] sm:$0xff]  }
 0x1e0   : > { %7426 = vmatprep.subr.bf16.mxu0 %v8606_v47  ;;  %v8644_v47 = vld [vmem:[#allocation9 + $0xe8] sm:$0xff]  }
 0x1e2   : > { %8468 = vmatpush3.bf16.msra.mxu1 %v8449_v43  ;;  %v8640_v43 = vld [vmem:[#allocation9 + $0x160] sm:$0xff]  }
 0x1e3   : > { %8011 = vmatprep.subr.bf16.mxu1 %v9343_v16  ;;  %7427 = vmatpush3.bf16.msra.mxu0 %v8608_v50  ;;  %v8647_v50 = vld [vmem:[#allocation9 + $0xf0] sm:$0xff]  }
 0x1e4   : > { %7428 = vmatprep.subr.bf16.mxu0 %v8609_v51  ;;  %v8648_v51 = vld [vmem:[#allocation9 + $0x138] sm:$0xff]  }
 0x1e5   : > { %8009 = vmatmul.mubr.msk.f32.vlgmr.msra.gmra.mrb[2].mxu1 %vm446_vm0, %v6917_v38  ;;  %v8635_v38 = vld [vmem:[#allocation9 + $0xd0] sm:$0xff]  }
 0x1e6   : > { %8012 = vmatpush3.bf16.msra.mxu1 %v8604_v48  ;;  %8027 = vmatprep.mubr.msk.bf16.mxu1 %vm9344_vm7, %v9343_v16  ;;  %v8645_v48 = vld [vmem:[#allocation9 + $0x130] sm:$0xff]  }
 0x1e7   : > { %8013 = vmatprep.subr.bf16.mxu1 %v9343_v16  ;;  %7429 = vmatpush3.bf16.msra.mxu0 %v8611_v53  ;;  %v8650_v53 = vld [vmem:[#allocation9 + $0xf8] sm:$0xff]  }
 0x1e8   : > { %7430 = vmatprep.subr.bf16.mxu0 %v8612_v54  ;;  %v8651_v54 = vld [vmem:[#allocation9 + $0x1c0] sm:$0xff]  }
 0x1ea   : > { %8014 = vmatpush3.bf16.msra.mxu1 %v8607_v49  ;;  %v8646_v49 = vld [vmem:[#allocation9 + $0x170] sm:$0xff]  }
 0x1eb   : > { %8015 = vmatprep.subr.bf16.mxu1 %v9343_v16  ;;  %7431 = vmatpush3.bf16.msra.mxu0 %v8614_v56 }
 0x1ec   : > { %7432 = vmatprep.subr.bf16.mxu0 %v8615_v57 }
 0x1ee   : > { %8016 = vmatpush3.bf16.msra.mxu1 %v8610_v52  ;;  %v8649_v52 = vld [vmem:[#allocation9 + $0x178] sm:$0xff]  }
 0x1ef   : > { %8017 = vmatprep.subr.bf16.mxu1 %v9343_v16  ;;  %7433 = vmatpush3.bf16.msra.mxu0 %v8617_v59 }
 0x1f0   : > { %7434 = vmatprep.subr.bf16.mxu0 %v8618_v60 }
 0x1f2   : > { %8018 = vmatpush3.bf16.msra.mxu1 %v8613_v55 }
 0x1f3   : > { %8019 = vmatprep.subr.bf16.mxu1 %v9343_v16  ;;  %7435 = vmatpush3.bf16.msra.mxu0 %v8620_v62  ;;  %v6946_v62 = vld [vmem:[#allocation6 + $0x2] ss:$0 sm:$0xff] }
 0x1f4   : > { %7436 = vmatprep.subr.bf16.mxu0 %v8621_v63 }
 0x1f6   : > { %8020 = vmatpush3.bf16.msra.mxu1 %v8616_v58 }
 0x1f7   : > { %8021 = vmatprep.subr.bf16.mxu1 %v9343_v16  ;;  %7437 = vmatpush3.bf16.msra.mxu0 %v8623_v1 }
 0x1f8   : > { %7438 = vmatprep.subr.bf16.mxu0 %v8624_v2 }
 0x1fa   : > { %8022 = vmatpush3.bf16.msra.mxu1 %v8619_v61 }
 0x1fb   : > { %8023 = vmatprep.subr.bf16.mxu1 %v9343_v16  ;;  %7439 = vmatpush3.bf16.msra.mxu0 %v8626_v4 }
 0x1fc   : > { %7455 = vmatprep.subr.bf16.mxu0 %v8627_v5 }
 0x1fe   : > { %8024 = vmatpush3.bf16.msra.mxu1 %v8622_v0 }
 0x1ff   : > { %8025 = vmatprep.subr.bf16.mxu1 %v9343_v16 }
 0x202   : > { %8026 = vmatpush3.bf16.msra.mxu1 %v8625_v3  ;;  %v6947_v3 = vld [vmem:[#allocation8 + $0x2] ss:$0 sm:$0xff] }
 0x203   : > { %8031 = vmatprep.subr.bf16.mxu1 %v9343_v16 }
 0x2b0   : > { %v7988_v6 = vpop.f32.mrb[0].mxu1  ;;  %v7999_v7 = vpop.f32.mrb[4].mxu0 }
 0x2b1   : > { %v712_v8 = vmax.f32 %v7988_v6, %v7999_v7  ;;  %v615_v9 = vpop.f32.mrb[1].mxu1  ;;  %v702_v10 = vpop.f32.mrb[5].mxu0 }
 0x2b2   : > { %v711_v11 = vmax.f32 %v615_v9, %v702_v10 }
 0x2b8   : > { %v8010_v12 = vpop.f32.mrb[2].mxu1 }
 0x2b9   : > { %v9731_v14 = vmax.f32 %v712_v8, %v8010_v12  ;;  %v793_v15 = vpop.f32.mrb[3].mxu1 }
 0x2ba   : > { %v9733_v19 = vmax.f32 %v711_v11, %v793_v15  ;;  %v8653_v15 = vld [vmem:[#allocation9 + $0x180] sm:$0xff]  }
 0x2bb   : > { %v813_v20 = vmul.f32 %v6920_v13, %v9731_v14 }
 0x2bc   : > { %v812_v21 = vmul.f32 %v6920_v13, %v9733_v19  ;;  %v8652_v13 = vld [vmem:[#allocation9 + $0x200] sm:$0xff]  }
 0x2bd   : > { %v823_v22 = vadd.f32 %v6921_v17, %v813_v20 }
 0x2be   : > { %v822_v23 = vadd.f32 %v6921_v17, %v812_v21 }
 0x2bf   : > { %874 = vst [vmem:[#allocation2 + $0x9] sm:$0xff] %v823_v22 }
 0x2c0   : > { %873 = vst [vmem:[#allocation2 + $0x1] sm:$0xff] %v822_v23  ;;  %v883_v24 = vpack.c.bf16 %v823_v22, %v822_v23 }
 0x2c2   : > { %1061 = vmatprep.mubr.bf16.mxu0 %v883_v24  ;;  %v8654_v24 = vld [vmem:[#allocation9 + $0x1c8] sm:$0xff]  }
 0x2c6   : > { %v881_v25 = vld [vmem:[#allocation2 + $0xa] sm:$0xff] }
 0x2c7   : > { %v876_v28 = vld [vmem:[#allocation2] sm:$0xff]  ;;  %v877_v29 = vld [vmem:[#allocation2 + $0x8] sm:$0xff]  ;;  %1185 = vst [vmem:[#allocation2 + $0x11] sm:$0x1] %v9343_v16 }
 0x2c8   : > { %v880_v30 = vld [vmem:[#allocation2 + $0x2] sm:$0xff]  ;;  %1182 = vst [vmem:[#allocation2] sm:$0x1] %v9343_v16  ;;  %v882_v32 = vpack.c.bf16 %v877_v29, %v876_v28 }
 0x2c9   : > { %v884_v31 = vpack.c.bf16 %v881_v25, %v880_v30  ;;  %v8655_v25 = vld [vmem:[#allocation9 + $0x208] sm:$0xff]   ;;  %v8658_v28 = vld [vmem:[#allocation9 + $0x210] sm:$0xff]   ;;  %v8660_v30 = vld [vmem:[#allocation9 + $0x1d8] sm:$0xff]  }
 0x2ca   : > { %1062 = vmatmul.mubr.bf16.vlgmr.msra.gmra.mrb[8].mxu0 %v882_v32  ;;  %v8659_v29 = vld [vmem:[#allocation9 + $0x190] sm:$0xff]   ;;  %v8662_v32 = vld [vmem:[#allocation9 + $0x198] sm:$0xff]  }
 0x2cb   : > { %8028 = vmatmul.mubr.bf16.vlgmr.msra.gmra.mrb[4].mxu1 %v884_v31  ;;  %7456 = vmatpush3.bf16.msra.mxu0 %v8629_v27  ;;  %v8657_v27 = vld [vmem:[#allocation9 + $0x1d0] sm:$0xff]   ;;  %v8661_v31 = vld [vmem:[#allocation9 + $0x218] sm:$0xff]  }
 0x2cc   : > { %8032 = vmatpush3.bf16.msra.mxu1 %v8628_v26  ;;  %7457 = vmatprep.subr.bf16.mxu0 %v8630_v33  ;;  %v8656_v26 = vld [vmem:[#allocation9 + $0x188] sm:$0xff]   ;;  %v8663_v33 = vld [vmem:[#allocation9 + $0x1e0] sm:$0xff]  }
 0x2cd   : > { %8033 = vmatprep.subr.bf16.mxu1 %v9343_v16  ;;  %8047 = vmatprep.mubr.msk.bf16.mxu1 %vm9344_vm7, %v9343_v16 }
 0x2cf   : > { %7458 = vmatpush3.bf16.msra.mxu0 %v8632_v35  ;;  %v8665_v35 = vld [vmem:[#allocation9 + $0x1a0] sm:$0xff]  }
 0x2d0   : > { %8034 = vmatpush3.bf16.msra.mxu1 %v8631_v34  ;;  %7459 = vmatprep.subr.bf16.mxu0 %v8633_v36  ;;  %v8664_v34 = vld [vmem:[#allocation9 + $0x220] sm:$0xff]   ;;  %v8666_v36 = vld [vmem:[#allocation9 + $0x1e8] sm:$0xff]  }
 0x2d1   : > { %8035 = vmatprep.subr.bf16.mxu1 %v9343_v16 }
 0x2d3   : > { %7460 = vmatpush3.bf16.msra.mxu0 %v8635_v38  ;;  %v8668_v38 = vld [vmem:[#allocation9 + $0x1a8] sm:$0xff]  }
 0x2d4   : > { %8036 = vmatpush3.bf16.msra.mxu1 %v8634_v37  ;;  %7461 = vmatprep.subr.bf16.mxu0 %v8636_v39  ;;  %v8667_v37 = vld [vmem:[#allocation9 + $0x228] sm:$0xff]   ;;  %v8669_v39 = vld [vmem:[#allocation9 + $0x1f0] sm:$0xff]  }
 0x2d5   : > { %8037 = vmatprep.subr.bf16.mxu1 %v9343_v16 }
 0x2d7   : > { %7462 = vmatpush3.bf16.msra.mxu0 %v8638_v41  ;;  %v8671_v41 = vld [vmem:[#allocation9 + $0x1b0] sm:$0xff]  }
 0x2d8   : > { %8038 = vmatpush3.bf16.msra.mxu1 %v8637_v40  ;;  %7463 = vmatprep.subr.bf16.mxu0 %v8639_v42  ;;  %v8670_v40 = vld [vmem:[#allocation9 + $0x230] sm:$0xff]   ;;  %v8672_v42 = vld [vmem:[#allocation9 + $0x1f8] sm:$0xff]  }
 0x2d9   : > { %8039 = vmatprep.subr.bf16.mxu1 %v9343_v16 }
 0x2db   : > { %7464 = vmatpush3.bf16.msra.mxu0 %v8641_v44  ;;  %v8674_v44 = vld [vmem:[#allocation9 + $0x1b8] sm:$0xff]  }
 0x2dc   : > { %8040 = vmatpush3.bf16.msra.mxu1 %v8640_v43  ;;  %7465 = vmatprep.subr.bf16.mxu0 %v8642_v45  ;;  %v8673_v43 = vld [vmem:[#allocation9 + $0x238] sm:$0xff]   ;;  %v8675_v45 = vld [vmem:[#allocation9 + $0x280] sm:$0xff]  }
 0x2dd   : > { %8041 = vmatprep.subr.bf16.mxu1 %v9343_v16 }
 0x2df   : > { %7466 = vmatpush3.bf16.msra.mxu0 %v8644_v47 }
 0x2e0   : > { %8042 = vmatpush3.bf16.msra.mxu1 %v8643_v46  ;;  %7467 = vmatprep.subr.bf16.mxu0 %v8645_v48 }
 0x2e1   : > { %8043 = vmatprep.subr.bf16.mxu1 %v9343_v16 }
 0x2e3   : > { %7468 = vmatpush3.bf16.msra.mxu0 %v8647_v50 }
 0x2e4   : > { %8044 = vmatpush3.bf16.msra.mxu1 %v8646_v49  ;;  %7469 = vmatprep.subr.bf16.mxu0 %v8648_v51 }
 0x2e5   : > { %8045 = vmatprep.subr.bf16.mxu1 %v9343_v16 }
 0x2e7   : > { %7470 = vmatpush3.bf16.msra.mxu0 %v8650_v53  ;;  %v6972_v53 = vld [vmem:[#allocation6 + $0x3] ss:$0 sm:$0xff] }
 0x2e8   : > { %8046 = vmatpush3.bf16.msra.mxu1 %v8649_v52  ;;  %7486 = vmatprep.subr.bf16.mxu0 %v8651_v54 }
 0x2e9   : > { %8051 = vmatprep.subr.bf16.mxu1 %v9343_v16 }
 0x39d   : > { %v7440_v56 = vpop.f32.mrb[8].mxu0 }
 0x39e   : > { %v1104_v55 = vpop.f32.mrb[4].mxu1  ;;  %v7441_v58 = vpop.f32.mrb[9].mxu0 }
 0x39f   : > { %v8029_v57 = vpop.f32.mrb[5].mxu1  ;;  %v7442_v59 = vadd.f32 %v7441_v58, %v7440_v56  ;;  %v7443_v61 = vpop.f32.mrb[10].mxu0  ;;  %v6973_v58 = vld [vmem:[#allocation8 + $0x3] ss:$0 sm:$0xff] }
 0x3a0   : > { %v1107_v60 = vpop.f32.mrb[6].mxu1  ;;  %v7444_v0 = vpop.f32.mrb[11].mxu0 }
 0x3a1   : > { %v8030_v63 = vpop.f32.mrb[7].mxu1  ;;  %v1105_v1 = vadd.f32 %v7442_v59, %v1104_v55  ;;  %v7445_v2 = vadd.f32 %v7444_v0, %v7443_v61 }
 0x3a2   : > { %v6974_v63 = vld [vmem:[#allocation6 + $0x4] ss:$0 sm:$0xff] }
 0x3a3   : > { %v1119_v4 = vmul.f32 %v6946_v62, %v1105_v1  ;;  %v1108_v5 = vadd.f32 %v7445_v2, %v1107_v60  ;;  %v6975_v2 = vld [vmem:[#allocation8 + $0x4] ss:$0 sm:$0xff] }
 0x3a5   : > { %v1129_v6 = vadd.f32 %v6947_v3, %v1119_v4  ;;  %v1120_v7 = vmul.f32 %v6946_v62, %v1108_v5 }
 0x3a7   : > { %v1131_v8 = vmax.f32 %v1129_v6, 0.0  ;;  %v1130_v9 = vadd.f32 %v6947_v3, %v1120_v7 }
 0x3a9   : > { %1183 = vst [vmem:[#allocation2 + $0x1] sm:$0xff] %v1131_v8  ;;  %v1132_v10 = vmax.f32 %v1130_v9, 0.0 }
 0x3ab   : > { %1184 = vst [vmem:[#allocation2 + $0x9] sm:$0xff] %v1132_v10  ;;  %v1193_v11 = vpack.c.bf16 %v1132_v10, %v1131_v8  ;;  %v8677_v10 = vld [vmem:[#allocation9 + $0x240] sm:$0xff]  }
 0x3ad   : > { %1371 = vmatprep.mubr.bf16.mxu0 %v1193_v11 }
 0x3b0   : > { %v1186_v12 = vld [vmem:[#allocation2] sm:$0xff] }
 0x3b1   : > { %1512 = vst [vmem:[#allocation2] sm:$0x1] %v9343_v16 }
 0x3b2   : > { %v1187_v17 = vld [vmem:[#allocation2 + $0x8] sm:$0xff] }
 0x3b3   : > { %v1190_v20 = vld [vmem:[#allocation2 + $0x2] sm:$0xff]  ;;  %v1191_v21 = vld [vmem:[#allocation2 + $0xa] sm:$0xff]  ;;  %v1192_v23 = vpack.c.bf16 %v1187_v17, %v1186_v12  ;;  %v8678_v17 = vld [vmem:[#allocation9 + $0x288] sm:$0xff]  }
 0x3b4   : > { %v1194_v22 = vpack.c.bf16 %v1191_v21, %v1190_v20  ;;  %1515 = vst [vmem:[#allocation2 + $0x11] sm:$0x1] %v9343_v16  ;;  %v8679_v20 = vld [vmem:[#allocation9 + $0x2c8] sm:$0xff]  }
 0x3b5   : > { %1372 = vmatmul.mubr.bf16.vlgmr.msra.gmra.mrb[12].mxu0 %v1192_v23  ;;  %v8680_v21 = vld [vmem:[#allocation9 + $0x248] sm:$0xff]   ;;  %v8682_v23 = vld [vmem:[#allocation9 + $0x2d0] sm:$0xff]  }
 0x3b6   : > { %8048 = vmatmul.mubr.bf16.vlgmr.msra.gmra.mrb[8].mxu1 %v1194_v22  ;;  %7487 = vmatpush3.bf16.msra.mxu0 %v8653_v15  ;;  %v8681_v22 = vld [vmem:[#allocation9 + $0x290] sm:$0xff]  }
 0x3b7   : > { %8052 = vmatpush3.bf16.msra.mxu1 %v8652_v13  ;;  %8067 = vmatprep.mubr.msk.bf16.mxu1 %vm9344_vm7, %v9343_v16 }
 0x3b8   : > { %8053 = vmatprep.subr.bf16.mxu1 %v9343_v16  ;;  %7488 = vmatprep.subr.bf16.mxu0 %v8654_v24  ;;  %v8683_v24 = vld [vmem:[#allocation9 + $0x250] sm:$0xff]  }
 0x3ba   : > { %7489 = vmatpush3.bf16.msra.mxu0 %v8656_v26  ;;  %v8685_v26 = vld [vmem:[#allocation9 + $0x2d8] sm:$0xff]  }
 0x3bb   : > { %8054 = vmatpush3.bf16.msra.mxu1 %v8655_v25  ;;  %7490 = vmatprep.subr.bf16.mxu0 %v8657_v27  ;;  %v8684_v25 = vld [vmem:[#allocation9 + $0x298] sm:$0xff]  }
 0x3bc   : > { %8055 = vmatprep.subr.bf16.mxu1 %v9343_v16  ;;  %v8686_v27 = vld [vmem:[#allocation9 + $0x258] sm:$0xff]  }
 0x3be   : > { %7491 = vmatpush3.bf16.msra.mxu0 %v8659_v29  ;;  %v8688_v29 = vld [vmem:[#allocation9 + $0x2e0] sm:$0xff]  }
 0x3bf   : > { %8056 = vmatpush3.bf16.msra.mxu1 %v8658_v28  ;;  %7492 = vmatprep.subr.bf16.mxu0 %v8660_v30  ;;  %v8687_v28 = vld [vmem:[#allocation9 + $0x2a0] sm:$0xff]  }
 0x3c0   : > { %8057 = vmatprep.subr.bf16.mxu1 %v9343_v16  ;;  %v8689_v30 = vld [vmem:[#allocation9 + $0x260] sm:$0xff]  }
 0x3c2   : > { %7493 = vmatpush3.bf16.msra.mxu0 %v8662_v32  ;;  %v8691_v32 = vld [vmem:[#allocation9 + $0x2e8] sm:$0xff]  }
 0x3c3   : > { %8058 = vmatpush3.bf16.msra.mxu1 %v8661_v31  ;;  %7494 = vmatprep.subr.bf16.mxu0 %v8663_v33  ;;  %v8690_v31 = vld [vmem:[#allocation9 + $0x2a8] sm:$0xff]  }
 0x3c4   : > { %8059 = vmatprep.subr.bf16.mxu1 %v9343_v16  ;;  %v8692_v33 = vld [vmem:[#allocation9 + $0x268] sm:$0xff]  }
 0x3c6   : > { %7495 = vmatpush3.bf16.msra.mxu0 %v8665_v35  ;;  %v8694_v35 = vld [vmem:[#allocation9 + $0x2f0] sm:$0xff]  }
 0x3c7   : > { %8060 = vmatpush3.bf16.msra.mxu1 %v8664_v34  ;;  %7496 = vmatprep.subr.bf16.mxu0 %v8666_v36  ;;  %v8693_v34 = vld [vmem:[#allocation9 + $0x2b0] sm:$0xff]  }
 0x3c8   : > { %8061 = vmatprep.subr.bf16.mxu1 %v9343_v16  ;;  %v8695_v36 = vld [vmem:[#allocation9 + $0x270] sm:$0xff]  }
 0x3ca   : > { %7497 = vmatpush3.bf16.msra.mxu0 %v8668_v38  ;;  %v8697_v38 = vld [vmem:[#allocation9 + $0x2f8] sm:$0xff]  }
 0x3cb   : > { %8062 = vmatpush3.bf16.msra.mxu1 %v8667_v37  ;;  %7498 = vmatprep.subr.bf16.mxu0 %v8669_v39  ;;  %v8696_v37 = vld [vmem:[#allocation9 + $0x2b8] sm:$0xff]  }
 0x3cc   : > { %8063 = vmatprep.subr.bf16.mxu1 %v9343_v16  ;;  %v8698_v39 = vld [vmem:[#allocation9 + $0x278] sm:$0xff]  }
 0x3ce   : > { %7499 = vmatpush3.bf16.msra.mxu0 %v8671_v41 }
 0x3cf   : > { %8064 = vmatpush3.bf16.msra.mxu1 %v8670_v40  ;;  %7500 = vmatprep.subr.bf16.mxu0 %v8672_v42  ;;  %v8699_v40 = vld [vmem:[#allocation9 + $0x340] sm:$0xff]  }
 0x3d0   : > { %8065 = vmatprep.subr.bf16.mxu1 %v9343_v16 }
 0x3d2   : > { %7501 = vmatpush3.bf16.msra.mxu0 %v8674_v44 }
 0x3d3   : > { %8066 = vmatpush3.bf16.msra.mxu1 %v8673_v43  ;;  %7517 = vmatprep.subr.bf16.mxu0 %v8675_v45 }
 0x3d4   : > { %8071 = vmatprep.subr.bf16.mxu1 %v9343_v16 }
 0x488   : > { %v7471_v47 = vpop.f32.mrb[12].mxu0 }
 0x489   : > { %v1414_v46 = vpop.f32.mrb[8].mxu1  ;;  %v7472_v49 = vpop.f32.mrb[13].mxu0 }
 0x48a   : > { %v8049_v48 = vpop.f32.mrb[9].mxu1  ;;  %v7473_v50 = vadd.f32 %v7472_v49, %v7471_v47  ;;  %v7474_v52 = vpop.f32.mrb[14].mxu0 }
 0x48b   : > { %v1417_v51 = vpop.f32.mrb[10].mxu1  ;;  %v7475_v55 = vpop.f32.mrb[15].mxu0  ;;  %v7000_v48 = vld [vmem:[#allocation6 + $0x5] ss:$0 sm:$0xff] }
 0x48c   : > { %v8050_v54 = vpop.f32.mrb[11].mxu1  ;;  %v1415_v56 = vadd.f32 %v7473_v50, %v1414_v46  ;;  %v7476_v57 = vadd.f32 %v7475_v55, %v7474_v52 }
 0x48e   : > { %v1429_v59 = vmul.f32 %v6972_v53, %v1415_v56  ;;  %v1418_v60 = vadd.f32 %v7476_v57, %v1417_v51 }
 0x490   : > { %v1439_v61 = vadd.f32 %v6973_v58, %v1429_v59  ;;  %v1430_v62 = vmul.f32 %v6972_v53, %v1418_v60  ;;  %v7001_v53 = vld [vmem:[#allocation8 + $0x5] ss:$0 sm:$0xff] }
 0x492   : > { %v9762_v0 = vadd.f32 %v1439_v61, %v9733_v19  ;;  %v1440_v1 = vadd.f32 %v6973_v58, %v1430_v62  ;;  %v8676_v19 = vld [vmem:[#allocation9 + $0x2c0] sm:$0xff]  }
 0x494   : > { %v1451_v3 = vmul.f32 %v6974_v63, %v9762_v0  ;;  %v9766_v4 = vadd.f32 %v1440_v1, %v9731_v14  ;;  %v8701_v1 = vld [vmem:[#allocation9 + $0x300] sm:$0xff]  }
 0x496   : > { %v1461_v5 = vadd.f32 %v6975_v2, %v1451_v3  ;;  %v1452_v6 = vmul.f32 %v6974_v63, %v9766_v4  ;;  %v8700_v63 = vld [vmem:[#allocation9 + $0x380] sm:$0xff]  }
 0x498   : > { %1513 = vst [vmem:[#allocation2 + $0x1] sm:$0xff] %v1461_v5  ;;  %v1462_v7 = vadd.f32 %v6975_v2, %v1452_v6 }
 0x49a   : > { %1514 = vst [vmem:[#allocation2 + $0x9] sm:$0xff] %v1462_v7  ;;  %v1523_v8 = vpack.c.bf16 %v1462_v7, %v1461_v5 }
 0x49c   : > { %1701 = vmatprep.mubr.bf16.mxu0 %v1523_v8  ;;  %v8702_v8 = vld [vmem:[#allocation9 + $0x348] sm:$0xff]  }
 0x49f   : > { %v1516_v9 = vld [vmem:[#allocation2] sm:$0xff] }
 0x4a0   : > { %1822 = vst [vmem:[#allocation2] sm:$0x1] %v9343_v16 }
 0x4a1   : > { %v1520_v11 = vld [vmem:[#allocation2 + $0x2] sm:$0xff]  ;;  %v1521_v12 = vld [vmem:[#allocation2 + $0xa] sm:$0xff] }
 0x4a2   : > { %v1517_v13 = vld [vmem:[#allocation2 + $0x8] sm:$0xff]  ;;  %v1524_v15 = vpack.c.bf16 %v1521_v12, %v1520_v11  ;;  %1825 = vst [vmem:[#allocation2 + $0x11] sm:$0x1] %v9343_v16  ;;  %v8706_v11 = vld [vmem:[#allocation9 + $0x390] sm:$0xff]  }
 0x4a3   : > { %v1522_v14 = vpack.c.bf16 %v1517_v13, %v1516_v9  ;;  %v8703_v9 = vld [vmem:[#allocation9 + $0x388] sm:$0xff]   ;;  %v8707_v12 = vld [vmem:[#allocation9 + $0x310] sm:$0xff]   ;;  %v8708_v13 = vld [vmem:[#allocation9 + $0x358] sm:$0xff]  }
 0x4a4   : > { %8068 = vmatmul.mubr.bf16.vlgmr.msra.gmra.mrb[12].mxu1 %v1524_v15  ;;  %v8709_v15 = vld [vmem:[#allocation9 + $0x398] sm:$0xff]  }
 0x4a5   : > { %1702 = vmatmul.mubr.bf16.vlgmr.msra.gmra.mrb[16].mxu0 %v1522_v14  ;;  %8072 = vmatpush3.bf16.msra.mxu1 %v8676_v19  ;;  %v8704_v19 = vld [vmem:[#allocation9 + $0x308] sm:$0xff]   ;;  %v8710_v14 = vld [vmem:[#allocation9 + $0x318] sm:$0xff]  }
 0x4a6   : > { %7518 = vmatpush3.bf16.msra.mxu0 %v8677_v10  ;;  %8073 = vmatprep.subr.bf16.mxu1 %v9343_v16  ;;  %v8705_v10 = vld [vmem:[#allocation9 + $0x350] sm:$0xff]  }
 0x4a7   : > { %7519 = vmatprep.subr.bf16.mxu0 %v8678_v17  ;;  %8087 = vmatprep.mubr.msk.bf16.mxu1 %vm9344_vm7, %v9343_v16  ;;  %v8711_v17 = vld [vmem:[#allocation9 + $0x360] sm:$0xff]  }
 0x4a9   : > { %8074 = vmatpush3.bf16.msra.mxu1 %v8679_v20  ;;  %v8712_v20 = vld [vmem:[#allocation9 + $0x3a0] sm:$0xff]  }
 0x4aa   : > { %7520 = vmatpush3.bf16.msra.mxu0 %v8680_v21  ;;  %8075 = vmatprep.subr.bf16.mxu1 %v9343_v16  ;;  %v8713_v21 = vld [vmem:[#allocation9 + $0x320] sm:$0xff]  }
 0x4ab   : > { %7521 = vmatprep.subr.bf16.mxu0 %v8681_v22  ;;  %v8714_v22 = vld [vmem:[#allocation9 + $0x368] sm:$0xff]  }
 0x4ad   : > { %8076 = vmatpush3.bf16.msra.mxu1 %v8682_v23  ;;  %v8715_v23 = vld [vmem:[#allocation9 + $0x3a8] sm:$0xff]  }
 0x4ae   : > { %7522 = vmatpush3.bf16.msra.mxu0 %v8683_v24  ;;  %8077 = vmatprep.subr.bf16.mxu1 %v9343_v16  ;;  %v8716_v24 = vld [vmem:[#allocation9 + $0x328] sm:$0xff]  }
 0x4af   : > { %7523 = vmatprep.subr.bf16.mxu0 %v8684_v25  ;;  %v8717_v25 = vld [vmem:[#allocation9 + $0x370] sm:$0xff]  }
 0x4b1   : > { %8078 = vmatpush3.bf16.msra.mxu1 %v8685_v26  ;;  %v8718_v26 = vld [vmem:[#allocation9 + $0x3b0] sm:$0xff]  }
 0x4b2   : > { %7524 = vmatpush3.bf16.msra.mxu0 %v8686_v27  ;;  %8079 = vmatprep.subr.bf16.mxu1 %v9343_v16  ;;  %v8719_v27 = vld [vmem:[#allocation9 + $0x330] sm:$0xff]  }
 0x4b3   : > { %7525 = vmatprep.subr.bf16.mxu0 %v8687_v28  ;;  %v8720_v28 = vld [vmem:[#allocation9 + $0x378] sm:$0xff]  }
 0x4b5   : > { %8080 = vmatpush3.bf16.msra.mxu1 %v8688_v29  ;;  %v8721_v29 = vld [vmem:[#allocation9 + $0x3b8] sm:$0xff]  }
 0x4b6   : > { %7526 = vmatpush3.bf16.msra.mxu0 %v8689_v30  ;;  %8081 = vmatprep.subr.bf16.mxu1 %v9343_v16  ;;  %v8722_v30 = vld [vmem:[#allocation9 + $0x338] sm:$0xff]  }
 0x4b7   : > { %7527 = vmatprep.subr.bf16.mxu0 %v8690_v31 }
 0x4b9   : > { %8082 = vmatpush3.bf16.msra.mxu1 %v8691_v32 }
 0x4ba   : > { %7528 = vmatpush3.bf16.msra.mxu0 %v8692_v33  ;;  %8083 = vmatprep.subr.bf16.mxu1 %v9343_v16 }
 0x4bb   : > { %7529 = vmatprep.subr.bf16.mxu0 %v8693_v34 }
 0x4bd   : > { %8084 = vmatpush3.bf16.msra.mxu1 %v8694_v35 }
 0x4be   : > { %7530 = vmatpush3.bf16.msra.mxu0 %v8695_v36  ;;  %8085 = vmatprep.subr.bf16.mxu1 %v9343_v16 }
 0x4bf   : > { %7531 = vmatprep.subr.bf16.mxu0 %v8696_v37 }
 0x4c1   : > { %8086 = vmatpush3.bf16.msra.mxu1 %v8697_v38  ;;  %v7026_v38 = vld [vmem:[#allocation6 + $0x6] ss:$0 sm:$0xff] }
 0x4c2   : > { %7532 = vmatpush3.bf16.msra.mxu0 %v8698_v39  ;;  %8091 = vmatprep.subr.bf16.mxu1 %v9343_v16 }
 0x4c3   : > { %7548 = vmatprep.subr.bf16.mxu0 %v8699_v40 }
 0x577   : > { %v1744_v41 = vpop.f32.mrb[12].mxu1 }
 0x578   : > { %v7502_v42 = vpop.f32.mrb[16].mxu0  ;;  %v8069_v43 = vpop.f32.mrb[13].mxu1 }
 0x579   : > { %v7503_v44 = vpop.f32.mrb[17].mxu0  ;;  %v1747_v46 = vpop.f32.mrb[14].mxu1  ;;  %v7027_v43 = vld [vmem:[#allocation8 + $0x6] ss:$0 sm:$0xff] }
 0x57a   : > { %v7504_v45 = vadd.f32 %v7503_v44, %v7502_v42  ;;  %v7505_v47 = vpop.f32.mrb[18].mxu0  ;;  %v8070_v49 = vpop.f32.mrb[15].mxu1 }
 0x57b   : > { %v7506_v50 = vpop.f32.mrb[19].mxu0 }
 0x57c   : > { %v1745_v51 = vadd.f32 %v7504_v45, %v1744_v41  ;;  %v7507_v52 = vadd.f32 %v7506_v50, %v7505_v47 }
 0x57e   : > { %v1759_v54 = vmul.f32 %v7000_v48, %v1745_v51  ;;  %v1748_v55 = vadd.f32 %v7507_v52, %v1747_v46  ;;  %v7029_v51 = vld [vmem:[#allocation8 + $0x7] ss:$0 sm:$0xff] }
 0x580   : > { %v1769_v56 = vadd.f32 %v7001_v53, %v1759_v54  ;;  %v1760_v57 = vmul.f32 %v7000_v48, %v1748_v55  ;;  %v7028_v48 = vld [vmem:[#allocation6 + $0x7] ss:$0 sm:$0xff] }
 0x582   : > { %v1771_v58 = vmax.f32 %v1769_v56, 0.0  ;;  %v1770_v59 = vadd.f32 %v7001_v53, %v1760_v57 }
 0x584   : > { %1823 = vst [vmem:[#allocation2 + $0x1] sm:$0xff] %v1771_v58  ;;  %v1772_v60 = vmax.f32 %v1770_v59, 0.0 }
 0x586   : > { %1824 = vst [vmem:[#allocation2 + $0x9] sm:$0xff] %v1772_v60  ;;  %v1833_v61 = vpack.c.bf16 %v1772_v60, %v1771_v58 }
 0x588   : > { %2011 = vmatprep.mubr.bf16.mxu0 %v1833_v61 }
 0x58b   : > { %v1826_v62 = vld [vmem:[#allocation2] sm:$0xff] }
 0x58c   : > { %2152 = vst [vmem:[#allocation2] sm:$0x1] %v9343_v16 }
 0x58d   : > { %v1830_v2 = vld [vmem:[#allocation2 + $0x2] sm:$0xff]  ;;  %v1831_v3 = vld [vmem:[#allocation2 + $0xa] sm:$0xff] }
 0x58e   : > { %v1827_v5 = vld [vmem:[#allocation2 + $0x8] sm:$0xff]  ;;  %v1834_v6 = vpack.c.bf16 %v1831_v3, %v1830_v2  ;;  %2155 = vst [vmem:[#allocation2 + $0x11] sm:$0x1] %v9343_v16  ;;  %v8724_v2 = vld [vmem:[#allocation9 + $0x3c0] sm:$0xff]   ;;  %v8726_v3 = vld [vmem:[#allocation9 + $0x408] sm:$0xff]  }
 0x58f   : > { %v1832_v7 = vpack.c.bf16 %v1827_v5, %v1826_v62  ;;  %v8727_v5 = vld [vmem:[#allocation9 + $0x3c8] sm:$0xff]  }
 0x590   : > { %8088 = vmatmul.mubr.bf16.vlgmr.msra.gmra.mrb[16].mxu1 %v1834_v6  ;;  %v8729_v6 = vld [vmem:[#allocation9 + $0x410] sm:$0xff]  }
 0x591   : > { %2012 = vmatmul.mubr.bf16.vlgmr.msra.gmra.mrb[20].mxu0 %v1832_v7  ;;  %8092 = vmatpush3.bf16.msra.mxu1 %v8700_v63  ;;  %v9345_v63 = vmov 0.0|0.0   ;;  %v8730_v7 = vld [vmem:[#allocation9 + $0x3d0] sm:$0xff]  }
 0x592   : > { %7549 = vmatpush3.bf16.msra.mxu0 %v8701_v1  ;;  %8093 = vmatprep.subr.bf16.mxu1 %v9343_v16  ;;  %v8723_v1 = vld [vmem:[#allocation9 + $0x400] sm:$0xff]  }
 0x593   : > { %8107 = vmatprep.mubr.msk.bf16.mxu1 %vm9344_vm7, %v9343_v16  ;;  %7550 = vmatprep.subr.bf16.mxu0 %v8702_v8  ;;  %v8732_v8 = vld [vmem:[#allocation9 + $0x418] sm:$0xff]  }
 0x595   : > { %8094 = vmatpush3.bf16.msra.mxu1 %v8703_v9  ;;  %v8733_v9 = vld [vmem:[#allocation9 + $0x3d8] sm:$0xff]  }
 0x596   : > { %7551 = vmatpush3.bf16.msra.mxu0 %v8704_v19  ;;  %8095 = vmatprep.subr.bf16.mxu1 %v9343_v16 }
 0x597   : > { %7552 = vmatprep.subr.bf16.mxu0 %v8705_v10 }
 0x599   : > { %8096 = vmatpush3.bf16.msra.mxu1 %v8706_v11 }
 0x59a   : > { %7553 = vmatpush3.bf16.msra.mxu0 %v8707_v12  ;;  %8097 = vmatprep.subr.bf16.mxu1 %v9343_v16 }
 0x59b   : > { %7554 = vmatprep.subr.bf16.mxu0 %v8708_v13 }
 0x59d   : > { %8098 = vmatpush3.bf16.msra.mxu1 %v8709_v15 }
 0x59e   : > { %7555 = vmatpush3.bf16.msra.mxu0 %v8710_v14  ;;  %8099 = vmatprep.subr.bf16.mxu1 %v9343_v16 }
 0x59f   : > { %7556 = vmatprep.subr.bf16.mxu0 %v8711_v17 }
 0x5a1   : > { %8100 = vmatpush3.bf16.msra.mxu1 %v8712_v20 }
 0x5a2   : > { %7557 = vmatpush3.bf16.msra.mxu0 %v8713_v21  ;;  %8101 = vmatprep.subr.bf16.mxu1 %v9343_v16 }
 0x5a3   : > { %7558 = vmatprep.subr.bf16.mxu0 %v8714_v22 }
 0x5a5   : > { %8102 = vmatpush3.bf16.msra.mxu1 %v8715_v23 }
 0x5a6   : > { %7559 = vmatpush3.bf16.msra.mxu0 %v8716_v24  ;;  %8103 = vmatprep.subr.bf16.mxu1 %v9343_v16 }
 0x5a7   : > { %7560 = vmatprep.subr.bf16.mxu0 %v8717_v25  ;;  %v8725_v25 = vld [vmem:[#allocation9 + $0x440] sm:$0xff]  }
 0x5a9   : > { %8104 = vmatpush3.bf16.msra.mxu1 %v8718_v26  ;;  %v8728_v26 = vld [vmem:[#allocation9 + $0x448] sm:$0xff]  }
 0x5aa   : > { %7561 = vmatpush3.bf16.msra.mxu0 %v8719_v27  ;;  %8105 = vmatprep.subr.bf16.mxu1 %v9343_v16  ;;  %v8731_v27 = vld [vmem:[#allocation9 + $0x450] sm:$0xff]  }
 0x5ab   : > { %7562 = vmatprep.subr.bf16.mxu0 %v8720_v28  ;;  %v8734_v28 = vld [vmem:[#allocation9 + $0x458] sm:$0xff]  }
 0x5ad   : > { %8106 = vmatpush3.bf16.msra.mxu1 %v8721_v29  ;;  %v8735_v29 = vld [vmem:[#allocation9 + $0x420] sm:$0xff]  }
 0x5ae   : > { %7563 = vmatpush3.bf16.msra.mxu0 %v8722_v30  ;;  %7582 = vmatprep.subr.bf16.mxu1 %v8723_v1  ;;  %v8736_v30 = vld [vmem:[#allocation9 + $0x3e0] sm:$0xff]   ;;  %v8763_v1 = vld [vmem:[#allocation9 + $0x490] sm:$0xff]  }
 0x5af   : > { %8469 = vmatprep.subr.bf16.mxu0 %v9345_v63 }
 0x663   : > { %v2054_v31 = vpop.f32.mrb[16].mxu1 }
 0x664   : > { %v7533_v32 = vpop.f32.mrb[20].mxu0  ;;  %v8089_v33 = vpop.f32.mrb[17].mxu1 }
 0x665   : > { %v7534_v34 = vpop.f32.mrb[21].mxu0  ;;  %v2057_v36 = vpop.f32.mrb[18].mxu1  ;;  %v8739_v33 = vld [vmem:[#allocation9 + $0x3e8] sm:$0xff]  }
 0x666   : > { %v7535_v35 = vadd.f32 %v7534_v34, %v7533_v32  ;;  %v7536_v37 = vpop.f32.mrb[22].mxu0  ;;  %v8090_v39 = vpop.f32.mrb[19].mxu1  ;;  %v8738_v32 = vld [vmem:[#allocation9 + $0x428] sm:$0xff]  }
 0x667   : > { %v7537_v40 = vpop.f32.mrb[23].mxu0  ;;  %v8740_v34 = vld [vmem:[#allocation9 + $0x468] sm:$0xff]   ;;  %v8745_v39 = vld [vmem:[#allocation9 + $0x3f8] sm:$0xff]  }
 0x668   : > { %v2055_v41 = vadd.f32 %v7535_v35, %v2054_v31  ;;  %v7538_v42 = vadd.f32 %v7537_v40, %v7536_v37  ;;  %v8737_v31 = vld [vmem:[#allocation9 + $0x460] sm:$0xff]   ;;  %v8741_v35 = vld [vmem:[#allocation9 + $0x430] sm:$0xff]   ;;  %v8746_v40 = vld [vmem:[#allocation9 + $0x478] sm:$0xff]  }
 0x669   : > { %v8743_v37 = vld [vmem:[#allocation9 + $0x470] sm:$0xff]  }
 0x66a   : > { %v2069_v44 = vmul.f32 %v7026_v38, %v2055_v41  ;;  %v2058_v45 = vadd.f32 %v7538_v42, %v2057_v36  ;;  %v8742_v36 = vld [vmem:[#allocation9 + $0x3f0] sm:$0xff]  }
 0x66b   : > { %v7055_v41 = vld [vmem:[#allocation6 + $0x8] ss:$0 sm:$0xff] }
 0x66c   : > { %v2079_v46 = vadd.f32 %v7027_v43, %v2069_v44  ;;  %v2070_v47 = vmul.f32 %v7026_v38, %v2058_v45  ;;  %v8744_v38 = vld [vmem:[#allocation9 + $0x438] sm:$0xff]  }
 0x66e   : > { %v9793_v49 = vadd.f32 %v2079_v46, %v9762_v0  ;;  %v2080_v50 = vadd.f32 %v7027_v43, %v2070_v47  ;;  %v7056_v43 = vld [vmem:[#allocation8 + $0x8] ss:$0 sm:$0xff] }
 0x670   : > { %v2091_v52 = vmul.f32 %v7028_v48, %v9793_v49  ;;  %v9797_v53 = vadd.f32 %v2080_v50, %v9766_v4 }
 0x672   : > { %v2101_v54 = vadd.f32 %v7029_v51, %v2091_v52  ;;  %v2092_v55 = vmul.f32 %v7028_v48, %v9797_v53  ;;  %v8473_v56 = vpack.c.bf16 %v9797_v53, %v9793_v49  ;;  %v8750_v49 = vld [vmem:[#allocation11 + $0x18] sm:$0xff]   ;;  %v8751_v53 = vld [vmem:[#allocation11 + $0x20] sm:$0xff]  }
 0x674   : > { %2153 = vst [vmem:[#allocation2 + $0x1] sm:$0xff] %v2101_v54  ;;  %v2102_v57 = vadd.f32 %v7029_v51, %v2092_v55  ;;  %v8747_v55 = vld [vmem:[#allocation11] sm:$0xff]  }
 0x676   : > { %2154 = vst [vmem:[#allocation2 + $0x9] sm:$0xff] %v2102_v57  ;;  %v2163_v58 = vpack.c.bf16 %v2102_v57, %v2101_v54  ;;  %v8748_v57 = vld [vmem:[#allocation11 + $0x8] sm:$0xff]  }
 0x678   : > { %2341 = vmatprep.mubr.bf16.mxu0 %v2163_v58  ;;  %v8749_v58 = vld [vmem:[#allocation11 + $0x10] sm:$0xff]  }
 0x67b   : > { %v2156_v0 = vld [vmem:[#allocation2] sm:$0xff] }
 0x67c   : > { %2532 = vst [vmem:[#allocation2] sm:$0x1] %v9343_v16 }
 0x67d   : > { %v2160_v59 = vld [vmem:[#allocation2 + $0x2] sm:$0xff]  ;;  %v2161_v60 = vld [vmem:[#allocation2 + $0xa] sm:$0xff] }
 0x67e   : > { %v2157_v61 = vld [vmem:[#allocation2 + $0x8] sm:$0xff]  ;;  %v2164_v62 = vpack.c.bf16 %v2161_v60, %v2160_v59  ;;  %v8755_v60 = vld [vmem:[#allocation9 + $0x4c0] sm:$0xff]  }
 0x67f   : > { %v2162_v4 = vpack.c.bf16 %v2157_v61, %v2156_v0  ;;  %2534 = vst [vmem:[#allocation2 + $0x9] sm:$0x1] %v9343_v16  ;;  %v8753_v0 = vld [vmem:[#allocation11 + $0x30] sm:$0xff]   ;;  %v8754_v59 = vld [vmem:[#allocation11 + $0x38] sm:$0xff]   ;;  %v8757_v61 = vld [vmem:[#allocation9 + $0x480] sm:$0xff]  }
 0x680   : > { %8108 = vmatmul.mubr.bf16.vlgmr.msra.gmra.mrb[20].mxu1 %v2164_v62  ;;  %v8758_v62 = vld [vmem:[#allocation9 + $0x4c8] sm:$0xff]  }
 0x681   : > { %2342 = vmatmul.mubr.bf16.vlgmr.msra.gmra.mrb[24].mxu0 %v2162_v4  ;;  %7583 = vmatpush3.bf16.msra.mxu1 %v8724_v2  ;;  %v8760_v4 = vld [vmem:[#allocation9 + $0x488] sm:$0xff]  }
 0x682   : > { %8115 = vmatprep.mubr.msk.f32.mxu0 %vm9344_vm7, %v9343_v16  ;;  %7584 = vmatprep.subr.bf16.mxu1 %v8726_v3 }
 0x685   : > { %7585 = vmatpush3.bf16.msra.mxu1 %v8727_v5 }
 0x686   : > { %7586 = vmatprep.subr.bf16.mxu1 %v8729_v6 }
 0x689   : > { %7587 = vmatpush3.bf16.msra.mxu1 %v8730_v7 }
 0x68a   : > { %7588 = vmatprep.subr.bf16.mxu1 %v8732_v8 }
 0x68d   : > { %7589 = vmatpush3.bf16.msra.mxu1 %v8733_v9 }
 0x68e   : > { %7590 = vmatprep.subr.bf16.mxu1 %v8735_v29  ;;  %v8772_v29 = vld [vmem:[#allocation9 + $0x4a8] sm:$0xff]  }
 0x691   : > { %7591 = vmatpush3.bf16.msra.mxu1 %v8736_v30  ;;  %v8773_v30 = vld [vmem:[#allocation9 + $0x4f0] sm:$0xff]  }
 0x692   : > { %7592 = vmatprep.subr.bf16.mxu1 %v8738_v32  ;;  %v8775_v32 = vld [vmem:[#allocation9 + $0x4b0] sm:$0xff]  }
 0x695   : > { %7593 = vmatpush3.bf16.msra.mxu1 %v8739_v33  ;;  %v8776_v33 = vld [vmem:[#allocation9 + $0x4f8] sm:$0xff]  }
 0x696   : > { %7594 = vmatprep.subr.bf16.mxu1 %v8741_v35  ;;  %v8778_v35 = vld [vmem:[#allocation9 + $0x4b8] sm:$0xff]  }
 0x699   : > { %7595 = vmatpush3.bf16.msra.mxu1 %v8742_v36  ;;  %v8779_v36 = vld [vmem:[#allocation9 + $0x580] sm:$0xff]  }
 0x69a   : > { %7596 = vmatprep.subr.bf16.mxu1 %v8744_v38  ;;  %v7092_v38 = vld [vmem:[#allocation6 + $0xa] ss:$0 sm:$0xff] }
 0x69d   : > { %7597 = vmatpush3.bf16.msra.mxu1 %v8745_v39 }
 0x69e   : > { %8472 = vmatprep.subr.bf16.mxu1 %v9345_v63  ;;  %v8761_v63 = vld [vmem:[#allocation9 + $0x4d0] sm:$0xff]  }
 0x753   : > { %v2384_v19 = vpop.f32.mrb[20].mxu1 }
 0x754   : > { %v7564_v10 = vpop.f32.mrb[24].mxu0  ;;  %v8109_v11 = vpop.f32.mrb[21].mxu1 }
 0x755   : > { %v7565_v12 = vpop.f32.mrb[25].mxu0  ;;  %v2387_v15 = vpop.f32.mrb[22].mxu1 }
 0x756   : > { %v7566_v13 = vadd.f32 %v7565_v12, %v7564_v10  ;;  %v7567_v14 = vpop.f32.mrb[26].mxu0  ;;  %v8110_v17 = vpop.f32.mrb[23].mxu1 }
 0x757   : > { %v7568_v20 = vpop.f32.mrb[27].mxu0  ;;  %v8759_v17 = vld [vmem:[#allocation9 + $0x508] sm:$0xff]  }
 0x758   : > { %v2385_v21 = vadd.f32 %v7566_v13, %v2384_v19  ;;  %v7569_v22 = vadd.f32 %v7568_v20, %v7567_v14  ;;  %v8756_v13 = vld [vmem:[#allocation9 + $0x500] sm:$0xff]   ;;  %v8762_v20 = vld [vmem:[#allocation9 + $0x510] sm:$0xff]  }
 0x75a   : > { %v2388_v23 = vadd.f32 %v7569_v22, %v2387_v15  ;;  %v8765_v22 = vld [vmem:[#allocation9 + $0x518] sm:$0xff]  }
 0x75c   : > { %v8470_v24 = vpack.c.bf16 %v2388_v23, %v2385_v21  ;;  %v8764_v21 = vld [vmem:[#allocation9 + $0x4d8] sm:$0xff]  }
 0x75d   : > { %v8766_v23 = vld [vmem:[#allocation9 + $0x498] sm:$0xff]  }
 0x75e   : > { %8471 = vmatpush3.bf16.msra.mxu0 %v8470_v24  ;;  %v8767_v24 = vld [vmem:[#allocation9 + $0x4e0] sm:$0xff]  }
 0x75f   : > { %8118 = vmatprep.subr.bf16.mxu0 %v9343_v16 }
 0x761   : > { %8116 = vmatmul.mubr.msk.f32.vlgmr.msra.gmra.mrb[6].mxu0 %vm2391_vm8, %v9703_v18 }
 0x762   : > { %8119 = vmatpush3.bf16.msra.mxu0 %v8725_v25  ;;  %8134 = vmatprep.mubr.msk.bf16.mxu0 %vm9344_vm7, %v9343_v16  ;;  %v8768_v25 = vld [vmem:[#allocation9 + $0x520] sm:$0xff]  }
 0x763   : > { %8120 = vmatprep.subr.bf16.mxu0 %v9343_v16 }
 0x766   : > { %8121 = vmatpush3.bf16.msra.mxu0 %v8728_v26  ;;  %v8769_v26 = vld [vmem:[#allocation9 + $0x4a0] sm:$0xff]  }
 0x767   : > { %8122 = vmatprep.subr.bf16.mxu0 %v9343_v16 }
 0x76a   : > { %8123 = vmatpush3.bf16.msra.mxu0 %v8731_v27  ;;  %v8770_v27 = vld [vmem:[#allocation9 + $0x4e8] sm:$0xff]  }
 0x76b   : > { %8124 = vmatprep.subr.bf16.mxu0 %v9343_v16 }
 0x76e   : > { %8125 = vmatpush3.bf16.msra.mxu0 %v8734_v28  ;;  %v8771_v28 = vld [vmem:[#allocation9 + $0x528] sm:$0xff]  }
 0x76f   : > { %8126 = vmatprep.subr.bf16.mxu0 %v9343_v16 }
 0x772   : > { %8127 = vmatpush3.bf16.msra.mxu0 %v8737_v31  ;;  %v8774_v31 = vld [vmem:[#allocation9 + $0x530] sm:$0xff]  }
 0x773   : > { %8128 = vmatprep.subr.bf16.mxu0 %v9343_v16 }
 0x776   : > { %8129 = vmatpush3.bf16.msra.mxu0 %v8740_v34  ;;  %v8777_v34 = vld [vmem:[#allocation9 + $0x538] sm:$0xff]  }
 0x777   : > { %8130 = vmatprep.subr.bf16.mxu0 %v9343_v16 }
 0x77a   : > { %8131 = vmatpush3.bf16.msra.mxu0 %v8743_v37  ;;  %v7081_v37 = vld [vmem:[#allocation6 + $0x9] ss:$0 sm:$0xff] }
 0x77b   : > { %8132 = vmatprep.subr.bf16.mxu0 %v9343_v16 }
 0x77e   : > { %8133 = vmatpush3.bf16.msra.mxu0 %v8746_v40  ;;  %v7082_v40 = vld [vmem:[#allocation8 + $0x9] ss:$0 sm:$0xff] }
 0x77f   : > { %8145 = vmatprep.subr.bf16.mxu0 %v9343_v16 }
 0x834   : > { %v2460_v42 = vpop.f32.mrb[6].mxu0 }
 0x835   : > { %v2472_v44 = vmul.f32 %v7055_v41, %v2460_v42  ;;  %v8117_v45 = vpop.f32.mrb[7].mxu0  ;;  %v7093_v42 = vld [vmem:[#allocation8 + $0xa] ss:$0 sm:$0xff] }
 0x837   : > { %v2481_v46 = vadd.f32 %v7056_v43, %v2472_v44 }
 0x839   : > { %v2482_v47 = vmax.f32 %v2481_v46, 0.0 }
 0x83b   : > { %2533 = vst [vmem:[#allocation2 + $0x1] sm:$0xff] %v2482_v47  ;;  %v2539_v48 = vpack.c.bf16 %v2482_v47, %v2482_v47 }
 0x83d   : > { %2717 = vmatprep.mubr.bf16.mxu1 %v2539_v48 }
 0x842   : > { %v2535_v50 = vld [vmem:[#allocation2] sm:$0xff] }
 0x843   : > { %v2537_v51 = vld [vmem:[#allocation2 + $0x2] sm:$0xff]  ;;  %3044 = vst [vmem:[#allocation2] sm:$0x1] %v9343_v16  ;;  %v2538_v54 = vpack.c.bf16 %v2535_v50, %v2535_v50 }
 0x844   : > { %3046 = vst [vmem:[#allocation2 + $0x9] sm:$0x1] %v9343_v16  ;;  %v2540_v52 = vpack.c.bf16 %v2537_v51, %v2537_v51  ;;  %v7094_v50 = vld [vmem:[#allocation6 + $0xb] ss:$0 sm:$0xff] }
 0x845   : > { %2718 = vmatmul.mubr.bf16.vlgmr.msra.gmra.mrb[24].mxu1 %v2538_v54 }
 0x846   : > { %8135 = vmatmul.mubr.bf16.vlgmr.msra.gmra.mrb[28].mxu0 %v2540_v52  ;;  %8474 = vmatpush3.bf16.msra.mxu1 %v8473_v56  ;;  %v8752_v56 = vld [vmem:[#allocation11 + $0x28] sm:$0xff]  }
 0x847   : > { %8142 = vmatprep.mubr.msk.f32.mxu1 %vm9344_vm7, %v9343_v16  ;;  %8146 = vmatpush3.bf16.msra.mxu0 %v8747_v55  ;;  %v7095_v52 = vld [vmem:[#allocation8 + $0xb] ss:$0 sm:$0xff] }
 0x848   : > { %8161 = vmatprep.mubr.msk.bf16.mxu0 %vm9344_vm7, %v9343_v16  ;;  %8147 = vmatprep.subr.bf16.mxu0 %v9343_v16 }
 0x849   : > { %7625 = vmatprep.subr.bf16.mxu1 %v8755_v60  ;;  %v8782_v60 = vld [vmem:[#allocation9 + $0x588] sm:$0xff]  }
 0x84b   : > { %8148 = vmatpush3.bf16.msra.mxu0 %v8748_v57 }
 0x84c   : > { %8149 = vmatprep.subr.bf16.mxu0 %v9343_v16 }
 0x84d   : > { %8143 = vmatmul.mubr.msk.f32.vlgmr.msra.gmra.mrb[28].mxu1 %vm2391_vm8, %v9703_v18 }
 0x84e   : > { %7626 = vmatpush3.bf16.msra.mxu1 %v8757_v61  ;;  %v8783_v61 = vld [vmem:[#allocation9 + $0x5c8] sm:$0xff]  }
 0x84f   : > { %8150 = vmatpush3.bf16.msra.mxu0 %v8749_v58  ;;  %7627 = vmatprep.subr.bf16.mxu1 %v8758_v62  ;;  %v8780_v58 = vld [vmem:[#allocation9 + $0x5c0] sm:$0xff]   ;;  %v8784_v62 = vld [vmem:[#allocation9 + $0x548] sm:$0xff]  }
 0x850   : > { %8151 = vmatprep.subr.bf16.mxu0 %v9343_v16 }
 0x852   : > { %7628 = vmatpush3.bf16.msra.mxu1 %v8760_v4  ;;  %v8785_v4 = vld [vmem:[#allocation9 + $0x590] sm:$0xff]  }
 0x853   : > { %8152 = vmatpush3.bf16.msra.mxu0 %v8750_v49  ;;  %7629 = vmatprep.subr.bf16.mxu1 %v8761_v63  ;;  %v8786_v63 = vld [vmem:[#allocation9 + $0x5d0] sm:$0xff]  }
 0x854   : > { %8153 = vmatprep.subr.bf16.mxu0 %v9343_v16 }
 0x856   : > { %7630 = vmatpush3.bf16.msra.mxu1 %v8763_v1  ;;  %v8787_v1 = vld [vmem:[#allocation9 + $0x550] sm:$0xff]  }
 0x857   : > { %8154 = vmatpush3.bf16.msra.mxu0 %v8751_v53  ;;  %7631 = vmatprep.subr.bf16.mxu1 %v8764_v21 }
 0x858   : > { %8155 = vmatprep.subr.bf16.mxu0 %v9343_v16 }
 0x85a   : > { %7632 = vmatpush3.bf16.msra.mxu1 %v8766_v23 }
 0x85b   : > { %8156 = vmatpush3.bf16.msra.mxu0 %v8752_v56  ;;  %7633 = vmatprep.subr.bf16.mxu1 %v8767_v24  ;;  %v8781_v56 = vld [vmem:[#allocation9 + $0x540] sm:$0xff]  }
 0x85c   : > { %8157 = vmatprep.subr.bf16.mxu0 %v9343_v16 }
 0x85e   : > { %7634 = vmatpush3.bf16.msra.mxu1 %v8769_v26 }
 0x85f   : > { %8158 = vmatpush3.bf16.msra.mxu0 %v8753_v0  ;;  %7635 = vmatprep.subr.bf16.mxu1 %v8770_v27 }
 0x860   : > { %8159 = vmatprep.subr.bf16.mxu0 %v9343_v16 }
 0x862   : > { %7636 = vmatpush3.bf16.msra.mxu1 %v8772_v29 }
 0x863   : > { %8160 = vmatpush3.bf16.msra.mxu0 %v8754_v59  ;;  %7637 = vmatprep.subr.bf16.mxu1 %v8773_v30 }
 0x864   : > { %8165 = vmatprep.subr.bf16.mxu0 %v9343_v16 }
 0x866   : > { %7638 = vmatpush3.bf16.msra.mxu1 %v8775_v32  ;;  %v7121_v32 = vld [vmem:[#allocation8 + $0xc] ss:$0 sm:$0xff] }
 0x867   : > { %7639 = vmatprep.subr.bf16.mxu1 %v8776_v33 }
 0x86a   : > { %7640 = vmatpush3.bf16.msra.mxu1 %v8778_v35 }
 0x86b   : > { %7656 = vmatprep.subr.bf16.mxu1 %v8779_v36 }
 0x918   : > { %v7598_v3 = vpop.f32.mrb[24].mxu1 }
 0x919   : > { %v2759_v2 = vpop.f32.mrb[28].mxu0  ;;  %v7599_v6 = vpop.f32.mrb[25].mxu1 }
 0x91a   : > { %v8136_v5 = vpop.f32.mrb[29].mxu0  ;;  %v7600_v7 = vadd.f32 %v7599_v6, %v7598_v3  ;;  %v7601_v9 = vpop.f32.mrb[26].mxu1  ;;  %v8789_v3 = vld [vmem:[#allocation9 + $0x5d8] sm:$0xff]   ;;  %v8791_v6 = vld [vmem:[#allocation9 + $0x5a0] sm:$0xff]  }
 0x91b   : > { %v2762_v8 = vpop.f32.mrb[30].mxu0  ;;  %v7602_v10 = vpop.f32.mrb[27].mxu1  ;;  %v8790_v5 = vld [vmem:[#allocation9 + $0x558] sm:$0xff]   ;;  %v8794_v9 = vld [vmem:[#allocation9 + $0x5a8] sm:$0xff]  }
 0x91c   : > { %v8137_v19 = vpop.f32.mrb[31].mxu0  ;;  %v2760_v11 = vadd.f32 %v7600_v7, %v2759_v2  ;;  %v8788_v2 = vld [vmem:[#allocation9 + $0x598] sm:$0xff]   ;;  %v8792_v7 = vld [vmem:[#allocation9 + $0x5e0] sm:$0xff]   ;;  %v8796_v10 = vld [vmem:[#allocation9 + $0x568] sm:$0xff]  }
 0x91d   : > { %v8793_v8 = vld [vmem:[#allocation9 + $0x560] sm:$0xff]   ;;  %v8795_v19 = vld [vmem:[#allocation9 + $0x5e8] sm:$0xff]  }
 0x91e   : > { %v2773_v39 = vmul.f32 %v7081_v37, %v2760_v11  ;;  %v8797_v11 = vld [vmem:[#allocation9 + $0x5b0] sm:$0xff]   ;;  %v8804_v37 = vld [vmem:[#allocation9 + $0x680] sm:$0xff]  }
 0x920   : > { %v2849_v12 = vpop.f32.mrb[28].mxu1  ;;  %v2782_v46 = vadd.f32 %v7082_v40, %v2773_v39  ;;  %v8805_v40 = vld [vmem:[#allocation9 + $0x600] sm:$0xff]  }
 0x921   : > { %v2853_v15 = vpack.c.bf16 %v2849_v12, %v2849_v12  ;;  %v8144_v14 = vpop.f32.mrb[29].mxu1  ;;  %v8798_v12 = vld [vmem:[#allocation9 + $0x5f0] sm:$0xff]  }
 0x922   : > { %v8801_v14 = vld [vmem:[#allocation9 + $0x5f8] sm:$0xff]  }
 0x923   : > { %8162 = vmatmul.mubr.bf16.vlgmr.msra.gmra.mrb[32].mxu0 %v2853_v15  ;;  %v8800_v15 = vld [vmem:[#allocation9 + $0x5b8] sm:$0xff]  }
 0x924   : > { %8166 = vmatpush3.bf16.msra.mxu0 %v8756_v13  ;;  %8181 = vmatprep.mubr.msk.bf16.mxu0 %vm9344_vm7, %v9343_v16  ;;  %v8799_v13 = vld [vmem:[#allocation9 + $0x570] sm:$0xff]  }
 0x925   : > { %8167 = vmatprep.subr.bf16.mxu0 %v9343_v16 }
 0x928   : > { %8168 = vmatpush3.bf16.msra.mxu0 %v8759_v17  ;;  %v8802_v17 = vld [vmem:[#allocation9 + $0x578] sm:$0xff]  }
 0x929   : > { %8169 = vmatprep.subr.bf16.mxu0 %v9343_v16 }
 0x92c   : > { %8170 = vmatpush3.bf16.msra.mxu0 %v8762_v20  ;;  %v8803_v20 = vld [vmem:[#allocation9 + $0x640] sm:$0xff]  }
 0x92d   : > { %8171 = vmatprep.subr.bf16.mxu0 %v9343_v16 }
 0x930   : > { %8172 = vmatpush3.bf16.msra.mxu0 %v8765_v22 }
 0x931   : > { %8173 = vmatprep.subr.bf16.mxu0 %v9343_v16 }
 0x934   : > { %8174 = vmatpush3.bf16.msra.mxu0 %v8768_v25 }
 0x935   : > { %8175 = vmatprep.subr.bf16.mxu0 %v9343_v16 }
 0x938   : > { %8176 = vmatpush3.bf16.msra.mxu0 %v8771_v28  ;;  %v7120_v28 = vld [vmem:[#allocation6 + $0xc] ss:$0 sm:$0xff] }
 0x939   : > { %8177 = vmatprep.subr.bf16.mxu0 %v9343_v16 }
 0x93c   : > { %8178 = vmatpush3.bf16.msra.mxu0 %v8774_v31 }
 0x93d   : > { %8179 = vmatprep.subr.bf16.mxu0 %v9343_v16 }
 0x940   : > { %8180 = vmatpush3.bf16.msra.mxu0 %v8777_v34 }
 0x941   : > { %8185 = vmatprep.subr.bf16.mxu0 %v9343_v16 }
 0x9f6   : > { %v2952_v41 = vpop.f32.mrb[32].mxu0 }
 0x9f7   : > { %v2966_v43 = vmul.f32 %v7092_v38, %v2952_v41  ;;  %v8163_v44 = vpop.f32.mrb[33].mxu0 }
 0x9f8   : > { %v2955_v45 = vpop.f32.mrb[34].mxu0  ;;  %v8807_v44 = vld [vmem:[#allocation9 + $0x688] sm:$0xff]  }
 0x9f9   : > { %v2975_v47 = vadd.f32 %v7093_v42, %v2966_v43  ;;  %v8164_v48 = vpop.f32.mrb[35].mxu0  ;;  %v8806_v43 = vld [vmem:[#allocation9 + $0x648] sm:$0xff]  }
 0x9fa   : > { %v8808_v45 = vld [vmem:[#allocation9 + $0x608] sm:$0xff]   ;;  %v8811_v48 = vld [vmem:[#allocation9 + $0x610] sm:$0xff]  }
 0x9fb   : > { %v9850_v51 = vadd.f32 %v2975_v47, %v2782_v46  ;;  %v8809_v46 = vld [vmem:[#allocation9 + $0x650] sm:$0xff]  }
 0x9fc   : > { %v8810_v47 = vld [vmem:[#allocation9 + $0x690] sm:$0xff]  }
 0x9fd   : > { %v2985_v54 = vmul.f32 %v7094_v50, %v9850_v51  ;;  %v8812_v50 = vld [vmem:[#allocation9 + $0x658] sm:$0xff]  }
 0x9ff   : > { %v2994_v55 = vadd.f32 %v7095_v52, %v2985_v54  ;;  %v8813_v52 = vld [vmem:[#allocation9 + $0x698] sm:$0xff]  }
 0xa00   : > { %v8814_v54 = vld [vmem:[#allocation9 + $0x618] sm:$0xff]  }
 0xa01   : > { %3045 = vst [vmem:[#allocation2 + $0x1] sm:$0xff] %v2994_v55  ;;  %v3051_v57 = vpack.c.bf16 %v2994_v55, %v2994_v55  ;;  %v8815_v55 = vld [vmem:[#allocation9 + $0x660] sm:$0xff]  }
 0xa03   : > { %3229 = vmatprep.mubr.bf16.mxu1 %v3051_v57  ;;  %v8816_v57 = vld [vmem:[#allocation9 + $0x6a0] sm:$0xff]  }
 0xa08   : > { %v3047_v49 = vld [vmem:[#allocation2] sm:$0xff] }
 0xa09   : > { %v3049_v53 = vld [vmem:[#allocation2 + $0x2] sm:$0xff]  ;;  %3345 = vst [vmem:[#allocation2] sm:$0x1] %v9343_v16  ;;  %v3050_v59 = vpack.c.bf16 %v3047_v49, %v3047_v49  ;;  %v8818_v49 = vld [vmem:[#allocation9 + $0x668] sm:$0xff]  }
 0xa0a   : > { %3347 = vst [vmem:[#allocation2 + $0x9] sm:$0x1] %v9343_v16  ;;  %v3052_v0 = vpack.c.bf16 %v3049_v53, %v3049_v53  ;;  %v8819_v53 = vld [vmem:[#allocation9 + $0x6a8] sm:$0xff]  }
 0xa0b   : > { %3230 = vmatmul.mubr.bf16.vlgmr.msra.gmra.mrb[32].mxu1 %v3050_v59  ;;  %v8822_v59 = vld [vmem:[#allocation9 + $0x6b0] sm:$0xff]  }
 0xa0c   : > { %8182 = vmatmul.mubr.bf16.vlgmr.msra.gmra.mrb[36].mxu0 %v3052_v0  ;;  %7657 = vmatpush3.bf16.msra.mxu1 %v8781_v56  ;;  %v8820_v56 = vld [vmem:[#allocation9 + $0x628] sm:$0xff]   ;;  %v8821_v0 = vld [vmem:[#allocation9 + $0x670] sm:$0xff]  }
 0xa0d   : > { %8186 = vmatpush3.bf16.msra.mxu0 %v8780_v58  ;;  %7658 = vmatprep.subr.bf16.mxu1 %v8782_v60  ;;  %v8817_v58 = vld [vmem:[#allocation9 + $0x620] sm:$0xff]   ;;  %v8823_v60 = vld [vmem:[#allocation9 + $0x630] sm:$0xff]  }
 0xa0e   : > { %8187 = vmatprep.subr.bf16.mxu0 %v9343_v16  ;;  %8201 = vmatprep.mubr.msk.bf16.mxu0 %vm9344_vm7, %v9343_v16 }
 0xa10   : > { %7659 = vmatpush3.bf16.msra.mxu1 %v8784_v62  ;;  %v8825_v62 = vld [vmem:[#allocation9 + $0x6b8] sm:$0xff]  }
 0xa11   : > { %8188 = vmatpush3.bf16.msra.mxu0 %v8783_v61  ;;  %7660 = vmatprep.subr.bf16.mxu1 %v8785_v4  ;;  %v8824_v61 = vld [vmem:[#allocation9 + $0x678] sm:$0xff]  }
 0xa12   : > { %8189 = vmatprep.subr.bf16.mxu0 %v9343_v16  ;;  %v8826_v4 = vld [vmem:[#allocation9 + $0x638] sm:$0xff]  }
 0xa14   : > { %7661 = vmatpush3.bf16.msra.mxu1 %v8787_v1 }
 0xa15   : > { %8190 = vmatpush3.bf16.msra.mxu0 %v8786_v63  ;;  %7662 = vmatprep.subr.bf16.mxu1 %v8788_v2 }
 0xa16   : > { %8191 = vmatprep.subr.bf16.mxu0 %v9343_v16 }
 0xa18   : > { %7663 = vmatpush3.bf16.msra.mxu1 %v8790_v5 }
 0xa19   : > { %8192 = vmatpush3.bf16.msra.mxu0 %v8789_v3  ;;  %7664 = vmatprep.subr.bf16.mxu1 %v8791_v6 }
 0xa1a   : > { %8193 = vmatprep.subr.bf16.mxu0 %v9343_v16 }
 0xa1c   : > { %7665 = vmatpush3.bf16.msra.mxu1 %v8793_v8  ;;  %v7146_v8 = vld [vmem:[#allocation6 + $0xd] ss:$0 sm:$0xff] }
 0xa1d   : > { %8194 = vmatpush3.bf16.msra.mxu0 %v8792_v7  ;;  %7666 = vmatprep.subr.bf16.mxu1 %v8794_v9 }
 0xa1e   : > { %8195 = vmatprep.subr.bf16.mxu0 %v9343_v16 }
 0xa20   : > { %7667 = vmatpush3.bf16.msra.mxu1 %v8796_v10 }
 0xa21   : > { %8196 = vmatpush3.bf16.msra.mxu0 %v8795_v19  ;;  %7668 = vmatprep.subr.bf16.mxu1 %v8797_v11  ;;  %v7147_v11 = vld [vmem:[#allocation8 + $0xd] ss:$0 sm:$0xff] }
 0xa22   : > { %8197 = vmatprep.subr.bf16.mxu0 %v9343_v16 }
 0xa24   : > { %7669 = vmatpush3.bf16.msra.mxu1 %v8799_v13 }
 0xa25   : > { %8198 = vmatpush3.bf16.msra.mxu0 %v8798_v12  ;;  %7670 = vmatprep.subr.bf16.mxu1 %v8800_v15  ;;  %v7148_v15 = vld [vmem:[#allocation6 + $0xe] ss:$0 sm:$0xff] }
 0xa26   : > { %8199 = vmatprep.subr.bf16.mxu0 %v9343_v16 }
 0xa28   : > { %7671 = vmatpush3.bf16.msra.mxu1 %v8802_v17  ;;  %v7149_v17 = vld [vmem:[#allocation8 + $0xe] ss:$0 sm:$0xff] }
 0xa29   : > { %8200 = vmatpush3.bf16.msra.mxu0 %v8801_v14  ;;  %7687 = vmatprep.subr.bf16.mxu1 %v8803_v20 }
 0xa2a   : > { %8205 = vmatprep.subr.bf16.mxu0 %v9343_v16 }
 0xade   : > { %v7641_v22 = vpop.f32.mrb[32].mxu1 }
 0xadf   : > { %v3271_v21 = vpop.f32.mrb[36].mxu0  ;;  %v7642_v24 = vpop.f32.mrb[33].mxu1 }
 0xae0   : > { %v8183_v23 = vpop.f32.mrb[37].mxu0  ;;  %v7643_v25 = vadd.f32 %v7642_v24, %v7641_v22  ;;  %v7644_v27 = vpop.f32.mrb[34].mxu1 }
 0xae1   : > { %v3274_v26 = vpop.f32.mrb[38].mxu0  ;;  %v7645_v30 = vpop.f32.mrb[35].mxu1  ;;  %v8832_v27 = vld [vmem:[#allocation9 + $0x748] sm:$0xff]  }
 0xae2   : > { %v8184_v29 = vpop.f32.mrb[39].mxu0  ;;  %v3272_v31 = vadd.f32 %v7643_v25, %v3271_v21 }
 0xae3   : > { %v8838_v29 = vld [vmem:[#allocation9 + $0x758] sm:$0xff]  }
 0xae4   : > { %v3285_v33 = vmul.f32 %v7120_v28, %v3272_v31  ;;  %v8835_v28 = vld [vmem:[#allocation9 + $0x750] sm:$0xff]  }
 0xae6   : > { %v3294_v34 = vadd.f32 %v7121_v32, %v3285_v33 }
 0xae8   : > { %v3295_v35 = vmax.f32 %v3294_v34, 0.0 }
 0xaea   : > { %3346 = vst [vmem:[#allocation2 + $0x1] sm:$0xff] %v3295_v35  ;;  %v3352_v36 = vpack.c.bf16 %v3295_v35, %v3295_v35 }
 0xaec   : > { %3530 = vmatprep.mubr.bf16.mxu1 %v3352_v36 }
 0xaf1   : > { %v3348_v38 = vld [vmem:[#allocation2] sm:$0xff] }
 0xaf2   : > { %v3350_v39 = vld [vmem:[#allocation2 + $0x2] sm:$0xff]  ;;  %3664 = vst [vmem:[#allocation2] sm:$0x1] %v9343_v16  ;;  %v3351_v42 = vpack.c.bf16 %v3348_v38, %v3348_v38 }
 0xaf3   : > { %3666 = vst [vmem:[#allocation2 + $0x9] sm:$0x1] %v9343_v16  ;;  %v3353_v41 = vpack.c.bf16 %v3350_v39, %v3350_v39  ;;  %v8827_v39 = vld [vmem:[#allocation9 + $0x700] sm:$0xff]  }
 0xaf4   : > { %3531 = vmatmul.mubr.bf16.vlgmr.msra.gmra.mrb[36].mxu1 %v3351_v42  ;;  %v8830_v42 = vld [vmem:[#allocation9 + $0x708] sm:$0xff]  }
 0xaf5   : > { %8202 = vmatmul.mubr.bf16.vlgmr.msra.gmra.mrb[40].mxu0 %v3353_v41  ;;  %7688 = vmatpush3.bf16.msra.mxu1 %v8805_v40  ;;  %v8828_v41 = vld [vmem:[#allocation9 + $0x6c0] sm:$0xff]  }
 0xaf6   : > { %8206 = vmatpush3.bf16.msra.mxu0 %v8804_v37  ;;  %8221 = vmatprep.mubr.msk.bf16.mxu0 %vm9344_vm7, %v9343_v16 }
 0xaf7   : > { %8207 = vmatprep.subr.bf16.mxu0 %v9343_v16  ;;  %7689 = vmatprep.subr.bf16.mxu1 %v8806_v43  ;;  %v8831_v43 = vld [vmem:[#allocation9 + $0x6c8] sm:$0xff]  }
 0xaf9   : > { %7690 = vmatpush3.bf16.msra.mxu1 %v8808_v45  ;;  %v8834_v45 = vld [vmem:[#allocation9 + $0x6d0] sm:$0xff]  }
 0xafa   : > { %8208 = vmatpush3.bf16.msra.mxu0 %v8807_v44  ;;  %7691 = vmatprep.subr.bf16.mxu1 %v8809_v46  ;;  %v8833_v44 = vld [vmem:[#allocation9 + $0x710] sm:$0xff]   ;;  %v8836_v46 = vld [vmem:[#allocation9 + $0x718] sm:$0xff]  }
 0xafb   : > { %8209 = vmatprep.subr.bf16.mxu0 %v9343_v16 }
 0xafd   : > { %7692 = vmatpush3.bf16.msra.mxu1 %v8811_v48  ;;  %v8839_v48 = vld [vmem:[#allocation9 + $0x720] sm:$0xff]  }
 0xafe   : > { %8210 = vmatpush3.bf16.msra.mxu0 %v8810_v47  ;;  %7693 = vmatprep.subr.bf16.mxu1 %v8812_v50  ;;  %v8837_v47 = vld [vmem:[#allocation9 + $0x6d8] sm:$0xff]   ;;  %v8840_v50 = vld [vmem:[#allocation9 + $0x6e0] sm:$0xff]  }
 0xaff   : > { %8211 = vmatprep.subr.bf16.mxu0 %v9343_v16 }
 0xb01   : > { %7694 = vmatpush3.bf16.msra.mxu1 %v8814_v54  ;;  %v8842_v54 = vld [vmem:[#allocation9 + $0x728] sm:$0xff]  }
 0xb02   : > { %8212 = vmatpush3.bf16.msra.mxu0 %v8813_v52  ;;  %7695 = vmatprep.subr.bf16.mxu1 %v8815_v55  ;;  %v8841_v52 = vld [vmem:[#allocation9 + $0x760] sm:$0xff]   ;;  %v8843_v55 = vld [vmem:[#allocation9 + $0x6e8] sm:$0xff]  }
 0xb03   : > { %8213 = vmatprep.subr.bf16.mxu0 %v9343_v16 }
 0xb05   : > { %7696 = vmatpush3.bf16.msra.mxu1 %v8817_v58  ;;  %v8845_v58 = vld [vmem:[#allocation9 + $0x730] sm:$0xff]  }
 0xb06   : > { %8214 = vmatpush3.bf16.msra.mxu0 %v8816_v57  ;;  %7697 = vmatprep.subr.bf16.mxu1 %v8818_v49  ;;  %v8844_v57 = vld [vmem:[#allocation9 + $0x768] sm:$0xff]   ;;  %v8846_v49 = vld [vmem:[#allocation9 + $0x6f0] sm:$0xff]  }
 0xb07   : > { %8215 = vmatprep.subr.bf16.mxu0 %v9343_v16 }
 0xb09   : > { %7698 = vmatpush3.bf16.msra.mxu1 %v8820_v56  ;;  %v8848_v56 = vld [vmem:[#allocation9 + $0x738] sm:$0xff]  }
 0xb0a   : > { %8216 = vmatpush3.bf16.msra.mxu0 %v8819_v53  ;;  %7699 = vmatprep.subr.bf16.mxu1 %v8821_v0  ;;  %v8847_v53 = vld [vmem:[#allocation9 + $0x770] sm:$0xff]   ;;  %v8849_v0 = vld [vmem:[#allocation9 + $0x6f8] sm:$0xff]  }
 0xb0b   : > { %8217 = vmatprep.subr.bf16.mxu0 %v9343_v16 }
 0xb0d   : > { %7700 = vmatpush3.bf16.msra.mxu1 %v8823_v60  ;;  %v7175_v60 = vld [vmem:[#allocation6 + $0xf] ss:$0 sm:$0xff] }
 0xb0e   : > { %8218 = vmatpush3.bf16.msra.mxu0 %v8822_v59  ;;  %7701 = vmatprep.subr.bf16.mxu1 %v8824_v61  ;;  %v8850_v59 = vld [vmem:[#allocation9 + $0x778] sm:$0xff]  }
 0xb0f   : > { %8219 = vmatprep.subr.bf16.mxu0 %v9343_v16 }
 0xb11   : > { %7702 = vmatpush3.bf16.msra.mxu1 %v8826_v4 }
 0xb12   : > { %8220 = vmatpush3.bf16.msra.mxu0 %v8825_v62  ;;  %8225 = vmatprep.subr.mxu1 %v9343_v16  ;;  %v7176_v62 = vld [vmem:[#allocation8 + $0xf] ss:$0 sm:$0xff] }
 0xb13   : > { %8230 = vmatprep.subr.bf16.mxu0 %v9343_v16 }
 0xbc7   : > { %v7672_v1 = vpop.f32.mrb[36].mxu1 }
 0xbc8   : > { %v3572_v63 = vpop.f32.mrb[40].mxu0  ;;  %v7673_v3 = vpop.f32.mrb[37].mxu1 }
 0xbc9   : > { %v8203_v2 = vpop.f32.mrb[41].mxu0  ;;  %v7674_v5 = vadd.f32 %v7673_v3, %v7672_v1  ;;  %v7675_v7 = vpop.f32.mrb[38].mxu1 }
 0xbca   : > { %v3575_v6 = vpop.f32.mrb[42].mxu0  ;;  %v7676_v19 = vpop.f32.mrb[39].mxu1 }
 0xbcb   : > { %v8204_v9 = vpop.f32.mrb[43].mxu0  ;;  %v3573_v10 = vadd.f32 %v7674_v5, %v3572_v63  ;;  %v8851_v19 = vld [vmem:[#allocation11 + $0x40] sm:$0xff]  }
 0xbcd   : > { %v3586_v12 = vmul.f32 %v7146_v8, %v3573_v10  ;;  %v8852_v10 = vld [vmem:[#allocation11 + $0x48] sm:$0xff]  }
 0xbcf   : > { %v3595_v13 = vadd.f32 %v7147_v11, %v3586_v12  ;;  %v8853_v11 = vld [vmem:[#allocation11 + $0x50] sm:$0xff]   ;;  %v8854_v12 = vld [vmem:[#allocation11 + $0x58] sm:$0xff]  }
 0xbd1   : > { %v9879_v14 = vadd.f32 %v3595_v13, %v9850_v51  ;;  %v8829_v51 = vld [vmem:[#allocation9 + $0x740] sm:$0xff]  }
 0xbd2   : > { %v8855_v13 = vld [vmem:[#allocation11 + $0x60] sm:$0xff]  }
 0xbd3   : > { %v3605_v20 = vmul.f32 %v7148_v15, %v9879_v14  ;;  %v8856_v15 = vld [vmem:[#allocation11 + $0x68] sm:$0xff]  }
 0xbd5   : > { %v3614_v21 = vadd.f32 %v7149_v17, %v3605_v20  ;;  %v8858_v17 = vld [vmem:[#allocation11 + $0x78] sm:$0xff]   ;;  %v8859_v20 = vld [vmem:[#allocation9 + $0x7c0] sm:$0xff]  }
 0xbd7   : > { %3665 = vst [vmem:[#allocation2 + $0x1] sm:$0xff] %v3614_v21  ;;  %v3671_v22 = vpack.c.bf16 %v3614_v21, %v3614_v21  ;;  %v8861_v21 = vld [vmem:[#allocation9 + $0x780] sm:$0xff]  }
 0xbd9   : > { %3849 = vmatprep.mubr.bf16.mxu1 %v3671_v22  ;;  %v8862_v22 = vld [vmem:[#allocation9 + $0x7c8] sm:$0xff]  }
 0xbde   : > { %v3669_v23 = vld [vmem:[#allocation2 + $0x2] sm:$0xff] }
 0xbdf   : > { %v3667_v24 = vld [vmem:[#allocation2] sm:$0xff]  ;;  %v3672_v25 = vpack.c.bf16 %v3669_v23, %v3669_v23  ;;  %v8864_v23 = vld [vmem:[#allocation9 + $0x788] sm:$0xff]  }
 0xbe0   : > { %v3670_v26 = vpack.c.bf16 %v3667_v24, %v3667_v24  ;;  %4038 = vst [vmem:[#allocation2] sm:$0x1] %v9343_v16  ;;  %4040 = vst [vmem:[#allocation2 + $0x5] sm:$0x1] %v9343_v16  ;;  %v8865_v24 = vld [vmem:[#allocation9 + $0x7d0] sm:$0xff]  }
 0xbe1   : > { %8222 = vmatmul.mubr.bf16.vlgmr.msra.gmra.mrb[44].mxu0 %v3672_v25  ;;  %v8867_v25 = vld [vmem:[#allocation9 + $0x790] sm:$0xff]  }
 0xbe2   : > { %3850 = vmatmul.mubr.bf16.vlgmr.msra.gmra.mrb[40].mxu1 %v3670_v26  ;;  %8246 = vmatprep.mubr.msk.bf16.mxu0 %vm9344_vm7, %v9343_v16 }
 0xbe3   : > { %8227 = vmatprep.mubr.msk.f32.mxu1 %vm9344_vm7, %v9343_v16  ;;  %8231 = vmatpush3.bf16.msra.mxu0 %v8829_v51 }
 0xbe4   : > { %8232 = vmatprep.subr.bf16.mxu0 %v9343_v16 }
 0xbe7   : > { %8233 = vmatpush3.bf16.msra.mxu0 %v8832_v27 }
 0xbe8   : > { %8234 = vmatprep.subr.bf16.mxu0 %v9343_v16 }
 0xbeb   : > { %8235 = vmatpush3.bf16.msra.mxu0 %v8835_v28 }
 0xbec   : > { %8236 = vmatprep.subr.bf16.mxu0 %v9343_v16 }
 0xbef   : > { %8237 = vmatpush3.bf16.msra.mxu0 %v8838_v29 }
 0xbf0   : > { %8238 = vmatprep.subr.bf16.mxu0 %v9343_v16 }
 0xbf3   : > { %8239 = vmatpush3.bf16.msra.mxu0 %v8841_v52  ;;  %v8877_v52 = vld [vmem:[#allocation9 + $0x7f0] sm:$0xff]  }
 0xbf4   : > { %8240 = vmatprep.subr.bf16.mxu0 %v9343_v16 }
 0xbf7   : > { %8241 = vmatpush3.bf16.msra.mxu0 %v8844_v57  ;;  %v8880_v57 = vld [vmem:[#allocation9 + $0x7f8] sm:$0xff]  }
 0xbf8   : > { %8242 = vmatprep.subr.bf16.mxu0 %v9343_v16 }
 0xbfb   : > { %8243 = vmatpush3.bf16.msra.mxu0 %v8847_v53  ;;  %v8883_v53 = vld [vmem:[#allocation9 + $0x880] sm:$0xff]  }
 0xbfc   : > { %8244 = vmatprep.subr.bf16.mxu0 %v9343_v16 }
 0xbff   : > { %8245 = vmatpush3.bf16.msra.mxu0 %v8850_v59 }
 0xc00   : > { %7762 = vmatprep.subr.bf16.mxu0 %v8859_v20  ;;  %v8885_v20 = vld [vmem:[#allocation9 + $0x840] sm:$0xff]  }
 0xcb4   : > { %v3891_v30 = vpop.f32.mrb[44].mxu0 }
 0xcb5   : > { %v7703_v31 = vpop.f32.mrb[40].mxu1  ;;  %v8223_v32 = vpop.f32.mrb[45].mxu0 }
 0xcb6   : > { %v7704_v33 = vpop.f32.mrb[41].mxu1  ;;  %v3894_v35 = vpop.f32.mrb[46].mxu0 }
 0xcb7   : > { %v7705_v34 = vadd.f32 %v7704_v33, %v7703_v31  ;;  %v7706_v36 = vpop.f32.mrb[42].mxu1  ;;  %v8224_v37 = vpop.f32.mrb[47].mxu0 }
 0xcb8   : > { %v7707_v38 = vpop.f32.mrb[43].mxu1  ;;  %v8860_v36 = vld [vmem:[#allocation9 + $0x800] sm:$0xff]  }
 0xcb9   : > { %v3892_v40 = vadd.f32 %v7705_v34, %v3891_v30 }
 0xcbb   : > { %8226 = vmatpush3.msra.mxu1 %v3892_v40  ;;  %v8866_v40 = vld [vmem:[#allocation9 + $0x810] sm:$0xff]  }
 0xcbc   : > { %8228 = vmatmul.mubr.msk.f32.vlgmr.msra.gmra.mrb[30].mxu1 %vm3897_vm9, %v9703_v18  ;;  %7720 = vmatprep.subr.bf16.mxu1 %v8827_v39  ;;  %v8863_v39 = vld [vmem:[#allocation9 + $0x808] sm:$0xff]  }
 0xcbd   : > { %7721 = vmatpush3.bf16.msra.mxu1 %v8828_v41  ;;  %v8868_v41 = vld [vmem:[#allocation9 + $0x7d8] sm:$0xff]  }
 0xcbe   : > { %7722 = vmatprep.subr.bf16.mxu1 %v8830_v42  ;;  %v8869_v42 = vld [vmem:[#allocation9 + $0x818] sm:$0xff]  }
 0xcc1   : > { %7723 = vmatpush3.bf16.msra.mxu1 %v8831_v43  ;;  %v8870_v43 = vld [vmem:[#allocation9 + $0x798] sm:$0xff]  }
 0xcc2   : > { %7724 = vmatprep.subr.bf16.mxu1 %v8833_v44  ;;  %v8871_v44 = vld [vmem:[#allocation9 + $0x7e0] sm:$0xff]  }
 0xcc5   : > { %7725 = vmatpush3.bf16.msra.mxu1 %v8834_v45  ;;  %v8872_v45 = vld [vmem:[#allocation9 + $0x820] sm:$0xff]  }
 0xcc6   : > { %7726 = vmatprep.subr.bf16.mxu1 %v8836_v46  ;;  %v8873_v46 = vld [vmem:[#allocation9 + $0x7a0] sm:$0xff]  }
 0xcc9   : > { %7727 = vmatpush3.bf16.msra.mxu1 %v8837_v47  ;;  %v8874_v47 = vld [vmem:[#allocation9 + $0x7e8] sm:$0xff]  }
 0xcca   : > { %7728 = vmatprep.subr.bf16.mxu1 %v8839_v48  ;;  %v8875_v48 = vld [vmem:[#allocation9 + $0x828] sm:$0xff]  }
 0xccd   : > { %7729 = vmatpush3.bf16.msra.mxu1 %v8840_v50  ;;  %v8876_v50 = vld [vmem:[#allocation9 + $0x7a8] sm:$0xff]  }
 0xcce   : > { %7730 = vmatprep.subr.bf16.mxu1 %v8842_v54  ;;  %v8878_v54 = vld [vmem:[#allocation9 + $0x830] sm:$0xff]  }
 0xcd1   : > { %7731 = vmatpush3.bf16.msra.mxu1 %v8843_v55  ;;  %v8879_v55 = vld [vmem:[#allocation9 + $0x7b0] sm:$0xff]  }
 0xcd2   : > { %7732 = vmatprep.subr.bf16.mxu1 %v8845_v58  ;;  %v8881_v58 = vld [vmem:[#allocation9 + $0x838] sm:$0xff]  }
 0xcd5   : > { %7733 = vmatpush3.bf16.msra.mxu1 %v8846_v49  ;;  %v8882_v49 = vld [vmem:[#allocation9 + $0x7b8] sm:$0xff]  }
 0xcd6   : > { %7734 = vmatprep.subr.bf16.mxu1 %v8848_v56  ;;  %v7201_v56 = vld [vmem:[#allocation6 + $0x10] ss:$0 sm:$0xff] }
 0xcd9   : > { %7735 = vmatpush3.bf16.msra.mxu1 %v8849_v0  ;;  %v7212_v0 = vld [vmem:[#allocation6 + $0x11] ss:$0 sm:$0xff] }
 0xcda   : > { %8250 = vmatprep.subr.mxu1 %v9343_v16 }
 0xd8f   : > { %v3966_v61 = vpop.f32.mrb[30].mxu1 }
 0xd90   : > { %v3978_v4 = vmul.f32 %v7175_v60, %v3966_v61  ;;  %v8229_v63 = vpop.f32.mrb[31].mxu1  ;;  %v7202_v60 = vld [vmem:[#allocation8 + $0x10] ss:$0 sm:$0xff] }
 0xd92   : > { %v3987_v1 = vadd.f32 %v7176_v62, %v3978_v4  ;;  %v7213_v62 = vld [vmem:[#allocation8 + $0x11] ss:$0 sm:$0xff] }
 0xd94   : > { %v3988_v2 = vmax.f32 %v3987_v1, 0.0 }
 0xd96   : > { %4039 = vst [vmem:[#allocation2 + $0x1] sm:$0xf] %v3988_v2 }
 0xd9d   : > { %v4042_v3 = vld [vmem:[#allocation2 + $0x1] sm:$0xf] }
 0xd9e   : > { %v4043_v5 = vld [vmem:[#allocation2 + $0x2] sm:$0xf]  ;;  %v4045_v7 = vpack.c.bf16 %v4042_v3, %v4042_v3 }
 0xd9f   : > { %v4041_v6 = vld [vmem:[#allocation2] sm:$0xf]  ;;  %v4046_v8 = vpack.c.bf16 %v4043_v5, %v4043_v5  ;;  %4553 = vst [vmem:[#allocation2 + $0x5] sm:$0x1] %v9343_v16 }
 0xda0   : > { %v4044_v9 = vpack.c.bf16 %v4041_v6, %v4041_v6  ;;  %4551 = vst [vmem:[#allocation2] sm:$0x1] %v9343_v16  ;;  %4223 = vmatprep.mubr.bf16.mxu1 %v4045_v7  ;;  %v7214_v6 = vld [vmem:[#allocation6 + $0x12] ss:$0 sm:$0xff] }
 0xda1   : > { %8247 = vmatmul.mubr.bf16.vlgmr.msra.gmra.mrb[48].mxu0 %v4046_v8  ;;  %v7215_v8 = vld [vmem:[#allocation8 + $0x12] ss:$0 sm:$0xff] }
 0xda2   : > { %4224 = vmatmul.mubr.bf16.vlgmr.msra.gmra.mrb[44].mxu1 %v4044_v9  ;;  %7763 = vmatpush3.bf16.msra.mxu0 %v8861_v21  ;;  %v8886_v21 = vld [vmem:[#allocation9 + $0x888] sm:$0xff]  }
 0xda3   : > { %8251 = vmatpush3.msra.mxu1 %v9879_v14  ;;  %8252 = vmatprep.mubr.msk.f32.mxu1 %vm9344_vm7, %v9343_v16  ;;  %v8857_v14 = vld [vmem:[#allocation11 + $0x70] sm:$0xff]  }
 0xda4   : > { %8255 = vmatprep.subr.bf16.mxu1 %v9343_v16  ;;  %7764 = vmatprep.subr.bf16.mxu0 %v8862_v22  ;;  %v8887_v22 = vld [vmem:[#allocation9 + $0x8c8] sm:$0xff]  }
 0xda6   : > { %7765 = vmatpush3.bf16.msra.mxu0 %v8864_v23  ;;  %v8888_v23 = vld [vmem:[#allocation9 + $0x848] sm:$0xff]  }
 0xda7   : > { %7766 = vmatprep.subr.bf16.mxu0 %v8865_v24  ;;  %v8889_v24 = vld [vmem:[#allocation9 + $0x890] sm:$0xff]  }
 0xdaa   : > { %8253 = vmatmul.mubr.msk.f32.vlgmr.msra.gmra.mrb[48].mxu1 %vm3897_vm9, %v9703_v18  ;;  %7767 = vmatpush3.bf16.msra.mxu0 %v8867_v25  ;;  %v8890_v25 = vld [vmem:[#allocation9 + $0x8d0] sm:$0xff]  }
 0xdab   : > { %8256 = vmatpush3.bf16.msra.mxu1 %v8851_v19  ;;  %8271 = vmatprep.mubr.msk.bf16.mxu1 %vm9344_vm7, %v9343_v16 }
 0xdac   : > { %8257 = vmatprep.subr.bf16.mxu1 %v9343_v16  ;;  %7768 = vmatprep.subr.bf16.mxu0 %v8868_v41  ;;  %v8907_v41 = vld [vmem:[#allocation9 + $0x940] sm:$0xff]  }
 0xdae   : > { %7769 = vmatpush3.bf16.msra.mxu0 %v8870_v43 }
 0xdaf   : > { %8258 = vmatpush3.bf16.msra.mxu1 %v8852_v10  ;;  %7770 = vmatprep.subr.bf16.mxu0 %v8871_v44  ;;  %v8884_v10 = vld [vmem:[#allocation9 + $0x8c0] sm:$0xff]  }
 0xdb0   : > { %8259 = vmatprep.subr.bf16.mxu1 %v9343_v16 }
 0xdb2   : > { %7771 = vmatpush3.bf16.msra.mxu0 %v8873_v46 }
 0xdb3   : > { %8260 = vmatpush3.bf16.msra.mxu1 %v8853_v11  ;;  %7772 = vmatprep.subr.bf16.mxu0 %v8874_v47 }
 0xdb4   : > { %8261 = vmatprep.subr.bf16.mxu1 %v9343_v16 }
 0xdb6   : > { %7773 = vmatpush3.bf16.msra.mxu0 %v8876_v50 }
 0xdb7   : > { %8262 = vmatpush3.bf16.msra.mxu1 %v8854_v12  ;;  %7774 = vmatprep.subr.bf16.mxu0 %v8877_v52  ;;  %v7240_v52 = vld [vmem:[#allocation6 + $0x13] ss:$0 sm:$0xff] }
 0xdb8   : > { %8263 = vmatprep.subr.bf16.mxu1 %v9343_v16 }
 0xdba   : > { %7775 = vmatpush3.bf16.msra.mxu0 %v8879_v55 }
 0xdbb   : > { %8264 = vmatpush3.bf16.msra.mxu1 %v8855_v13  ;;  %7776 = vmatprep.subr.bf16.mxu0 %v8880_v57  ;;  %v7241_v57 = vld [vmem:[#allocation8 + $0x13] ss:$0 sm:$0xff] }
 0xdbc   : > { %8265 = vmatprep.subr.bf16.mxu1 %v9343_v16 }
 0xdbe   : > { %7777 = vmatpush3.bf16.msra.mxu0 %v8882_v49 }
 0xdbf   : > { %8266 = vmatpush3.bf16.msra.mxu1 %v8856_v15  ;;  %7793 = vmatprep.subr.bf16.mxu0 %v8883_v53 }
 0xdc0   : > { %8267 = vmatprep.subr.bf16.mxu1 %v9343_v16 }
 0xdc3   : > { %8268 = vmatpush3.bf16.msra.mxu1 %v8857_v14 }
 0xdc4   : > { %8269 = vmatprep.subr.bf16.mxu1 %v9343_v16 }
 0xdc7   : > { %8270 = vmatpush3.bf16.msra.mxu1 %v8858_v17 }
 0xdc8   : > { %8275 = vmatprep.subr.bf16.mxu1 %v9343_v16 }
 0xe74   : > { %v4265_v26 = vpop.f32.mrb[48].mxu0 }
 0xe75   : > { %v7736_v51 = vpop.f32.mrb[44].mxu1  ;;  %v8248_v27 = vpop.f32.mrb[49].mxu0 }
 0xe76   : > { %v7737_v28 = vpop.f32.mrb[45].mxu1  ;;  %v4268_v29 = vpop.f32.mrb[50].mxu0  ;;  %v8893_v27 = vld [vmem:[#allocation9 + $0x8d8] sm:$0xff]  }
 0xe77   : > { %v7738_v30 = vadd.f32 %v7737_v28, %v7736_v51  ;;  %v7739_v31 = vpop.f32.mrb[46].mxu1  ;;  %v8249_v32 = vpop.f32.mrb[51].mxu0  ;;  %v8892_v51 = vld [vmem:[#allocation9 + $0x898] sm:$0xff]   ;;  %v8895_v29 = vld [vmem:[#allocation9 + $0x8a0] sm:$0xff]  }
 0xe78   : > { %v7740_v33 = vpop.f32.mrb[47].mxu1  ;;  %v8894_v28 = vld [vmem:[#allocation9 + $0x858] sm:$0xff]   ;;  %v8897_v31 = vld [vmem:[#allocation9 + $0x860] sm:$0xff]   ;;  %v8898_v32 = vld [vmem:[#allocation9 + $0x8a8] sm:$0xff]  }
 0xe79   : > { %v4266_v34 = vadd.f32 %v7738_v30, %v4265_v26  ;;  %v8891_v26 = vld [vmem:[#allocation9 + $0x850] sm:$0xff]   ;;  %v8896_v30 = vld [vmem:[#allocation9 + $0x8e0] sm:$0xff]   ;;  %v8899_v33 = vld [vmem:[#allocation9 + $0x8e8] sm:$0xff]  }
 0xe7b   : > { %v4279_v59 = vmul.f32 %v7201_v56, %v4266_v34  ;;  %v8900_v34 = vld [vmem:[#allocation9 + $0x868] sm:$0xff]   ;;  %v8908_v56 = vld [vmem:[#allocation9 + $0x980] sm:$0xff]  }
 0xe7d   : > { %v4355_v35 = vpop.f32.mrb[48].mxu1  ;;  %v4288_v2 = vadd.f32 %v7202_v60, %v4279_v59 }
 0xe7e   : > { %v4359_v37 = vpack.c.bf16 %v4355_v35, %v4355_v35  ;;  %v8254_v38 = vpop.f32.mrb[49].mxu1  ;;  %v8901_v35 = vld [vmem:[#allocation9 + $0x8b0] sm:$0xff]  }
 0xe7f   : > { %v8904_v38 = vld [vmem:[#allocation9 + $0x8b8] sm:$0xff]  }
 0xe80   : > { %8272 = vmatmul.mubr.bf16.vlgmr.msra.gmra.mrb[52].mxu1 %v4359_v37  ;;  %v8903_v37 = vld [vmem:[#allocation9 + $0x870] sm:$0xff]  }
 0xe81   : > { %8276 = vmatpush3.bf16.msra.mxu1 %v8860_v36  ;;  %8291 = vmatprep.mubr.msk.bf16.mxu1 %vm9344_vm7, %v9343_v16  ;;  %v8902_v36 = vld [vmem:[#allocation9 + $0x8f0] sm:$0xff]  }
 0xe82   : > { %8277 = vmatprep.subr.bf16.mxu1 %v9343_v16 }
 0xe85   : > { %8278 = vmatpush3.bf16.msra.mxu1 %v8863_v39  ;;  %v8905_v39 = vld [vmem:[#allocation9 + $0x8f8] sm:$0xff]  }
 0xe86   : > { %8279 = vmatprep.subr.bf16.mxu1 %v9343_v16 }
 0xe89   : > { %8280 = vmatpush3.bf16.msra.mxu1 %v8866_v40  ;;  %v8906_v40 = vld [vmem:[#allocation9 + $0x878] sm:$0xff]  }
 0xe8a   : > { %8281 = vmatprep.subr.bf16.mxu1 %v9343_v16 }
 0xe8d   : > { %8282 = vmatpush3.bf16.msra.mxu1 %v8869_v42 }
 0xe8e   : > { %8283 = vmatprep.subr.bf16.mxu1 %v9343_v16 }
 0xe91   : > { %8284 = vmatpush3.bf16.msra.mxu1 %v8872_v45 }
 0xe92   : > { %8285 = vmatprep.subr.bf16.mxu1 %v9343_v16 }
 0xe95   : > { %8286 = vmatpush3.bf16.msra.mxu1 %v8875_v48 }
 0xe96   : > { %8287 = vmatprep.subr.bf16.mxu1 %v9343_v16 }
 0xe99   : > { %8288 = vmatpush3.bf16.msra.mxu1 %v8878_v54 }
 0xe9a   : > { %8289 = vmatprep.subr.bf16.mxu1 %v9343_v16 }
 0xe9d   : > { %8290 = vmatpush3.bf16.msra.mxu1 %v8881_v58 }
 0xe9e   : > { %8295 = vmatprep.subr.bf16.mxu1 %v9343_v16 }
 0xf53   : > { %v4459_v61 = vpop.f32.mrb[52].mxu1 }
 0xf54   : > { %v4473_v4 = vmul.f32 %v7212_v0, %v4459_v61  ;;  %v8273_v63 = vpop.f32.mrb[53].mxu1 }
 0xf55   : > { %v4462_v1 = vpop.f32.mrb[54].mxu1  ;;  %v8909_v63 = vld [vmem:[#allocation9 + $0x900] sm:$0xff]  }
 0xf56   : > { %v4482_v3 = vadd.f32 %v7213_v62, %v4473_v4  ;;  %v8274_v5 = vpop.f32.mrb[55].mxu1  ;;  %v8910_v1 = vld [vmem:[#allocation9 + $0x948] sm:$0xff]  }
 0xf57   : > { %v8913_v5 = vld [vmem:[#allocation9 + $0x950] sm:$0xff]  }
 0xf58   : > { %v9926_v7 = vadd.f32 %v4482_v3, %v4288_v2  ;;  %v8911_v2 = vld [vmem:[#allocation9 + $0x988] sm:$0xff]  }
 0xf59   : > { %v8912_v3 = vld [vmem:[#allocation9 + $0x908] sm:$0xff]  }
 0xf5a   : > { %v4492_v9 = vmul.f32 %v7214_v6, %v9926_v7  ;;  %v8914_v6 = vld [vmem:[#allocation9 + $0x990] sm:$0xff]  }
 0xf5c   : > { %v4501_v19 = vadd.f32 %v7215_v8, %v4492_v9  ;;  %v8915_v8 = vld [vmem:[#allocation9 + $0x910] sm:$0xff]   ;;  %v8916_v9 = vld [vmem:[#allocation9 + $0x958] sm:$0xff]  }
 0xf5e   : > { %4552 = vst [vmem:[#allocation2 + $0x1] sm:$0xf] %v4501_v19  ;;  %v8917_v19 = vld [vmem:[#allocation9 + $0x998] sm:$0xff]  }
 0xf65   : > { %v4555_v11 = vld [vmem:[#allocation2 + $0x1] sm:$0xf] }
 0xf66   : > { %v4556_v12 = vld [vmem:[#allocation2 + $0x2] sm:$0xf]  ;;  %v4558_v15 = vpack.c.bf16 %v4555_v11, %v4555_v11  ;;  %v8919_v11 = vld [vmem:[#allocation9 + $0x960] sm:$0xff]  }
 0xf67   : > { %v4554_v13 = vld [vmem:[#allocation2] sm:$0xf]  ;;  %v4559_v14 = vpack.c.bf16 %v4556_v12, %v4556_v12  ;;  %4854 = vst [vmem:[#allocation2 + $0x5] sm:$0x1] %v9343_v16  ;;  %v8920_v12 = vld [vmem:[#allocation9 + $0x9a0] sm:$0xff]  }
 0xf68   : > { %v4557_v17 = vpack.c.bf16 %v4554_v13, %v4554_v13  ;;  %4852 = vst [vmem:[#allocation2] sm:$0x1] %v9343_v16  ;;  %4736 = vmatprep.mubr.bf16.mxu0 %v4558_v15  ;;  %v8921_v13 = vld [vmem:[#allocation9 + $0x920] sm:$0xff]   ;;  %v8922_v15 = vld [vmem:[#allocation9 + $0x968] sm:$0xff]  }
 0xf69   : > { %8292 = vmatmul.mubr.bf16.vlgmr.msra.gmra.mrb[56].mxu1 %v4559_v14  ;;  %v8923_v14 = vld [vmem:[#allocation9 + $0x9a8] sm:$0xff]  }
 0xf6a   : > { %4737 = vmatmul.mubr.bf16.vlgmr.msra.gmra.mrb[52].mxu0 %v4557_v17  ;;  %8296 = vmatpush3.bf16.msra.mxu1 %v8884_v10  ;;  %v8918_v10 = vld [vmem:[#allocation9 + $0x918] sm:$0xff]   ;;  %v8924_v17 = vld [vmem:[#allocation9 + $0x928] sm:$0xff]  }
 0xf6b   : > { %7794 = vmatpush3.bf16.msra.mxu0 %v8885_v20  ;;  %8297 = vmatprep.subr.bf16.mxu1 %v9343_v16  ;;  %v8925_v20 = vld [vmem:[#allocation9 + $0x970] sm:$0xff]  }
 0xf6c   : > { %7795 = vmatprep.subr.bf16.mxu0 %v8886_v21  ;;  %8311 = vmatprep.mubr.msk.bf16.mxu1 %vm9344_vm7, %v9343_v16  ;;  %v8926_v21 = vld [vmem:[#allocation9 + $0x9b0] sm:$0xff]  }
 0xf6e   : > { %8298 = vmatpush3.bf16.msra.mxu1 %v8887_v22  ;;  %v8927_v22 = vld [vmem:[#allocation9 + $0x930] sm:$0xff]  }
 0xf6f   : > { %7796 = vmatpush3.bf16.msra.mxu0 %v8888_v23  ;;  %8299 = vmatprep.subr.bf16.mxu1 %v9343_v16  ;;  %v8928_v23 = vld [vmem:[#allocation9 + $0x978] sm:$0xff]  }
 0xf70   : > { %7797 = vmatprep.subr.bf16.mxu0 %v8889_v24  ;;  %v8929_v24 = vld [vmem:[#allocation9 + $0x9b8] sm:$0xff]  }
 0xf72   : > { %8300 = vmatpush3.bf16.msra.mxu1 %v8890_v25  ;;  %v8930_v25 = vld [vmem:[#allocation9 + $0x938] sm:$0xff]  }
 0xf73   : > { %7798 = vmatpush3.bf16.msra.mxu0 %v8891_v26  ;;  %8301 = vmatprep.subr.bf16.mxu1 %v9343_v16 }
 0xf74   : > { %7799 = vmatprep.subr.bf16.mxu0 %v8892_v51 }
 0xf76   : > { %8302 = vmatpush3.bf16.msra.mxu1 %v8893_v27 }
 0xf77   : > { %7800 = vmatpush3.bf16.msra.mxu0 %v8894_v28  ;;  %8303 = vmatprep.subr.bf16.mxu1 %v9343_v16 }
 0xf78   : > { %7801 = vmatprep.subr.bf16.mxu0 %v8895_v29 }
 0xf7a   : > { %8304 = vmatpush3.bf16.msra.mxu1 %v8896_v30 }
 0xf7b   : > { %7802 = vmatpush3.bf16.msra.mxu0 %v8897_v31  ;;  %8305 = vmatprep.subr.bf16.mxu1 %v9343_v16 }
 0xf7c   : > { %7803 = vmatprep.subr.bf16.mxu0 %v8898_v32 }
 0xf7e   : > { %8306 = vmatpush3.bf16.msra.mxu1 %v8899_v33  ;;  %v7266_v33 = vld [vmem:[#allocation6 + $0x14] ss:$0 sm:$0xff] }
 0xf7f   : > { %7804 = vmatpush3.bf16.msra.mxu0 %v8900_v34  ;;  %8307 = vmatprep.subr.bf16.mxu1 %v9343_v16 }
 0xf80   : > { %7805 = vmatprep.subr.bf16.mxu0 %v8901_v35 }
 0xf82   : > { %8308 = vmatpush3.bf16.msra.mxu1 %v8902_v36  ;;  %v7267_v36 = vld [vmem:[#allocation8 + $0x14] ss:$0 sm:$0xff] }
 0xf83   : > { %7806 = vmatpush3.bf16.msra.mxu0 %v8903_v37  ;;  %8309 = vmatprep.subr.bf16.mxu1 %v9343_v16 }
 0xf84   : > { %7807 = vmatprep.subr.bf16.mxu0 %v8904_v38 }
 0xf86   : > { %8310 = vmatpush3.bf16.msra.mxu1 %v8905_v39  ;;  %v7268_v39 = vld [vmem:[#allocation6 + $0x15] ss:$0 sm:$0xff] }
 0xf87   : > { %7808 = vmatpush3.bf16.msra.mxu0 %v8906_v40  ;;  %8315 = vmatprep.subr.bf16.mxu1 %v9343_v16 }
 0xf88   : > { %7824 = vmatprep.subr.bf16.mxu0 %v8907_v41  ;;  %v7269_v41 = vld [vmem:[#allocation8 + $0x15] ss:$0 sm:$0xff] }
0x103c   : > { %v4778_v42 = vpop.f32.mrb[56].mxu1 }
0x103d   : > { %v7778_v43 = vpop.f32.mrb[52].mxu0  ;;  %v8293_v44 = vpop.f32.mrb[57].mxu1 }
0x103e   : > { %v7779_v45 = vpop.f32.mrb[53].mxu0  ;;  %v4781_v46 = vpop.f32.mrb[58].mxu1 }
0x103f   : > { %v7780_v47 = vadd.f32 %v7779_v45, %v7778_v43  ;;  %v7781_v48 = vpop.f32.mrb[54].mxu0  ;;  %v8294_v50 = vpop.f32.mrb[59].mxu1 }
0x1040   : > { %v7782_v54 = vpop.f32.mrb[55].mxu0 }
0x1041   : > { %v4779_v55 = vadd.f32 %v7780_v47, %v4778_v42  ;;  %v8941_v54 = vld [vmem:[#allocation9 + $0xa50] sm:$0xff]  }
0x1043   : > { %v4792_v58 = vmul.f32 %v7240_v52, %v4779_v55  ;;  %v8938_v52 = vld [vmem:[#allocation9 + $0xa48] sm:$0xff]  }
0x1045   : > { %v4801_v49 = vadd.f32 %v7241_v57, %v4792_v58 }
0x1047   : > { %v4802_v53 = vmax.f32 %v4801_v49, 0.0 }
0x1049   : > { %4853 = vst [vmem:[#allocation2 + $0x1] sm:$0xf] %v4802_v53 }
0x1050   : > { %v4856_v0 = vld [vmem:[#allocation2 + $0x1] sm:$0xf] }
0x1051   : > { %v4857_v59 = vld [vmem:[#allocation2 + $0x2] sm:$0xf]  ;;  %v4859_v61 = vpack.c.bf16 %v4856_v0, %v4856_v0 }
0x1052   : > { %v4855_v60 = vld [vmem:[#allocation2] sm:$0xf]  ;;  %v4860_v62 = vpack.c.bf16 %v4857_v59, %v4857_v59  ;;  %5173 = vst [vmem:[#allocation2 + $0x5] sm:$0x1] %v9343_v16 }
0x1053   : > { %v4858_v4 = vpack.c.bf16 %v4855_v60, %v4855_v60  ;;  %5171 = vst [vmem:[#allocation2] sm:$0x1] %v9343_v16  ;;  %5037 = vmatprep.mubr.bf16.mxu0 %v4859_v61  ;;  %v8931_v61 = vld [vmem:[#allocation9 + $0xa00] sm:$0xff]  }
0x1054   : > { %8312 = vmatmul.mubr.bf16.vlgmr.msra.gmra.mrb[60].mxu1 %v4860_v62 }
0x1055   : > { %5038 = vmatmul.mubr.bf16.vlgmr.msra.gmra.mrb[56].mxu0 %v4858_v4  ;;  %8316 = vmatpush3.bf16.msra.mxu1 %v8908_v56  ;;  %v8932_v4 = vld [vmem:[#allocation9 + $0x9c0] sm:$0xff]  }
0x1056   : > { %7825 = vmatpush3.bf16.msra.mxu0 %v8909_v63  ;;  %8317 = vmatprep.subr.bf16.mxu1 %v9343_v16  ;;  %v8933_v63 = vld [vmem:[#allocation9 + $0xa08] sm:$0xff]  }
0x1057   : > { %8331 = vmatprep.mubr.msk.bf16.mxu1 %vm9344_vm7, %v9343_v16  ;;  %7826 = vmatprep.subr.bf16.mxu0 %v8910_v1  ;;  %v8934_v1 = vld [vmem:[#allocation9 + $0x9c8] sm:$0xff]  }
0x1059   : > { %8318 = vmatpush3.bf16.msra.mxu1 %v8911_v2  ;;  %v8936_v2 = vld [vmem:[#allocation9 + $0xa10] sm:$0xff]  }
0x105a   : > { %7827 = vmatpush3.bf16.msra.mxu0 %v8912_v3  ;;  %8319 = vmatprep.subr.bf16.mxu1 %v9343_v16  ;;  %v8937_v3 = vld [vmem:[#allocation9 + $0x9d0] sm:$0xff]  }
0x105b   : > { %7828 = vmatprep.subr.bf16.mxu0 %v8913_v5  ;;  %v8939_v5 = vld [vmem:[#allocation9 + $0xa18] sm:$0xff]  }
0x105d   : > { %8320 = vmatpush3.bf16.msra.mxu1 %v8914_v6  ;;  %v8940_v6 = vld [vmem:[#allocation9 + $0x9d8] sm:$0xff]  }
0x105e   : > { %7829 = vmatpush3.bf16.msra.mxu0 %v8915_v8  ;;  %8321 = vmatprep.subr.bf16.mxu1 %v9343_v16  ;;  %v8944_v8 = vld [vmem:[#allocation9 + $0xa58] sm:$0xff]  }
0x105f   : > { %7830 = vmatprep.subr.bf16.mxu0 %v8916_v9  ;;  %v8942_v9 = vld [vmem:[#allocation9 + $0xa20] sm:$0xff]  }
0x1061   : > { %8322 = vmatpush3.bf16.msra.mxu1 %v8917_v19  ;;  %v8943_v19 = vld [vmem:[#allocation9 + $0x9e0] sm:$0xff]  }
0x1062   : > { %7831 = vmatpush3.bf16.msra.mxu0 %v8918_v10  ;;  %8323 = vmatprep.subr.bf16.mxu1 %v9343_v16  ;;  %v8947_v10 = vld [vmem:[#allocation9 + $0xa60] sm:$0xff]  }
0x1063   : > { %7832 = vmatprep.subr.bf16.mxu0 %v8919_v11  ;;  %v8945_v11 = vld [vmem:[#allocation9 + $0xa28] sm:$0xff]  }
0x1065   : > { %8324 = vmatpush3.bf16.msra.mxu1 %v8920_v12  ;;  %v8946_v12 = vld [vmem:[#allocation9 + $0x9e8] sm:$0xff]  }
0x1066   : > { %7833 = vmatpush3.bf16.msra.mxu0 %v8921_v13  ;;  %8325 = vmatprep.subr.bf16.mxu1 %v9343_v16  ;;  %v8950_v13 = vld [vmem:[#allocation9 + $0xa68] sm:$0xff]  }
0x1067   : > { %7834 = vmatprep.subr.bf16.mxu0 %v8922_v15  ;;  %v8948_v15 = vld [vmem:[#allocation9 + $0xa30] sm:$0xff]  }
0x1069   : > { %8326 = vmatpush3.bf16.msra.mxu1 %v8923_v14  ;;  %v8949_v14 = vld [vmem:[#allocation9 + $0x9f0] sm:$0xff]  }
0x106a   : > { %7835 = vmatpush3.bf16.msra.mxu0 %v8924_v17  ;;  %8327 = vmatprep.subr.bf16.mxu1 %v9343_v16  ;;  %v8951_v17 = vld [vmem:[#allocation9 + $0xa38] sm:$0xff]  }
0x106b   : > { %7836 = vmatprep.subr.bf16.mxu0 %v8925_v20  ;;  %v8953_v20 = vld [vmem:[#allocation9 + $0xa70] sm:$0xff]  }
0x106d   : > { %8328 = vmatpush3.bf16.msra.mxu1 %v8926_v21  ;;  %v8952_v21 = vld [vmem:[#allocation9 + $0x9f8] sm:$0xff]  }
0x106e   : > { %7837 = vmatpush3.bf16.msra.mxu0 %v8927_v22  ;;  %8329 = vmatprep.subr.bf16.mxu1 %v9343_v16  ;;  %v8954_v22 = vld [vmem:[#allocation9 + $0xa78] sm:$0xff]  }
0x106f   : > { %7838 = vmatprep.subr.bf16.mxu0 %v8928_v23  ;;  %v7296_v23 = vld [vmem:[#allocation6 + $0x16] ss:$0 sm:$0xff] }
0x1071   : > { %8330 = vmatpush3.bf16.msra.mxu1 %v8929_v24 }
0x1072   : > { %7839 = vmatpush3.bf16.msra.mxu0 %v8930_v25  ;;  %8340 = vmatprep.subr.bf16.mxu1 %v9343_v16  ;;  %v7297_v25 = vld [vmem:[#allocation8 + $0x16] ss:$0 sm:$0xff] }
0x1073   : > { %8335 = vmatprep.subr.mxu0 %v9343_v16 }
0x1127   : > { %v5079_v26 = vpop.f32.mrb[60].mxu1 }
0x1128   : > { %v7809_v51 = vpop.f32.mrb[56].mxu0  ;;  %v8313_v27 = vpop.f32.mrb[61].mxu1 }
0x1129   : > { %v7810_v28 = vpop.f32.mrb[57].mxu0  ;;  %v5082_v29 = vpop.f32.mrb[62].mxu1 }
0x112a   : > { %v7811_v30 = vadd.f32 %v7810_v28, %v7809_v51  ;;  %v7812_v31 = vpop.f32.mrb[58].mxu0  ;;  %v8314_v32 = vpop.f32.mrb[63].mxu1 }
0x112b   : > { %v7813_v34 = vpop.f32.mrb[59].mxu0 }
0x112c   : > { %v5080_v35 = vadd.f32 %v7811_v30, %v5079_v26 }
0x112e   : > { %v5093_v37 = vmul.f32 %v7266_v33, %v5080_v35  ;;  %v8955_v35 = vld [vmem:[#allocation11 + $0x80] sm:$0xff]  }
0x1130   : > { %v5102_v38 = vadd.f32 %v7267_v36, %v5093_v37  ;;  %v8956_v36 = vld [vmem:[#allocation11 + $0x88] sm:$0xff]   ;;  %v8957_v37 = vld [vmem:[#allocation11 + $0x90] sm:$0xff]  }
0x1132   : > { %v9955_v40 = vadd.f32 %v5102_v38, %v9926_v7  ;;  %v8935_v7 = vld [vmem:[#allocation9 + $0xa40] sm:$0xff]   ;;  %v8958_v38 = vld [vmem:[#allocation11 + $0x98] sm:$0xff]  }
0x1134   : > { %v5112_v42 = vmul.f32 %v7268_v39, %v9955_v40  ;;  %v8959_v39 = vld [vmem:[#allocation11 + $0xa0] sm:$0xff]  }
0x1136   : > { %v5121_v43 = vadd.f32 %v7269_v41, %v5112_v42  ;;  %v8962_v41 = vld [vmem:[#allocation11 + $0xb8] sm:$0xff]   ;;  %v8963_v42 = vld [vmem:[#allocation9 + $0xac0] sm:$0xff]  }
0x1138   : > { %5172 = vst [vmem:[#allocation2 + $0x1] sm:$0xf] %v5121_v43  ;;  %v8965_v43 = vld [vmem:[#allocation9 + $0xa80] sm:$0xff]  }
0x113f   : > { %v5175_v44 = vld [vmem:[#allocation2 + $0x1] sm:$0xf] }
0x1140   : > { %v5176_v45 = vld [vmem:[#allocation2 + $0x2] sm:$0xf]  ;;  %v5178_v47 = vpack.c.bf16 %v5175_v44, %v5175_v44  ;;  %v8966_v44 = vld [vmem:[#allocation9 + $0xac8] sm:$0xff]  }
0x1141   : > { %v5174_v46 = vld [vmem:[#allocation2] sm:$0xf]  ;;  %v5179_v48 = vpack.c.bf16 %v5176_v45, %v5176_v45  ;;  %v8968_v45 = vld [vmem:[#allocation9 + $0xa88] sm:$0xff]  }
0x1142   : > { %v5177_v50 = vpack.c.bf16 %v5174_v46, %v5174_v46  ;;  %5549 = vst [vmem:[#allocation2] sm:$0x1] %v9343_v16  ;;  %5551 = vst [vmem:[#allocation2 + $0x3] sm:$0x1] %v9343_v16  ;;  %5356 = vmatprep.mubr.bf16.mxu0 %v5178_v47  ;;  %v8969_v46 = vld [vmem:[#allocation9 + $0xad0] sm:$0xff]  }
0x1143   : > { %8332 = vmatmul.mubr.bf16.vlgmr.msra.gmra.mrb[64].mxu1 %v5179_v48  ;;  %v8971_v47 = vld [vmem:[#allocation9 + $0xa90] sm:$0xff]  }
0x1144   : > { %5357 = vmatmul.mubr.bf16.vlgmr.msra.gmra.mrb[60].mxu0 %v5177_v50  ;;  %8356 = vmatprep.mubr.msk.bf16.mxu1 %vm9344_vm7, %v9343_v16 }
0x1145   : > { %8337 = vmatprep.mubr.msk.f32.mxu0 %vm9344_vm7, %v9343_v16  ;;  %8341 = vmatpush3.bf16.msra.mxu1 %v8935_v7 }
0x1146   : > { %8342 = vmatprep.subr.bf16.mxu1 %v9343_v16 }
0x1149   : > { %8343 = vmatpush3.bf16.msra.mxu1 %v8938_v52 }
0x114a   : > { %8344 = vmatprep.subr.bf16.mxu1 %v9343_v16 }
0x114d   : > { %8345 = vmatpush3.bf16.msra.mxu1 %v8941_v54 }
0x114e   : > { %8346 = vmatprep.subr.bf16.mxu1 %v9343_v16 }
0x1151   : > { %8347 = vmatpush3.bf16.msra.mxu1 %v8944_v8  ;;  %v8979_v8 = vld [vmem:[#allocation9 + $0xb28] sm:$0xff]  }
0x1152   : > { %8348 = vmatprep.subr.bf16.mxu1 %v9343_v16 }
0x1155   : > { %8349 = vmatpush3.bf16.msra.mxu1 %v8947_v10  ;;  %v8982_v10 = vld [vmem:[#allocation9 + $0xb30] sm:$0xff]  }
0x1156   : > { %8350 = vmatprep.subr.bf16.mxu1 %v9343_v16 }
0x1159   : > { %8351 = vmatpush3.bf16.msra.mxu1 %v8950_v13  ;;  %v8985_v13 = vld [vmem:[#allocation9 + $0xb38] sm:$0xff]  }
0x115a   : > { %8352 = vmatprep.subr.bf16.mxu1 %v9343_v16 }
0x115d   : > { %8353 = vmatpush3.bf16.msra.mxu1 %v8953_v20  ;;  %v7334_v20 = vld [vmem:[#allocation6 + $0x18] ss:$0 sm:$0xff] }
0x115e   : > { %8354 = vmatprep.subr.bf16.mxu1 %v9343_v16 }
0x1161   : > { %8355 = vmatpush3.bf16.msra.mxu1 %v8954_v22  ;;  %v7323_v22 = vld [vmem:[#allocation8 + $0x17] ss:$0 sm:$0xff] }
0x1162   : > { %7899 = vmatprep.subr.bf16.mxu1 %v8963_v42  ;;  %v8990_v42 = vld [vmem:[#allocation9 + $0xb88] sm:$0xff]  }
0x1216   : > { %v5398_v55 = vpop.f32.mrb[64].mxu1 }
0x1217   : > { %v7840_v57 = vpop.f32.mrb[60].mxu0  ;;  %v8333_v58 = vpop.f32.mrb[65].mxu1 }
0x1218   : > { %v7841_v49 = vpop.f32.mrb[61].mxu0  ;;  %v5401_v53 = vpop.f32.mrb[66].mxu1 }
0x1219   : > { %v7842_v56 = vadd.f32 %v7841_v49, %v7840_v57  ;;  %v7843_v0 = vpop.f32.mrb[62].mxu0  ;;  %v8334_v59 = vpop.f32.mrb[67].mxu1 }
0x121a   : > { %v7844_v60 = vpop.f32.mrb[63].mxu0  ;;  %v8964_v0 = vld [vmem:[#allocation9 + $0xb00] sm:$0xff]  }
0x121b   : > { %v5399_v62 = vadd.f32 %v7842_v56, %v5398_v55 }
0x121d   : > { %8336 = vmatpush3.msk.msra.mxu0 %vm5407_vm10, %v5399_v62  ;;  %v8970_v62 = vld [vmem:[#allocation9 + $0xb10] sm:$0xff]  }
0x121e   : > { %8338 = vmatmul.mubr.msk.f32.vlgmr.msra.gmra.mrb[64].mxu0 %vm5404_vm11, %v9703_v18  ;;  %7857 = vmatprep.subr.bf16.mxu0 %v8931_v61  ;;  %v8967_v61 = vld [vmem:[#allocation9 + $0xb08] sm:$0xff]  }
0x121f   : > { %7858 = vmatpush3.bf16.msra.mxu0 %v8932_v4  ;;  %v8972_v4 = vld [vmem:[#allocation9 + $0xad8] sm:$0xff]  }
0x1220   : > { %7859 = vmatprep.subr.bf16.mxu0 %v8933_v63  ;;  %v8973_v63 = vld [vmem:[#allocation9 + $0xb18] sm:$0xff]  }
0x1223   : > { %7860 = vmatpush3.bf16.msra.mxu0 %v8934_v1  ;;  %v8974_v1 = vld [vmem:[#allocation9 + $0xa98] sm:$0xff]  }
0x1224   : > { %7861 = vmatprep.subr.bf16.mxu0 %v8936_v2  ;;  %v8975_v2 = vld [vmem:[#allocation9 + $0xae0] sm:$0xff]  }
0x1227   : > { %7862 = vmatpush3.bf16.msra.mxu0 %v8937_v3  ;;  %v8976_v3 = vld [vmem:[#allocation9 + $0xb20] sm:$0xff]  }
0x1228   : > { %7863 = vmatprep.subr.bf16.mxu0 %v8939_v5  ;;  %v8977_v5 = vld [vmem:[#allocation9 + $0xaa0] sm:$0xff]  }
0x122b   : > { %7864 = vmatpush3.bf16.msra.mxu0 %v8940_v6  ;;  %v8978_v6 = vld [vmem:[#allocation9 + $0xae8] sm:$0xff]  }
0x122c   : > { %7865 = vmatprep.subr.bf16.mxu0 %v8942_v9  ;;  %v8980_v9 = vld [vmem:[#allocation9 + $0xaa8] sm:$0xff]  }
0x122f   : > { %7866 = vmatpush3.bf16.msra.mxu0 %v8943_v19  ;;  %v8981_v19 = vld [vmem:[#allocation9 + $0xaf0] sm:$0xff]  }
0x1230   : > { %7867 = vmatprep.subr.bf16.mxu0 %v8945_v11  ;;  %v8983_v11 = vld [vmem:[#allocation9 + $0xab0] sm:$0xff]  }
0x1233   : > { %7868 = vmatpush3.bf16.msra.mxu0 %v8946_v12  ;;  %v8984_v12 = vld [vmem:[#allocation9 + $0xaf8] sm:$0xff]  }
0x1234   : > { %7869 = vmatprep.subr.bf16.mxu0 %v8948_v15  ;;  %v8986_v15 = vld [vmem:[#allocation9 + $0xab8] sm:$0xff]  }
0x1237   : > { %7870 = vmatpush3.bf16.msra.mxu0 %v8949_v14  ;;  %v8987_v14 = vld [vmem:[#allocation9 + $0xb80] sm:$0xff]  }
0x1238   : > { %7871 = vmatprep.subr.bf16.mxu0 %v8951_v17  ;;  %v7322_v17 = vld [vmem:[#allocation6 + $0x17] ss:$0 sm:$0xff] }
0x123b   : > { %7872 = vmatpush3.bf16.msra.mxu0 %v8952_v21 }
0x123c   : > { %8360 = vmatprep.subr.mxu0 %v9343_v16 }
0x12f1   : > { %v5477_v24 = vpop.f32.mrb[64].mxu0 }
0x12f2   : > { %v5489_v26 = vmul.f32 %v7296_v23, %v5477_v24  ;;  %v8339_v51 = vpop.f32.mrb[65].mxu0  ;;  %v7335_v24 = vld [vmem:[#allocation8 + $0x18] ss:$0 sm:$0xff] }
0x12f4   : > { %v5498_v27 = vadd.f32 %v7297_v25, %v5489_v26 }
0x12f6   : > { %v5499_v28 = vmax.f32 %v5498_v27, 0.0 }
0x12f8   : > { %5550 = vst [vmem:[#allocation2 + $0x1] sm:$0x3] %v5499_v28 }
0x12ff   : > { %v5553_v29 = vld [vmem:[#allocation2 + $0x1] sm:$0x3] }
0x1300   : > { %v5552_v30 = vld [vmem:[#allocation2] sm:$0x3]  ;;  %v5554_v31 = vld [vmem:[#allocation2 + $0x2] sm:$0x3]  ;;  %v5556_v32 = vpack.c.bf16 %v5553_v29, %v5553_v29 }
0x1301   : > { %v5555_v33 = vpack.c.bf16 %v5552_v30, %v5552_v30  ;;  %6065 = vst [vmem:[#allocation2] sm:$0x1] %v9343_v16  ;;  %v5557_v34 = vpack.c.bf16 %v5554_v31, %v5554_v31  ;;  %6067 = vst [vmem:[#allocation2 + $0x3] sm:$0x1] %v9343_v16  ;;  %v7336_v30 = vld [vmem:[#allocation6 + $0x19] ss:$0 sm:$0xff] }
0x1302   : > { %5734 = vmatprep.mubr.bf16.mxu0 %v5556_v32  ;;  %v7337_v32 = vld [vmem:[#allocation8 + $0x19] ss:$0 sm:$0xff] }
0x1303   : > { %8357 = vmatmul.mubr.bf16.vlgmr.msra.gmra.mrb[68].mxu1 %v5557_v34  ;;  %5735 = vmatmul.mubr.bf16.vlgmr.msra.gmra.mrb[68].mxu0 %v5555_v33 }
0x1304   : > { %8361 = vmatpush3.msk.msra.mxu0 %vm5407_vm10, %v9955_v40  ;;  %8362 = vmatprep.mubr.msk.f32.mxu0 %vm9344_vm7, %v9343_v16  ;;  %v8961_v40 = vld [vmem:[#allocation11 + $0xb0] sm:$0xff]  }
0x1305   : > { %8365 = vmatprep.subr.bf16.mxu0 %v9343_v16  ;;  %7900 = vmatpush3.bf16.msra.mxu1 %v8965_v43  ;;  %v8991_v43 = vld [vmem:[#allocation9 + $0xbc8] sm:$0xff]  }
0x1306   : > { %7901 = vmatprep.subr.bf16.mxu1 %v8966_v44  ;;  %v8992_v44 = vld [vmem:[#allocation9 + $0xb48] sm:$0xff]  }
0x1309   : > { %7902 = vmatpush3.bf16.msra.mxu1 %v8968_v45  ;;  %v8993_v45 = vld [vmem:[#allocation9 + $0xb90] sm:$0xff]  }
0x130a   : > { %7903 = vmatprep.subr.bf16.mxu1 %v8969_v46  ;;  %v8994_v46 = vld [vmem:[#allocation9 + $0xbd0] sm:$0xff]  }
0x130b   : > { %8363 = vmatmul.mubr.msk.f32.vlgmr.msra.gmra.mrb[66].mxu0 %vm5404_vm11, %v9703_v18  ;;  %v8960_v18 = vld [vmem:[#allocation11 + $0xa8] sm:$0xff]  }
0x130c   : > { %8366 = vmatpush3.bf16.msra.mxu0 %v8955_v35  ;;  %8381 = vmatprep.mubr.msk.bf16.mxu0 %vm9344_vm7, %v9343_v16  ;;  %v8988_v35 = vld [vmem:[#allocation9 + $0xbc0] sm:$0xff]  }
0x130d   : > { %8367 = vmatprep.subr.bf16.mxu0 %v9343_v16  ;;  %7904 = vmatpush3.bf16.msra.mxu1 %v8971_v47  ;;  %v8995_v47 = vld [vmem:[#allocation9 + $0xb50] sm:$0xff]  }
0x130e   : > { %7905 = vmatprep.subr.bf16.mxu1 %v8972_v4 }
0x1310   : > { %8368 = vmatpush3.bf16.msra.mxu0 %v8956_v36 }
0x1311   : > { %8369 = vmatprep.subr.bf16.mxu0 %v9343_v16  ;;  %7906 = vmatpush3.bf16.msra.mxu1 %v8974_v1 }
0x1312   : > { %7907 = vmatprep.subr.bf16.mxu1 %v8975_v2 }
0x1314   : > { %8370 = vmatpush3.bf16.msra.mxu0 %v8957_v37 }
0x1315   : > { %8371 = vmatprep.subr.bf16.mxu0 %v9343_v16  ;;  %7908 = vmatpush3.bf16.msra.mxu1 %v8977_v5 }
0x1316   : > { %7909 = vmatprep.subr.bf16.mxu1 %v8978_v6 }
0x1318   : > { %8372 = vmatpush3.bf16.msra.mxu0 %v8958_v38 }
0x1319   : > { %8373 = vmatprep.subr.bf16.mxu0 %v9343_v16  ;;  %7910 = vmatpush3.bf16.msra.mxu1 %v8980_v9 }
0x131a   : > { %7911 = vmatprep.subr.bf16.mxu1 %v8981_v19 }
0x131c   : > { %8374 = vmatpush3.bf16.msra.mxu0 %v8959_v39 }
0x131d   : > { %8375 = vmatprep.subr.bf16.mxu0 %v9343_v16  ;;  %7912 = vmatpush3.bf16.msra.mxu1 %v8983_v11 }
0x131e   : > { %7913 = vmatprep.subr.bf16.mxu1 %v8984_v12 }
0x1320   : > { %8376 = vmatpush3.bf16.msra.mxu0 %v8960_v18 }
0x1321   : > { %8377 = vmatprep.subr.bf16.mxu0 %v9343_v16  ;;  %7914 = vmatpush3.bf16.msra.mxu1 %v8986_v15 }
0x1322   : > { %7930 = vmatprep.subr.bf16.mxu1 %v8987_v14 }
0x1324   : > { %8378 = vmatpush3.bf16.msra.mxu0 %v8961_v40 }
0x1325   : > { %8379 = vmatprep.subr.bf16.mxu0 %v9343_v16 }
0x1328   : > { %8380 = vmatpush3.bf16.msra.mxu0 %v8962_v41  ;;  %v8989_v41 = vld [vmem:[#allocation9 + $0xb40] sm:$0xff]  }
0x1329   : > { %8385 = vmatprep.subr.bf16.mxu0 %v9343_v16 }
0x13d6   : > { %v5776_v48 = vpop.f32.mrb[68].mxu1  ;;  %v7873_v50 = vpop.f32.mrb[68].mxu0 }
0x13d7   : > { %v8358_v7 = vpop.f32.mrb[69].mxu1  ;;  %v7874_v52 = vpop.f32.mrb[69].mxu0 }
0x13d8   : > { %v5779_v54 = vpop.f32.mrb[70].mxu1  ;;  %v7875_v55 = vadd.f32 %v7874_v52, %v7873_v50  ;;  %v7876_v57 = vpop.f32.mrb[70].mxu0  ;;  %v8997_v50 = vld [vmem:[#allocation9 + $0xbd8] sm:$0xff]   ;;  %v8999_v52 = vld [vmem:[#allocation9 + $0xba0] sm:$0xff]  }
0x13d9   : > { %v8359_v58 = vpop.f32.mrb[71].mxu1  ;;  %v7877_v49 = vpop.f32.mrb[71].mxu0  ;;  %v8998_v7 = vld [vmem:[#allocation9 + $0xb58] sm:$0xff]   ;;  %v9000_v54 = vld [vmem:[#allocation9 + $0xbe0] sm:$0xff]   ;;  %v9002_v57 = vld [vmem:[#allocation9 + $0xba8] sm:$0xff]  }
0x13da   : > { %v5777_v53 = vadd.f32 %v7875_v55, %v5776_v48  ;;  %v8996_v48 = vld [vmem:[#allocation9 + $0xb98] sm:$0xff]   ;;  %v9001_v55 = vld [vmem:[#allocation9 + $0xb60] sm:$0xff]   ;;  %v9003_v58 = vld [vmem:[#allocation9 + $0xbe8] sm:$0xff]  }
0x13db   : > { %v9004_v49 = vld [vmem:[#allocation9 + $0xb68] sm:$0xff]  }
0x13dc   : > { %v5790_v21 = vmul.f32 %v7322_v17, %v5777_v53  ;;  %v9005_v53 = vld [vmem:[#allocation9 + $0xbb0] sm:$0xff]  }
0x13de   : > { %v5869_v56 = vpop.f32.mrb[66].mxu0  ;;  %v5799_v27 = vadd.f32 %v7323_v22, %v5790_v21 }
0x13df   : > { %v5873_v59 = vpack.c.bf16 %v5869_v56, %v5869_v56  ;;  %v8364_v60 = vpop.f32.mrb[67].mxu0  ;;  %v9006_v56 = vld [vmem:[#allocation9 + $0xbf0] sm:$0xff]  }
0x13e0   : > { %v9009_v60 = vld [vmem:[#allocation9 + $0xbf8] sm:$0xff]  }
0x13e1   : > { %8382 = vmatmul.mubr.bf16.vlgmr.msra.gmra.mrb[72].mxu0 %v5873_v59  ;;  %v9008_v59 = vld [vmem:[#allocation9 + $0xbb8] sm:$0xff]  }
0x13e2   : > { %8386 = vmatpush3.bf16.msra.mxu0 %v8964_v0  ;;  %8401 = vmatprep.mubr.msk.bf16.mxu0 %vm9344_vm7, %v9343_v16  ;;  %v9007_v0 = vld [vmem:[#allocation9 + $0xb70] sm:$0xff]  }
0x13e3   : > { %8387 = vmatprep.subr.bf16.mxu0 %v9343_v16 }
0x13e6   : > { %8388 = vmatpush3.bf16.msra.mxu0 %v8967_v61  ;;  %v9010_v61 = vld [vmem:[#allocation9 + $0xb78] sm:$0xff]  }
0x13e7   : > { %8389 = vmatprep.subr.bf16.mxu0 %v9343_v16 }
0x13ea   : > { %8390 = vmatpush3.bf16.msra.mxu0 %v8970_v62 }
0x13eb   : > { %8391 = vmatprep.subr.bf16.mxu0 %v9343_v16 }
0x13ee   : > { %8392 = vmatpush3.bf16.msra.mxu0 %v8973_v63 }
0x13ef   : > { %8393 = vmatprep.subr.bf16.mxu0 %v9343_v16 }
0x13f2   : > { %8394 = vmatpush3.bf16.msra.mxu0 %v8976_v3 }
0x13f3   : > { %8395 = vmatprep.subr.bf16.mxu0 %v9343_v16 }
0x13f6   : > { %8396 = vmatpush3.bf16.msra.mxu0 %v8979_v8  ;;  %v7362_v8 = vld [vmem:[#allocation6 + $0x1a] ss:$0 sm:$0xff] }
0x13f7   : > { %8397 = vmatprep.subr.bf16.mxu0 %v9343_v16 }
0x13fa   : > { %8398 = vmatpush3.bf16.msra.mxu0 %v8982_v10  ;;  %v7363_v10 = vld [vmem:[#allocation8 + $0x1a] ss:$0 sm:$0xff] }
0x13fb   : > { %8399 = vmatprep.subr.bf16.mxu0 %v9343_v16 }
0x13fe   : > { %8400 = vmatpush3.bf16.msra.mxu0 %v8985_v13 }
0x13ff   : > { %8405 = vmatprep.subr.bf16.mxu0 %v9343_v16 }
0x14b4   : > { %v5973_v23 = vpop.f32.mrb[72].mxu0 }
0x14b5   : > { %v5987_v25 = vmul.f32 %v7334_v20, %v5973_v23  ;;  %v8383_v26 = vpop.f32.mrb[73].mxu0  ;;  %v9011_v23 = vld [vmem:[#allocation14] sm:$0xff]  }
0x14b6   : > { %v5976_v51 = vpop.f32.mrb[74].mxu0  ;;  %v9014_v26 = vld [vmem:[#allocation14 + $0x18] sm:$0xff]  }
0x14b7   : > { %v5996_v28 = vadd.f32 %v7335_v24, %v5987_v25  ;;  %v8384_v29 = vpop.f32.mrb[75].mxu0  ;;  %v9012_v24 = vld [vmem:[#allocation14 + $0x8] sm:$0xff]   ;;  %v9013_v25 = vld [vmem:[#allocation14 + $0x10] sm:$0xff]   ;;  %v9015_v51 = vld [vmem:[#allocation14 + $0x20] sm:$0xff]  }
0x14b8   : > { %v9018_v29 = vld [vmem:[#allocation14 + $0x38] sm:$0xff]  }
0x14b9   : > { %v10004_v31 = vadd.f32 %v5996_v28, %v5799_v27  ;;  %v9016_v27 = vld [vmem:[#allocation14 + $0x28] sm:$0xff]   ;;  %v9017_v28 = vld [vmem:[#allocation14 + $0x30] sm:$0xff]  }
0x14bb   : > { %v6006_v33 = vmul.f32 %v7336_v30, %v10004_v31 }
0x14bd   : > { %v6015_v34 = vadd.f32 %v7337_v32, %v6006_v33 }
0x14bf   : > { %6066 = vst [vmem:[#allocation2 + $0x1] sm:$0x3] %v6015_v34 }
0x14c6   : > { %v6069_v36 = vld [vmem:[#allocation2 + $0x1] sm:$0x3] }
0x14c7   : > { %v6070_v37 = vld [vmem:[#allocation2 + $0x2] sm:$0x3]  ;;  %v6068_v38 = vld [vmem:[#allocation2] sm:$0x3]  ;;  %v6072_v39 = vpack.c.bf16 %v6069_v36, %v6069_v36 }
0x14c8   : > { %v6073_v18 = vpack.c.bf16 %v6070_v37, %v6070_v37  ;;  %6368 = vst [vmem:[#allocation2 + $0x3] sm:$0x1] %v9343_v16  ;;  %v6071_v40 = vpack.c.bf16 %v6068_v38, %v6068_v38  ;;  %6366 = vst [vmem:[#allocation2] sm:$0x1] %v9343_v16 }
0x14c9   : > { %6250 = vmatprep.mubr.bf16.mxu1 %v6072_v39  ;;  %v7388_v39 = vld [vmem:[#allocation6 + $0x1b] ss:$0 sm:$0xff] }
0x14ca   : > { %8402 = vmatmul.mubr.bf16.vlgmr.msra.gmra.mrb[76].mxu0 %v6073_v18  ;;  %6251 = vmatmul.mubr.bf16.vlgmr.msra.gmra.mrb[72].mxu1 %v6071_v40 }
0x14cb   : > { %8406 = vmatpush3.bf16.msra.mxu0 %v8988_v35  ;;  %7931 = vmatpush3.bf16.msra.mxu1 %v8989_v41  ;;  %v7389_v41 = vld [vmem:[#allocation8 + $0x1b] ss:$0 sm:$0xff] }
0x14cc   : > { %8407 = vmatprep.subr.bf16.mxu0 %v9343_v16  ;;  %7932 = vmatprep.subr.bf16.mxu1 %v8990_v42 }
0x14cd   : > { %8421 = vmatprep.mubr.msk.bf16.mxu0 %vm9344_vm7, %v9343_v16 }
0x14cf   : > { %8408 = vmatpush3.bf16.msra.mxu0 %v8991_v43  ;;  %7933 = vmatpush3.bf16.msra.mxu1 %v8992_v44 }
0x14d0   : > { %8409 = vmatprep.subr.bf16.mxu0 %v9343_v16  ;;  %7934 = vmatprep.subr.bf16.mxu1 %v8993_v45 }
0x14d3   : > { %8410 = vmatpush3.bf16.msra.mxu0 %v8994_v46  ;;  %7935 = vmatpush3.bf16.msra.mxu1 %v8995_v47 }
0x14d4   : > { %8411 = vmatprep.subr.bf16.mxu0 %v9343_v16  ;;  %7936 = vmatprep.subr.bf16.mxu1 %v8996_v48 }
0x14d7   : > { %8412 = vmatpush3.bf16.msra.mxu0 %v8997_v50  ;;  %7937 = vmatpush3.bf16.msra.mxu1 %v8998_v7 }
0x14d8   : > { %8413 = vmatprep.subr.bf16.mxu0 %v9343_v16  ;;  %7938 = vmatprep.subr.bf16.mxu1 %v8999_v52 }
0x14db   : > { %8414 = vmatpush3.bf16.msra.mxu0 %v9000_v54  ;;  %7939 = vmatpush3.bf16.msra.mxu1 %v9001_v55  ;;  %v6644_v55 = vld [vmem:[#allocation15] sm:$0x1] }
0x14dc   : > { %8415 = vmatprep.subr.bf16.mxu0 %v9343_v16  ;;  %7940 = vmatprep.subr.bf16.mxu1 %v9002_v57 }
0x14df   : > { %8416 = vmatpush3.bf16.msra.mxu0 %v9003_v58  ;;  %7941 = vmatpush3.bf16.msra.mxu1 %v9004_v49 }
0x14e0   : > { %8417 = vmatprep.subr.bf16.mxu0 %v9343_v16  ;;  %7942 = vmatprep.subr.bf16.mxu1 %v9005_v53 }
0x14e3   : > { %8418 = vmatpush3.bf16.msra.mxu0 %v9006_v56  ;;  %7943 = vmatpush3.bf16.msra.mxu1 %v9007_v0 }
0x14e4   : > { %8419 = vmatprep.subr.bf16.mxu0 %v9343_v16  ;;  %7944 = vmatprep.subr.bf16.mxu1 %v9008_v59 }
0x14e7   : > { %8420 = vmatpush3.bf16.msra.mxu0 %v9009_v60  ;;  %7945 = vmatpush3.bf16.msra.mxu1 %v9010_v61 }
0x14e8   : > { %8425 = vmatprep.subr.bf16.mxu1 %v9343_v16 }
0x159d   : > { %v6292_v62 = vpop.f32.mrb[76].mxu0  ;;  %v7915_v4 = vpop.f32.mrb[72].mxu1 }
0x159e   : > { %v8403_v63 = vpop.f32.mrb[77].mxu0  ;;  %v7916_v1 = vpop.f32.mrb[73].mxu1 }
0x159f   : > { %v6295_v2 = vpop.f32.mrb[78].mxu0  ;;  %v7917_v3 = vadd.f32 %v7916_v1, %v7915_v4  ;;  %v7918_v5 = vpop.f32.mrb[74].mxu1 }
0x15a0   : > { %v8404_v6 = vpop.f32.mrb[79].mxu0  ;;  %v7919_v9 = vpop.f32.mrb[75].mxu1 }
0x15a1   : > { %v6293_v19 = vadd.f32 %v7917_v3, %v6292_v62 }
0x15a3   : > { %v6306_v11 = vmul.f32 %v7362_v8, %v6293_v19 }
0x15a5   : > { %v6315_v12 = vadd.f32 %v7363_v10, %v6306_v11 }
0x15a7   : > { %v6316_v13 = vmax.f32 %v6315_v12, 0.0 }
0x15a9   : > { %6367 = vst [vmem:[#allocation2 + $0x1] sm:$0x3] %v6316_v13 }
0x15b0   : > { %v6370_v15 = vld [vmem:[#allocation2 + $0x1] sm:$0x3] }
0x15b1   : > { %v6371_v14 = vld [vmem:[#allocation2 + $0x2] sm:$0x3]  ;;  %v6369_v17 = vld [vmem:[#allocation2] sm:$0x3]  ;;  %v6373_v20 = vpack.c.bf16 %v6370_v15, %v6370_v15 }
0x15b2   : > { %v6374_v21 = vpack.c.bf16 %v6371_v14, %v6371_v14  ;;  %v6372_v22 = vpack.c.bf16 %v6369_v17, %v6369_v17 }
0x15b3   : > { %6551 = vmatprep.mubr.bf16.mxu1 %v6373_v20 }
0x15b4   : > { %8422 = vmatmul.mubr.bf16.vlgmr.msra.gmra.mrb[80].mxu0 %v6374_v21  ;;  %6552 = vmatmul.mubr.bf16.vlgmr.msra.gmra.mrb[76].mxu1 %v6372_v22 }
0x15b5   : > { %8426 = vmatpush3.bf16.msra.mxu1 %v9011_v23  ;;  %8441 = vmatprep.mubr.msk.bf16.mxu1 %vm9344_vm7, %v9343_v16 }
0x15b6   : > { %8427 = vmatprep.subr.bf16.mxu1 %v9343_v16 }
0x15b9   : > { %8428 = vmatpush3.bf16.msra.mxu1 %v9012_v24 }
0x15ba   : > { %8429 = vmatprep.subr.bf16.mxu1 %v9343_v16 }
0x15bd   : > { %8430 = vmatpush3.bf16.msra.mxu1 %v9013_v25 }
0x15be   : > { %8431 = vmatprep.subr.bf16.mxu1 %v9343_v16 }
0x15c1   : > { %8432 = vmatpush3.bf16.msra.mxu1 %v9014_v26 }
0x15c2   : > { %8433 = vmatprep.subr.bf16.mxu1 %v9343_v16 }
0x15c5   : > { %8434 = vmatpush3.bf16.msra.mxu1 %v9015_v51 }
0x15c6   : > { %8435 = vmatprep.subr.bf16.mxu1 %v9343_v16 }
0x15c9   : > { %8436 = vmatpush3.bf16.msra.mxu1 %v9016_v27 }
0x15ca   : > { %8437 = vmatprep.subr.bf16.mxu1 %v9343_v16 }
0x15cd   : > { %8438 = vmatpush3.bf16.msra.mxu1 %v9017_v28 }
0x15ce   : > { %8439 = vmatprep.subr.bf16.mxu1 %v9343_v16 }
0x15d1   : > { %8440 = vmatpush3.bf16.msra.mxu1 %v9018_v29 }
0x1687   : > { %v6593_v30 = vpop.f32.mrb[80].mxu0  ;;  %v7946_v32 = vpop.f32.mrb[76].mxu1 }
0x1688   : > { %v8423_v33 = vpop.f32.mrb[81].mxu0  ;;  %v7947_v34 = vpop.f32.mrb[77].mxu1 }
0x1689   : > { %v6596_v35 = vpop.f32.mrb[82].mxu0  ;;  %v7948_v36 = vadd.f32 %v7947_v34, %v7946_v32  ;;  %v7949_v37 = vpop.f32.mrb[78].mxu1 }
0x168a   : > { %v8424_v38 = vpop.f32.mrb[83].mxu0  ;;  %v7950_v18 = vpop.f32.mrb[79].mxu1 }
0x168b   : > { %v6594_v40 = vadd.f32 %v7948_v36, %v6593_v30 }
0x168d   : > { %v6607_v42 = vmul.f32 %v7388_v39, %v6594_v40 }
0x168f   : > { %v6616_v43 = vadd.f32 %v7389_v41, %v6607_v42 }
0x1691   : > { %v6617_v16 = vadd.f32 %v6616_v43, %v10004_v31 }
0x1693   : > { %v6619_v44 = vsel %vm6618_vm12, %v6617_v16, 0.0 }
0x1694   : > { %v6620_v45 = vrot.slane %v6619_v44, 4 }
0x1696   : > { %v6621_v46 = vadd.f32 %v6620_v45, %v6619_v44 }
0x1698   : > { %v6622_v47 = vrot.slane %v6621_v46, 2 }
0x169a   : > { %v6623_v48 = vadd.f32 %v6622_v47, %v6621_v46 }
0x169c   : > { %v6624_v50 = vrot.slane %v6623_v48, 1 }
0x169e   : > { %v6625_v7 = vadd.f32 %v6624_v50, %v6623_v48 }
0x16a0   : > { %v6626_v52 = vmul.f32 0.5, %v6625_v7 }
0x16a2   : > { %v6627_v54 = vpack.c.bf16 %v6626_v52, %v6626_v52 }
0x16a4   : > { %8442 = vmatmul.mubr.bf16.vlgmr.msra.gmra.mrb[80].mxu1 %v6627_v54 }
0x1777   : > { %v6727_v57 = vpop.f32.mrb[80].mxu1 }
0x1778   : > { %v6728_v58 = vadd.f32 %v6727_v57, %v6644_v55  ;;  %v8443_v49 = vpop.f32.mrb[81].mxu1 }
0x1779   : > { %v6730_v31 = vpop.f32.mrb[82].mxu1 }
0x177a   : > { %6733 = vst [vmem:[%s422_s22] sm:$0x1] %v6728_v58  ;;  %v8444_v53 = vpop.f32.mrb[83].mxu1 }
0x177b   : > { %9258 = shalt.err (!%p9255_p9)
}
0x177c   : > { %s9259_s17 = scalar_lea.hbm %s10034_s23, 16  ;;  %s9263_s16 = scalar_lea.hbm %s10086_s8, 32 }
0x177d   : > { %p9260_p4 = scmp.ne.s32.totalorder %s10034_s23, %s9259_s17  ;;  %p9264_p5 = scmp.lt.u32.totalorder %s10034_s23, %s10086_s8 }
0x177e   : > { %p9265_p2 = scmp.lt.u32.totalorder %s9263_s16, %s9259_s17  ;;  %p9267_p10 = scmp.lt.u32.totalorder %s9259_s17, %s10034_s23 }
0x177f   : > { %p9261_p3 = pnand %p9260_p4, %p10113_p1 }
0x1780   : > { %p9266_p7 = por %p9265_p2, %p9264_p5 }
0x1781   : > { %p9262_p0 = pneg %p9261_p3 }
0x1782   : > { %p9268_p11 = por %p9267_p10, %p9266_p7 }
0x1784   : > { %p9269_p12 = pnand %p9268_p11, %p9262_p0 }
0x1786   : > { %9272 = shalt.err (!%p9269_p12)
}
0x1787   : > { %8505 = dma.vmem_to_hbm [thread:$0]  (%p10113_p1), %s10036_s21, 16, %s10034_s23, %s6735_s13  }
0x1788 PF: > { %s6759_s18 = sand.u32 1, %s9315_s27   ;;  %p10114_p13 = scmp.ne.s32.totalorder %s10102_s10, 0 }
0x1789   : > { %p10115_p8 = scmp.ge.s32.totalorder %s9327_s30, 2  ;;  %s6760_s20 = scalar_lea.sflag [#allocation5], %s6759_s18 }
0x178b   : > { %p8534_p6 = pnand %p10115_p8, %p10114_p13 }
0x178d   : > { %9310 = dma.done.wait (!%p8534_p6), %s6760_s20, 16  }
0x178e   : > { %9312 = vsyncadd (!%p8534_p6), %s6760_s20, 4294967280  ;;  %p25_p9 = scmp.ge.s32.totalorder %s9600_s15, 4   ;;  %s10116_s27 = smov %s9319_s28 }
0x178f   : > { %s10117_s28 = smov %s9323_s29  ;;  %s10118_s29 = smov %s9612_s9 }
0x1790   : > { %s10119_s30 = smov %s9600_s15  ;;  %27 = sbr.rel (!%p25_p9) target bundleno = 11 (0xb), region = 196 }
0x1797   :  { %6764 = vsyncpa [#allocation4], 1 }
0x1798   :  { %6766 = vsyncpa [#allocation4 + $0x1], 1 }
0x1799   :  { %6767 = vsyncpa [#allocation7], 1 }
0x179a   :  { %6768 = vsyncpa [#allocation10], 1 }
0x179b   :  { %6769 = vsyncpa [#allocation13], 1 }
0x179c   :  { %6770 = vsyncpa [#allocation16], 1 }
0x179d   :  { %6771 = vsyncpa [#allocation5], 1 }
0x179e   :  { %6773 = vsyncpa [#allocation5 + $0x1], 1 }

</bundles_post_ra>
